<compile_context>
chip_gen: v6e
topology: v6e:2x2x1
jax: 0.10.0
libtpu: 0.0.40
codegen_flags: <defaults>
</compile_context>

<pallas_src>
import functools

import jax
import jax.numpy as jnp
from jax.experimental import pallas as pl
from jax.experimental.pallas import tpu as pltpu

_EPS = 1e-5
_NEG_INF = -1e9


def _round_up(n, m):
    return (n + m - 1) // m * m


_VMEM_LIMIT_CACHE = [None]


def _vmem_limit_bytes():
    # ~3/4 of physical VMEM, capped at 96 MiB (v5e/v6e: 128 MiB -> 96 MiB; v7x: 64 -> 48).
    if _VMEM_LIMIT_CACHE[0] is None:
        try:
            cap = int(pltpu.get_tpu_info().vmem_capacity_bytes)
        except Exception:
            cap = 64 * 1024 * 1024
        _VMEM_LIMIT_CACHE[0] = int(
            min(max(cap * 3 // 4, 32 * 1024 * 1024), 96 * 1024 * 1024))
    return _VMEM_LIMIT_CACHE[0]


def _compiler_params(n_axes=1):
    return pltpu.CompilerParams(
        dimension_semantics=("parallel",) * n_axes,
        vmem_limit_bytes=_vmem_limit_bytes())


def _layernorm(x, gamma, beta):
    mean = jnp.mean(x, axis=-1, keepdims=True)
    c = x - mean
    var = jnp.mean(c * c, axis=-1, keepdims=True)
    return c * jax.lax.rsqrt(var + _EPS) * gamma + beta


def _silu(x):
    return x * jax.nn.sigmoid(x)


# ---------------------------------------------------------------------------
# Feed-forward module: LayerNorm -> Linear -> SiLU -> Linear, fused with the
# 0.5 * ff(x) + x residual (and optionally the block's final LayerNorm).
# Row-tiled over B*T with a fixed 256-row tile (padded), weights resident.
# ---------------------------------------------------------------------------
def _ff_body(x_ref, g_ref, b_ref, w1_ref, b1_ref, w2_ref, b2_ref):
    x = x_ref[...].astype(jnp.float32)                                 # (tR, F)
    y = _layernorm(x, g_ref[...], b_ref[...])
    h = jnp.dot(y.astype(jnp.bfloat16), w1_ref[...],
                preferred_element_type=jnp.float32) + b1_ref[...]      # (tR, H)
    h = _silu(h)
    o = jnp.dot(h.astype(jnp.bfloat16), w2_ref[...],
                preferred_element_type=jnp.float32) + b2_ref[...]      # (tR, F)
    return 0.5 * o + x                                                 # scaled residual


def _ff_kernel(x_ref, g_ref, b_ref, w1_ref, b1_ref, w2_ref, b2_ref, o_ref):
    o_ref[...] = _ff_body(x_ref, g_ref, b_ref, w1_ref, b1_ref,
                          w2_ref, b2_ref).astype(o_ref.dtype)


def _ff_final_ln_kernel(x_ref, g_ref, b_ref, w1_ref, b1_ref, w2_ref, b2_ref,
                        g2_ref, bb2_ref, o_ref):
    o = _ff_body(x_ref, g_ref, b_ref, w1_ref, b1_ref, w2_ref, b2_ref)
    o_ref[...] = _layernorm(o, g2_ref[...], bb2_ref[...]).astype(o_ref.dtype)


def ff_forward(x, p, final_ln=None):
    B, T, F = x.shape
    N = B * T
    H = p["w1"].shape[1]
    x2 = x.reshape(N, F)

    tR = min(256, _round_up(N, 8))     # fixed MXU-friendly row tile
    Np = _round_up(N, tR)
    if Np != N:
        x2 = jnp.pad(x2, ((0, Np - N), (0, 0)))  # padded rows produce masked-off garbage

    args = [x2, p["ln_g"], p["ln_b"], p["w1"], p["b1"], p["w2"], p["b2"]]
    in_specs = [
        pl.BlockSpec((tR, F), lambda i: (i, 0)),
        pl.BlockSpec((1, F), lambda i: (0, 0)),
        pl.BlockSpec((1, F), lambda i: (0, 0)),
        pl.BlockSpec((F, H), lambda i: (0, 0)),
        pl.BlockSpec((1, H), lambda i: (0, 0)),
        pl.BlockSpec((H, F), lambda i: (0, 0)),
        pl.BlockSpec((1, F), lambda i: (0, 0)),
    ]
    kernel = _ff_kernel
    if final_ln is not None:
        args += [final_ln["g"], final_ln["b"]]
        in_specs += [pl.BlockSpec((1, F), lambda i: (0, 0)),
                     pl.BlockSpec((1, F), lambda i: (0, 0))]
        kernel = _ff_final_ln_kernel

    out = pl.pallas_call(
        kernel,
        out_shape=jax.ShapeDtypeStruct((Np, F), x.dtype),
        grid_spec=pltpu.PrefetchScalarGridSpec(
            num_scalar_prefetch=0,
            grid=(Np // tR,),
            in_specs=in_specs,
            out_specs=pl.BlockSpec((tR, F), lambda i: (i, 0)),
        ),
        compiler_params=_compiler_params(1),
        cost_estimate=pl.CostEstimate(
            flops=int(4 * Np * F * H),
            transcendentals=int(Np * H),
            bytes_accessed=int(2 * Np * F * 2 + 2 * F * H * 2 + (H + 5 * F) * 4)),
    )(*args)
    if Np != N:
        out = out[:N]
    return out.reshape(B, T, F)


# ---------------------------------------------------------------------------
# MHSA module: LayerNorm -> multi-head self-attention (additive key-padding
# bias) -> out-proj, fused with the residual. Q/K/V and out-proj are full-width
# (T,F)@(F,F) matmuls (full MXU lanes); only the (T,T) logits/probs step is
# per-head (dh-wide lane slices).
# ---------------------------------------------------------------------------
def _mhsa_kernel(x_ref, kbias_ref, g_ref, b_ref, wq_ref, bq_ref, wk_ref, bk_ref,
                 wv_ref, bv_ref, wo_ref, bo_ref, o_ref, *, n_heads):
    x = x_ref[0].astype(jnp.float32)                       # (T, F)
    T, F = x.shape
    dh = F // n_heads
    scale = 1.0 / float(dh) ** 0.5

    y = _layernorm(x, g_ref[...], b_ref[...])
    yb = y.astype(jnp.bfloat16)
    kbias = kbias_ref[0]                                   # (1, T) additive key bias

    q = jnp.dot(yb, wq_ref[...], preferred_element_type=jnp.float32) + bq_ref[...]
    k = jnp.dot(yb, wk_ref[...], preferred_element_type=jnp.float32) + bk_ref[...]
    v = jnp.dot(yb, wv_ref[...], preferred_element_type=jnp.float32) + bv_ref[...]

    ctx_parts = []
    for h in range(n_heads):                               # static unroll over heads
        sl = slice(h * dh, (h + 1) * dh)
        qh = q[:, sl].astype(jnp.bfloat16)
        kh = k[:, sl].astype(jnp.bfloat16)
        vh = v[:, sl].astype(jnp.bfloat16)
        logits = jax.lax.dot_general(
            qh, kh, (((1,), (1,)), ((), ())),
            preferred_element_type=jnp.float32) * scale + kbias          # (T, T)
        m = jnp.max(logits, axis=-1, keepdims=True)
        e = jnp.exp(logits - m)
        probs = e * pl.reciprocal(jnp.sum(e, axis=-1, keepdims=True), approx=True)
        ctx_parts.append(jnp.dot(probs.astype(jnp.bfloat16), vh,
                                 preferred_element_type=jnp.float32))    # (T, dh)
    ctx = jnp.concatenate(ctx_parts, axis=-1)              # (T, F) = concat(heads)
    out = jnp.dot(ctx.astype(jnp.bfloat16), wo_ref[...],
                  preferred_element_type=jnp.float32) + bo_ref[...]
    o_ref[0] = (out + x).astype(o_ref.dtype)


def mhsa_forward(x, key_bias, p, n_heads):
    B, T, F = x.shape
    in_specs = [
        pl.BlockSpec((1, T, F), lambda b: (b, 0, 0)),
        pl.BlockSpec((1, 1, T), lambda b: (b, 0, 0)),
        pl.BlockSpec((1, F), lambda b: (0, 0)),
        pl.BlockSpec((1, F), lambda b: (0, 0)),
        pl.BlockSpec((F, F), lambda b: (0, 0)),
        pl.BlockSpec((1, F), lambda b: (0, 0)),
        pl.BlockSpec((F, F), lambda b: (0, 0)),
        pl.BlockSpec((1, F), lambda b: (0, 0)),
        pl.BlockSpec((F, F), lambda b: (0, 0)),
        pl.BlockSpec((1, F), lambda b: (0, 0)),
        pl.BlockSpec((F, F), lambda b: (0, 0)),
        pl.BlockSpec((1, F), lambda b: (0, 0)),
    ]
    out = pl.pallas_call(
        functools.partial(_mhsa_kernel, n_heads=n_heads),
        out_shape=jax.ShapeDtypeStruct((B, T, F), x.dtype),
        grid_spec=pltpu.PrefetchScalarGridSpec(
            num_scalar_prefetch=0, grid=(B,),
            in_specs=in_specs,
            out_specs=pl.BlockSpec((1, T, F), lambda b: (b, 0, 0)),
        ),
        compiler_params=_compiler_params(1),
        cost_estimate=pl.CostEstimate(
            flops=int(B * (8 * T * F * F + 4 * T * T * F)),
            transcendentals=int(B * n_heads * T * T),
            bytes_accessed=int(2 * B * T * F * 2 + 4 * F * F * 2 + 5 * F * 4)),
    )(x, key_bias, p["ln_g"], p["ln_b"], p["wq"], p["bq"], p["wk"], p["bk"],
      p["wv"], p["bv"], p["wo"], p["bo"])
    return out


# ---------------------------------------------------------------------------
# Convolution module: LayerNorm -> Linear(F,2F) -> GLU -> depthwise Conv1d(K)
# -> BatchNorm(eval, folded affine) -> SiLU -> Linear(F,F), fused with the
# residual. The depthwise conv is K pltpu.roll sublane shifts (XLU) + VPU FMAs,
# with the (K-1)/2 wrapped edge rows masked to zero (exact zero padding).
# ---------------------------------------------------------------------------
def _conv_kernel(x_ref, g_ref, b_ref, w1_ref, b1_ref, dw_ref, dwb_ref,
                 bns_ref, bnsh_ref, w2_ref, b2_ref, o_ref):
    x = x_ref[0].astype(jnp.float32)                       # (T, F)
    T, F = x.shape
    K = dw_ref.shape[0]
    pad = (K - 1) // 2

    y = _layernorm(x, g_ref[...], b_ref[...])
    h = jnp.dot(y.astype(jnp.bfloat16), w1_ref[...],
                preferred_element_type=jnp.float32) + b1_ref[...]      # (T, 2F)
    u = h[:, :F] * jax.nn.sigmoid(h[:, F:])                # GLU -> (T, F)

    t_idx = jax.lax.broadcasted_iota(jnp.int32, (T, 1), 0)
    acc = jnp.broadcast_to(dwb_ref[...], (T, F)).astype(jnp.float32)
    for j in range(K):                                     # static unroll over taps
        off = j - pad
        if off == 0:
            shifted = u
        else:
            shifted = pltpu.roll(u, shift=(-off) % T, axis=0)   # shifted[t] = u[t+off]
            valid = jnp.logical_and(t_idx + off >= 0, t_idx + off < T)
            shifted = jnp.where(valid, shifted, 0.0)             # zero padding at edges
        acc = acc + shifted * dw_ref[j]

    v = acc * bns_ref[...] + bnsh_ref[...]                 # BatchNorm1d (eval) affine
    v = _silu(v)
    out = jnp.dot(v.astype(jnp.bfloat16), w2_ref[...],
                  preferred_element_type=jnp.float32) + b2_ref[...]
    o_ref[0] = (out + x).astype(o_ref.dtype)


def conv_forward(x, p):
    B, T, F = x.shape
    K = p["dw"].shape[0]
    in_specs = [
        pl.BlockSpec((1, T, F), lambda b: (b, 0, 0)),
        pl.BlockSpec((1, F), lambda b: (0, 0)),
        pl.BlockSpec((1, F), lambda b: (0, 0)),
        pl.BlockSpec((F, 2 * F), lambda b: (0, 0)),
        pl.BlockSpec((1, 2 * F), lambda b: (0, 0)),
        pl.BlockSpec((K, 1, F), lambda b: (0, 0, 0)),
        pl.BlockSpec((1, F), lambda b: (0, 0)),
        pl.BlockSpec((1, F), lambda b: (0, 0)),
        pl.BlockSpec((1, F), lambda b: (0, 0)),
        pl.BlockSpec((F, F), lambda b: (0, 0)),
        pl.BlockSpec((1, F), lambda b: (0, 0)),
    ]
    out = pl.pallas_call(
        _conv_kernel,
        out_shape=jax.ShapeDtypeStruct((B, T, F), x.dtype),
        grid_spec=pltpu.PrefetchScalarGridSpec(
            num_scalar_prefetch=0, grid=(B,),
            in_specs=in_specs,
            out_specs=pl.BlockSpec((1, T, F), lambda b: (b, 0, 0)),
        ),
        compiler_params=_compiler_params(1),
        cost_estimate=pl.CostEstimate(
            flops=int(B * (6 * T * F * F + 2 * K * T * F)),
            transcendentals=int(2 * B * T * F),
            bytes_accessed=int(2 * B * T * F * 2 + 3 * F * F * 2 + (K + 7) * F * 4)),
    )(x, p["ln_g"], p["ln_b"], p["w1"], p["b1"], p["dw"], p["dwb"],
      p["bn_scale"], p["bn_shift"], p["w2"], p["b2"])
    return out


# ---------------------------------------------------------------------------
# Block / encoder wrappers.
# ---------------------------------------------------------------------------
def conformer_block_forward(x, key_bias, p, n_heads):
    x = ff_forward(x, p["ff1"])                              # x = 0.5*ff1(x) + x
    x = conv_forward(x, p["conv"])                           # x = conv(x) + x
    x = mhsa_forward(x, key_bias, p["mhsa"], n_heads)        # x = mhsa(x, mask) + x
    x = ff_forward(x, p["ff2"], final_ln=p["final_ln"])      # x = LN(0.5*ff2(x) + x)
    return x


def conformer_encoder_forward(x, sequence_mask, layer_params, n_heads):
    """x: [B, T, F] (frontend output), sequence_mask: [B, T] bool (True = valid frame,
    matching i6_models' actual mask usage). Returns (encoded [B, T, F], sequence_mask)."""
    B, T, F = x.shape
    assert T % 8 == 0, "T must be a multiple of 8 (sublane granule)"
    assert F % 128 == 0, "model dim must be a multiple of 128 (lane granule)"
    assert F % n_heads == 0
    key_bias = jnp.where(sequence_mask, 0.0, _NEG_INF).astype(jnp.float32).reshape(B, 1, T)
    xb = x.astype(jnp.bfloat16)       # bf16 residual stream between fused kernels
    for p in layer_params:
        xb = conformer_block_forward(xb, key_bias, p, n_heads)
    return xb.astype(jnp.float32), sequence_mask


# ---------------------------------------------------------------------------
# Pure-JAX reference (mirrors the kernel math incl. bf16 operand casts and the
# bf16 residual stream between modules).
# ---------------------------------------------------------------------------
def _ref_ff(x, p):
    y = _layernorm(x, p["ln_g"], p["ln_b"])
    h = jnp.einsum("btf,fh->bth", y.astype(jnp.bfloat16), p["w1"],
                   preferred_element_type=jnp.float32) + p["b1"]
    h = _silu(h)
    return jnp.einsum("bth,hf->btf", h.astype(jnp.bfloat16), p["w2"],
                      preferred_element_type=jnp.float32) + p["b2"]


def _ref_conv(x, p):
    B, T, F = x.shape
    y = _layernorm(x, p["ln_g"], p["ln_b"])
    h = jnp.einsum("btf,fg->btg", y.astype(jnp.bfloat16), p["w1"],
                   preferred_element_type=jnp.float32) + p["b1"]
    u = h[..., :F] * jax.nn.sigmoid(h[..., F:])
    K = p["dw"].shape[0]
    pad = (K - 1) // 2
    up = jnp.pad(u, ((0, 0), (pad, pad), (0, 0)))
    acc = jnp.broadcast_to(p["dwb"], u.shape)
    for j in range(K):
        acc = acc + up[:, j:j + T, :] * p["dw"][j]
    v = acc * p["bn_scale"] + p["bn_shift"]
    v = _silu(v)
    return jnp.einsum("btf,fg->btg", v.astype(jnp.bfloat16), p["w2"],
                      preferred_element_type=jnp.float32) + p["b2"]


def _ref_mhsa(x, key_bias, p, n_heads):
    F = x.shape[-1]
    dh = F // n_heads
    scale = 1.0 / float(dh) ** 0.5
    y = _layernorm(x, p["ln_g"], p["ln_b"])
    yb = y.astype(jnp.bfloat16)
    q = jnp.einsum("btf,fd->btd", yb, p["wq"], preferred_element_type=jnp.float32) + p["bq"]
    k = jnp.einsum("btf,fd->btd", yb, p["wk"], preferred_element_type=jnp.float32) + p["bk"]
    v = jnp.einsum("btf,fd->btd", yb, p["wv"], preferred_element_type=jnp.float32) + p["bv"]
    ctx_parts = []
    for h in range(n_heads):
        sl = slice(h * dh, (h + 1) * dh)
        logits = jnp.einsum("btd,bsd->bts",
                            q[..., sl].astype(jnp.bfloat16), k[..., sl].astype(jnp.bfloat16),
                            preferred_element_type=jnp.float32) * scale + key_bias
        probs = jax.nn.softmax(logits, axis=-1)
        ctx_parts.append(jnp.einsum("bts,bsd->btd", probs.astype(jnp.bfloat16),
                                    v[..., sl].astype(jnp.bfloat16),
                                    preferred_element_type=jnp.float32))
    ctx = jnp.concatenate(ctx_parts, axis=-1)
    return jnp.einsum("btd,df->btf", ctx.astype(jnp.bfloat16), p["wo"],
                      preferred_element_type=jnp.float32) + p["bo"]


def _ref_block(xb, key_bias, p, n_heads):
    x = xb.astype(jnp.float32)
    x = (0.5 * _ref_ff(x, p["ff1"]) + x).astype(jnp.bfloat16).astype(jnp.float32)
    x = (_ref_conv(x, p["conv"]) + x).astype(jnp.bfloat16).astype(jnp.float32)
    x = (_ref_mhsa(x, key_bias, p["mhsa"], n_heads) + x).astype(jnp.bfloat16).astype(jnp.float32)
    y = 0.5 * _ref_ff(x, p["ff2"]) + x
    y = _layernorm(y, p["final_ln"]["g"], p["final_ln"]["b"])
    return y.astype(jnp.bfloat16)


def reference_encoder(x, sequence_mask, layer_params, n_heads):
    key_bias = jnp.where(sequence_mask, 0.0, _NEG_INF).astype(jnp.float32)[:, None, :]
    xb = x.astype(jnp.bfloat16)
    for p in layer_params:
        xb = _ref_block(xb, key_bias, p, n_heads)
    return xb.astype(jnp.float32), sequence_mask


# ---------------------------------------------------------------------------
# Deterministic parameter construction.
# ---------------------------------------------------------------------------
def _init_ln(key, F):
    k1, k2 = jax.random.split(key)
    return (1.0 + 0.1 * jax.random.normal(k1, (1, F), jnp.float32),
            0.1 * jax.random.normal(k2, (1, F), jnp.float32))


def _w(key, shape, scale=0.05):
    return (scale * jax.random.normal(key, shape, jnp.float32)).astype(jnp.bfloat16)


def _init_ff_params(key, F, H):
    ks = jax.random.split(key, 5)
    g, b = _init_ln(ks[0], F)
    return dict(ln_g=g, ln_b=b,
                w1=_w(ks[1], (F, H)),
                b1=0.05 * jax.random.normal(ks[2], (1, H), jnp.float32),
                w2=_w(ks[3], (H, F)),
                b2=0.05 * jax.random.normal(ks[4], (1, F), jnp.float32))


def _init_mhsa_params(key, F):
    ks = jax.random.split(key, 9)
    g, b = _init_ln(ks[0], F)
    return dict(ln_g=g, ln_b=b,
                wq=_w(ks[1], (F, F)),
                bq=0.05 * jax.random.normal(ks[2], (1, F), jnp.float32),
                wk=_w(ks[3], (F, F)),
                bk=0.05 * jax.random.normal(ks[4], (1, F), jnp.float32),
                wv=_w(ks[5], (F, F)),
                bv=0.05 * jax.random.normal(ks[6], (1, F), jnp.float32),
                wo=_w(ks[7], (F, F)),
                bo=0.05 * jax.random.normal(ks[8], (1, F), jnp.float32))


def _init_conv_params(key, F, K):
    ks = jax.random.split(key, 11)
    g, b = _init_ln(ks[0], F)
    bn_gamma = 1.0 + 0.1 * jax.random.normal(ks[1], (1, F), jnp.float32)
    bn_beta = 0.1 * jax.random.normal(ks[2], (1, F), jnp.float32)
    bn_mean = 0.1 * jax.random.normal(ks[3], (1, F), jnp.float32)
    bn_var = 1.0 + 0.1 * jax.random.uniform(ks[4], (1, F), jnp.float32)
    bn_scale = bn_gamma * jax.lax.rsqrt(bn_var + _EPS)     # eval-mode BatchNorm folded
    bn_shift = bn_beta - bn_mean * bn_scale
    return dict(ln_g=g, ln_b=b,
                w1=_w(ks[5], (F, 2 * F)),
                b1=0.05 * jax.random.normal(ks[6], (1, 2 * F), jnp.float32),
                dw=0.1 * jax.random.normal(ks[7], (K, 1, F), jnp.float32),
                dwb=0.05 * jax.random.normal(ks[8], (1, F), jnp.float32),
                bn_scale=bn_scale, bn_shift=bn_shift,
                w2=_w(ks[9], (F, F)),
                b2=0.05 * jax.random.normal(ks[10], (1, F), jnp.float32))


def _init_block_params(key, F, H, K):
    k_ff1, k_conv, k_mhsa, k_ff2, k_g, k_b = jax.random.split(key, 6)
    return dict(
        ff1=_init_ff_params(k_ff1, F, H),
        conv=_init_conv_params(k_conv, F, K),
        mhsa=_init_mhsa_params(k_mhsa, F),
        ff2=_init_ff_params(k_ff2, F, H),
        final_ln=dict(g=1.0 + 0.1 * jax.random.normal(k_g, (1, F), jnp.float32),
                      b=0.1 * jax.random.normal(k_b, (1, F), jnp.float32)))


if __name__ == "__main__":
    B, T, F = 2, 32, 128          # batch, (down-sampled) time, model dim
    H = 512                       # feed-forward hidden dim
    N_HEADS = 2                   # head dim = 64
    K = 7                         # depthwise conv kernel size (odd)
    NUM_LAYERS = 2

    key = jax.random.PRNGKey(0)
    k_x, k_p = jax.random.split(key)
    x = jax.random.normal(k_x, (B, T, F), jnp.float32)
    lengths = jnp.array([T, T - 9], jnp.int32)
    sequence_mask = jnp.arange(T)[None, :] < lengths[:, None]   # True = inside sequence

    layer_keys = jax.random.split(k_p, NUM_LAYERS)
    params = [_init_block_params(k, F, H, K) for k in layer_keys]

    run = jax.jit(conformer_encoder_forward, static_argnames=("n_heads",))
    out, out_mask = run(x, sequence_mask, params, n_heads=N_HEADS)
    out = jax.block_until_ready(out)

    ref, _ = reference_encoder(x, sequence_mask, params, N_HEADS)
    assert out.shape == (B, T, F)
    assert jnp.array_equal(out_mask, sequence_mask)
    max_err = float(jnp.max(jnp.abs(out - ref)))
    assert max_err < 2e-2, f"max abs error {max_err}"
    print("KERNEL_OK")
</pallas_src>

<mosaic_0001>
module attributes {stable_mosaic.version = 11 : i64} {
  func.func @_conv_kernel(%arg0: i32, %arg1: memref<1x32x128xbf16, #tpu.memory_space<vmem>>, %arg2: memref<1x128xf32, #tpu.memory_space<vmem>>, %arg3: memref<1x128xf32, #tpu.memory_space<vmem>>, %arg4: memref<128x256xbf16, #tpu.memory_space<vmem>>, %arg5: memref<1x256xf32, #tpu.memory_space<vmem>>, %arg6: memref<7x1x128xf32, #tpu.memory_space<vmem>>, %arg7: memref<1x128xf32, #tpu.memory_space<vmem>>, %arg8: memref<1x128xf32, #tpu.memory_space<vmem>>, %arg9: memref<1x128xf32, #tpu.memory_space<vmem>>, %arg10: memref<128x128xbf16, #tpu.memory_space<vmem>>, %arg11: memref<1x128xf32, #tpu.memory_space<vmem>>, %arg12: memref<1x32x128xbf16, #tpu.memory_space<vmem>>) attributes {dimension_semantics = [#tpu.dimension_semantics<parallel>], iteration_bounds = array<i64: 2>, scalar_prefetch = 0 : i64, scratch_operands = 0 : i64, tpu.core_type = #tpu.core_type<tc>, window_params = [{transform_indices = @transform_0, window_bounds = array<i64: 1, 32, 128>}, {pipeline_mode = #tpu.pipeline_mode<synchronous>, transform_indices = @transform_1, window_bounds = array<i64: 1, 128>}, {pipeline_mode = #tpu.pipeline_mode<synchronous>, transform_indices = @transform_2, window_bounds = array<i64: 1, 128>}, {pipeline_mode = #tpu.pipeline_mode<synchronous>, transform_indices = @transform_3, window_bounds = array<i64: 128, 256>}, {pipeline_mode = #tpu.pipeline_mode<synchronous>, transform_indices = @transform_4, window_bounds = array<i64: 1, 256>}, {pipeline_mode = #tpu.pipeline_mode<synchronous>, transform_indices = @transform_5, window_bounds = array<i64: 7, 1, 128>}, {pipeline_mode = #tpu.pipeline_mode<synchronous>, transform_indices = @transform_6, window_bounds = array<i64: 1, 128>}, {pipeline_mode = #tpu.pipeline_mode<synchronous>, transform_indices = @transform_7, window_bounds = array<i64: 1, 128>}, {pipeline_mode = #tpu.pipeline_mode<synchronous>, transform_indices = @transform_8, window_bounds = array<i64: 1, 128>}, {pipeline_mode = #tpu.pipeline_mode<synchronous>, transform_indices = @transform_9, window_bounds = array<i64: 128, 128>}, {pipeline_mode = #tpu.pipeline_mode<synchronous>, transform_indices = @transform_10, window_bounds = array<i64: 1, 128>}, {transform_indices = @transform_11, window_bounds = array<i64: 1, 32, 128>}]} {
    %c0 = arith.constant 0 : index
    %c0_0 = arith.constant 0 : index
    %c0_1 = arith.constant 0 : index
    %0 = vector.load %arg1[%c0, %c0_0, %c0_1] : memref<1x32x128xbf16, #tpu.memory_space<vmem>>, vector<1x32x128xbf16>
    %1 = vector.shape_cast %0 : vector<1x32x128xbf16> to vector<32x128xbf16>
    %2 = arith.extf %1 : vector<32x128xbf16> to vector<32x128xf32>
    %c0_2 = arith.constant 0 : index
    %c0_3 = arith.constant 0 : index
    %3 = vector.load %arg2[%c0_2, %c0_3] : memref<1x128xf32, #tpu.memory_space<vmem>>, vector<1x128xf32>
    %c0_4 = arith.constant 0 : index
    %c0_5 = arith.constant 0 : index
    %4 = vector.load %arg3[%c0_4, %c0_5] : memref<1x128xf32, #tpu.memory_space<vmem>>, vector<1x128xf32>
    %cst = arith.constant dense<0.000000e+00> : vector<32xf32>
    %5 = vector.multi_reduction <add>, %2, %cst [1] : vector<32x128xf32> to vector<32xf32>
    %6 = vector.shape_cast %5 : vector<32xf32> to vector<32x1xf32>
    %cst_6 = arith.constant 1.280000e+02 : f32
    %7 = vector.broadcast %cst_6 : f32 to vector<32x1xf32>
    %8 = arith.divf %6, %7 : vector<32x1xf32>
    %9 = vector.broadcast %8 : vector<32x1xf32> to vector<32x128xf32>
    %10 = arith.subf %2, %9 : vector<32x128xf32>
    %11 = arith.mulf %10, %10 : vector<32x128xf32>
    %cst_7 = arith.constant dense<0.000000e+00> : vector<32xf32>
    %12 = vector.multi_reduction <add>, %11, %cst_7 [1] : vector<32x128xf32> to vector<32xf32>
    %13 = vector.shape_cast %12 : vector<32xf32> to vector<32x1xf32>
    %cst_8 = arith.constant 1.280000e+02 : f32
    %14 = vector.broadcast %cst_8 : f32 to vector<32x1xf32>
    %15 = arith.divf %13, %14 : vector<32x1xf32>
    %cst_9 = arith.constant 9.99999974E-6 : f32
    %16 = vector.broadcast %cst_9 : f32 to vector<32x1xf32>
    %17 = arith.addf %15, %16 : vector<32x1xf32>
    %18 = math.rsqrt %17 : vector<32x1xf32>
    %19 = vector.broadcast %18 : vector<32x1xf32> to vector<32x128xf32>
    %20 = arith.mulf %10, %19 : vector<32x128xf32>
    %21 = vector.broadcast %3 : vector<1x128xf32> to vector<32x128xf32>
    %22 = arith.mulf %20, %21 : vector<32x128xf32>
    %23 = vector.broadcast %4 : vector<1x128xf32> to vector<32x128xf32>
    %24 = arith.addf %22, %23 : vector<32x128xf32>
    %25 = arith.truncf %24 : vector<32x128xf32> to vector<32x128xbf16>
    %c0_10 = arith.constant 0 : index
    %c0_11 = arith.constant 0 : index
    %26 = vector.load %arg4[%c0_10, %c0_11] : memref<128x256xbf16, #tpu.memory_space<vmem>>, vector<128x256xbf16>
    %cst_12 = arith.constant dense<0.000000e+00> : vector<32x256xf32>
    %27 = tpu.matmul %25, %26, %cst_12 {dimension_numbers = #tpu.dot_dimension_numbers<[1], [0], [0], [1], [0, 0, 1, 1], [], []>} : vector<32x128xbf16>, vector<128x256xbf16>, vector<32x256xf32> -> vector<32x256xf32>
    %c0_13 = arith.constant 0 : index
    %c0_14 = arith.constant 0 : index
    %28 = vector.load %arg5[%c0_13, %c0_14] : memref<1x256xf32, #tpu.memory_space<vmem>>, vector<1x256xf32>
    %29 = vector.broadcast %28 : vector<1x256xf32> to vector<32x256xf32>
    %30 = arith.addf %27, %29 : vector<32x256xf32>
    %31 = vector.extract_strided_slice %30 {offsets = [0, 0], sizes = [32, 128], strides = [1, 1]} : vector<32x256xf32> to vector<32x128xf32>
    %32 = vector.extract_strided_slice %30 {offsets = [0, 128], sizes = [32, 128], strides = [1, 1]} : vector<32x256xf32> to vector<32x128xf32>
    %33 = arith.negf %32 : vector<32x128xf32>
    %34 = math.exp %33 : vector<32x128xf32>
    %cst_15 = arith.constant 1.000000e+00 : f32
    %35 = vector.broadcast %cst_15 : f32 to vector<32x128xf32>
    %36 = arith.addf %35, %34 : vector<32x128xf32>
    %37 = arith.divf %35, %36 : vector<32x128xf32>
    %38 = arith.mulf %31, %37 : vector<32x128xf32>
    %39 = tpu.iota {dimensions = array<i32: 0>} : vector<32x1xi32>
    %c0_16 = arith.constant 0 : index
    %c0_17 = arith.constant 0 : index
    %40 = vector.load %arg7[%c0_16, %c0_17] : memref<1x128xf32, #tpu.memory_space<vmem>>, vector<1x128xf32>
    %41 = vector.shape_cast %40 : vector<1x128xf32> to vector<1x128xf32>
    %42 = vector.broadcast %41 : vector<1x128xf32> to vector<32x128xf32>
    %c3_i32 = arith.constant 3 : i32
    %43 = tpu.dynamic_rotate %38 by %c3_i32 dim 0 : vector<32x128xf32>, i32 -> vector<32x128xf32>
    %c-3_i32 = arith.constant -3 : i32
    %44 = vector.broadcast %c-3_i32 : i32 to vector<32x1xi32>
    %45 = arith.addi %39, %44 : vector<32x1xi32>
    %c0_i32 = arith.constant 0 : i32
    %46 = vector.broadcast %c0_i32 : i32 to vector<32x1xi32>
    %47 = arith.cmpi sge, %45, %46 : vector<32x1xi32>
    %c-3_i32_18 = arith.constant -3 : i32
    %48 = vector.broadcast %c-3_i32_18 : i32 to vector<32x1xi32>
    %49 = arith.addi %39, %48 : vector<32x1xi32>
    %c32_i32 = arith.constant 32 : i32
    %50 = vector.broadcast %c32_i32 : i32 to vector<32x1xi32>
    %51 = arith.cmpi slt, %49, %50 : vector<32x1xi32>
    %52 = arith.andi %47, %51 : vector<32x1xi1>
    %cst_19 = arith.constant 0.000000e+00 : f32
    %53 = vector.shape_cast %52 : vector<32x1xi1> to vector<32x1xi1>
    %54 = vector.broadcast %53 : vector<32x1xi1> to vector<32x128xi1>
    %55 = vector.broadcast %cst_19 : f32 to vector<32x128xf32>
    %56 = arith.select %54, %43, %55 : vector<32x128xi1>, vector<32x128xf32>
    %c0_20 = arith.constant 0 : index
    %c0_21 = arith.constant 0 : index
    %c0_22 = arith.constant 0 : index
    %57 = vector.load %arg6[%c0_20, %c0_21, %c0_22] : memref<7x1x128xf32, #tpu.memory_space<vmem>>, vector<1x1x128xf32>
    %58 = vector.shape_cast %57 : vector<1x1x128xf32> to vector<1x128xf32>
    %59 = vector.broadcast %58 : vector<1x128xf32> to vector<32x128xf32>
    %60 = arith.mulf %56, %59 : vector<32x128xf32>
    %61 = arith.addf %42, %60 : vector<32x128xf32>
    %c2_i32 = arith.constant 2 : i32
    %62 = tpu.dynamic_rotate %38 by %c2_i32 dim 0 : vector<32x128xf32>, i32 -> vector<32x128xf32>
    %c-2_i32 = arith.constant -2 : i32
    %63 = vector.broadcast %c-2_i32 : i32 to vector<32x1xi32>
    %64 = arith.addi %39, %63 : vector<32x1xi32>
    %c0_i32_23 = arith.constant 0 : i32
    %65 = vector.broadcast %c0_i32_23 : i32 to vector<32x1xi32>
    %66 = arith.cmpi sge, %64, %65 : vector<32x1xi32>
    %c-2_i32_24 = arith.constant -2 : i32
    %67 = vector.broadcast %c-2_i32_24 : i32 to vector<32x1xi32>
    %68 = arith.addi %39, %67 : vector<32x1xi32>
    %c32_i32_25 = arith.constant 32 : i32
    %69 = vector.broadcast %c32_i32_25 : i32 to vector<32x1xi32>
    %70 = arith.cmpi slt, %68, %69 : vector<32x1xi32>
    %71 = arith.andi %66, %70 : vector<32x1xi1>
    %cst_26 = arith.constant 0.000000e+00 : f32
    %72 = vector.shape_cast %71 : vector<32x1xi1> to vector<32x1xi1>
    %73 = vector.broadcast %72 : vector<32x1xi1> to vector<32x128xi1>
    %74 = vector.broadcast %cst_26 : f32 to vector<32x128xf32>
    %75 = arith.select %73, %62, %74 : vector<32x128xi1>, vector<32x128xf32>
    %c1 = arith.constant 1 : index
    %c0_27 = arith.constant 0 : index
    %c0_28 = arith.constant 0 : index
    %76 = vector.load %arg6[%c1, %c0_27, %c0_28] : memref<7x1x128xf32, #tpu.memory_space<vmem>>, vector<1x1x128xf32>
    %77 = vector.shape_cast %76 : vector<1x1x128xf32> to vector<1x128xf32>
    %78 = vector.broadcast %77 : vector<1x128xf32> to vector<32x128xf32>
    %79 = arith.mulf %75, %78 : vector<32x128xf32>
    %80 = arith.addf %61, %79 : vector<32x128xf32>
    %c1_i32 = arith.constant 1 : i32
    %81 = tpu.dynamic_rotate %38 by %c1_i32 dim 0 : vector<32x128xf32>, i32 -> vector<32x128xf32>
    %c-1_i32 = arith.constant -1 : i32
    %82 = vector.broadcast %c-1_i32 : i32 to vector<32x1xi32>
    %83 = arith.addi %39, %82 : vector<32x1xi32>
    %c0_i32_29 = arith.constant 0 : i32
    %84 = vector.broadcast %c0_i32_29 : i32 to vector<32x1xi32>
    %85 = arith.cmpi sge, %83, %84 : vector<32x1xi32>
    %c-1_i32_30 = arith.constant -1 : i32
    %86 = vector.broadcast %c-1_i32_30 : i32 to vector<32x1xi32>
    %87 = arith.addi %39, %86 : vector<32x1xi32>
    %c32_i32_31 = arith.constant 32 : i32
    %88 = vector.broadcast %c32_i32_31 : i32 to vector<32x1xi32>
    %89 = arith.cmpi slt, %87, %88 : vector<32x1xi32>
    %90 = arith.andi %85, %89 : vector<32x1xi1>
    %cst_32 = arith.constant 0.000000e+00 : f32
    %91 = vector.shape_cast %90 : vector<32x1xi1> to vector<32x1xi1>
    %92 = vector.broadcast %91 : vector<32x1xi1> to vector<32x128xi1>
    %93 = vector.broadcast %cst_32 : f32 to vector<32x128xf32>
    %94 = arith.select %92, %81, %93 : vector<32x128xi1>, vector<32x128xf32>
    %c2 = arith.constant 2 : index
    %c0_33 = arith.constant 0 : index
    %c0_34 = arith.constant 0 : index
    %95 = vector.load %arg6[%c2, %c0_33, %c0_34] : memref<7x1x128xf32, #tpu.memory_space<vmem>>, vector<1x1x128xf32>
    %96 = vector.shape_cast %95 : vector<1x1x128xf32> to vector<1x128xf32>
    %97 = vector.broadcast %96 : vector<1x128xf32> to vector<32x128xf32>
    %98 = arith.mulf %94, %97 : vector<32x128xf32>
    %99 = arith.addf %80, %98 : vector<32x128xf32>
    %c3 = arith.constant 3 : index
    %c0_35 = arith.constant 0 : index
    %c0_36 = arith.constant 0 : index
    %100 = vector.load %arg6[%c3, %c0_35, %c0_36] : memref<7x1x128xf32, #tpu.memory_space<vmem>>, vector<1x1x128xf32>
    %101 = vector.shape_cast %100 : vector<1x1x128xf32> to vector<1x128xf32>
    %102 = vector.broadcast %101 : vector<1x128xf32> to vector<32x128xf32>
    %103 = arith.mulf %38, %102 : vector<32x128xf32>
    %104 = arith.addf %99, %103 : vector<32x128xf32>
    %c31_i32 = arith.constant 31 : i32
    %105 = tpu.dynamic_rotate %38 by %c31_i32 dim 0 : vector<32x128xf32>, i32 -> vector<32x128xf32>
    %c1_i32_37 = arith.constant 1 : i32
    %106 = vector.broadcast %c1_i32_37 : i32 to vector<32x1xi32>
    %107 = arith.addi %39, %106 : vector<32x1xi32>
    %c0_i32_38 = arith.constant 0 : i32
    %108 = vector.broadcast %c0_i32_38 : i32 to vector<32x1xi32>
    %109 = arith.cmpi sge, %107, %108 : vector<32x1xi32>
    %c1_i32_39 = arith.constant 1 : i32
    %110 = vector.broadcast %c1_i32_39 : i32 to vector<32x1xi32>
    %111 = arith.addi %39, %110 : vector<32x1xi32>
    %c32_i32_40 = arith.constant 32 : i32
    %112 = vector.broadcast %c32_i32_40 : i32 to vector<32x1xi32>
    %113 = arith.cmpi slt, %111, %112 : vector<32x1xi32>
    %114 = arith.andi %109, %113 : vector<32x1xi1>
    %cst_41 = arith.constant 0.000000e+00 : f32
    %115 = vector.shape_cast %114 : vector<32x1xi1> to vector<32x1xi1>
    %116 = vector.broadcast %115 : vector<32x1xi1> to vector<32x128xi1>
    %117 = vector.broadcast %cst_41 : f32 to vector<32x128xf32>
    %118 = arith.select %116, %105, %117 : vector<32x128xi1>, vector<32x128xf32>
    %c4 = arith.constant 4 : index
    %c0_42 = arith.constant 0 : index
    %c0_43 = arith.constant 0 : index
    %119 = vector.load %arg6[%c4, %c0_42, %c0_43] : memref<7x1x128xf32, #tpu.memory_space<vmem>>, vector<1x1x128xf32>
    %120 = vector.shape_cast %119 : vector<1x1x128xf32> to vector<1x128xf32>
    %121 = vector.broadcast %120 : vector<1x128xf32> to vector<32x128xf32>
    %122 = arith.mulf %118, %121 : vector<32x128xf32>
    %123 = arith.addf %104, %122 : vector<32x128xf32>
    %c30_i32 = arith.constant 30 : i32
    %124 = tpu.dynamic_rotate %38 by %c30_i32 dim 0 : vector<32x128xf32>, i32 -> vector<32x128xf32>
    %c2_i32_44 = arith.constant 2 : i32
    %125 = vector.broadcast %c2_i32_44 : i32 to vector<32x1xi32>
    %126 = arith.addi %39, %125 : vector<32x1xi32>
    %c0_i32_45 = arith.constant 0 : i32
    %127 = vector.broadcast %c0_i32_45 : i32 to vector<32x1xi32>
    %128 = arith.cmpi sge, %126, %127 : vector<32x1xi32>
    %c2_i32_46 = arith.constant 2 : i32
    %129 = vector.broadcast %c2_i32_46 : i32 to vector<32x1xi32>
    %130 = arith.addi %39, %129 : vector<32x1xi32>
    %c32_i32_47 = arith.constant 32 : i32
    %131 = vector.broadcast %c32_i32_47 : i32 to vector<32x1xi32>
    %132 = arith.cmpi slt, %130, %131 : vector<32x1xi32>
    %133 = arith.andi %128, %132 : vector<32x1xi1>
    %cst_48 = arith.constant 0.000000e+00 : f32
    %134 = vector.shape_cast %133 : vector<32x1xi1> to vector<32x1xi1>
    %135 = vector.broadcast %134 : vector<32x1xi1> to vector<32x128xi1>
    %136 = vector.broadcast %cst_48 : f32 to vector<32x128xf32>
    %137 = arith.select %135, %124, %136 : vector<32x128xi1>, vector<32x128xf32>
    %c5 = arith.constant 5 : index
    %c0_49 = arith.constant 0 : index
    %c0_50 = arith.constant 0 : index
    %138 = vector.load %arg6[%c5, %c0_49, %c0_50] : memref<7x1x128xf32, #tpu.memory_space<vmem>>, vector<1x1x128xf32>
    %139 = vector.shape_cast %138 : vector<1x1x128xf32> to vector<1x128xf32>
    %140 = vector.broadcast %139 : vector<1x128xf32> to vector<32x128xf32>
    %141 = arith.mulf %137, %140 : vector<32x128xf32>
    %142 = arith.addf %123, %141 : vector<32x128xf32>
    %c29_i32 = arith.constant 29 : i32
    %143 = tpu.dynamic_rotate %38 by %c29_i32 dim 0 : vector<32x128xf32>, i32 -> vector<32x128xf32>
    %c3_i32_51 = arith.constant 3 : i32
    %144 = vector.broadcast %c3_i32_51 : i32 to vector<32x1xi32>
    %145 = arith.addi %39, %144 : vector<32x1xi32>
    %c0_i32_52 = arith.constant 0 : i32
    %146 = vector.broadcast %c0_i32_52 : i32 to vector<32x1xi32>
    %147 = arith.cmpi sge, %145, %146 : vector<32x1xi32>
    %c3_i32_53 = arith.constant 3 : i32
    %148 = vector.broadcast %c3_i32_53 : i32 to vector<32x1xi32>
    %149 = arith.addi %39, %148 : vector<32x1xi32>
    %c32_i32_54 = arith.constant 32 : i32
    %150 = vector.broadcast %c32_i32_54 : i32 to vector<32x1xi32>
    %151 = arith.cmpi slt, %149, %150 : vector<32x1xi32>
    %152 = arith.andi %147, %151 : vector<32x1xi1>
    %cst_55 = arith.constant 0.000000e+00 : f32
    %153 = vector.shape_cast %152 : vector<32x1xi1> to vector<32x1xi1>
    %154 = vector.broadcast %153 : vector<32x1xi1> to vector<32x128xi1>
    %155 = vector.broadcast %cst_55 : f32 to vector<32x128xf32>
    %156 = arith.select %154, %143, %155 : vector<32x128xi1>, vector<32x128xf32>
    %c6 = arith.constant 6 : index
    %c0_56 = arith.constant 0 : index
    %c0_57 = arith.constant 0 : index
    %157 = vector.load %arg6[%c6, %c0_56, %c0_57] : memref<7x1x128xf32, #tpu.memory_space<vmem>>, vector<1x1x128xf32>
    %158 = vector.shape_cast %157 : vector<1x1x128xf32> to vector<1x128xf32>
    %159 = vector.broadcast %158 : vector<1x128xf32> to vector<32x128xf32>
    %160 = arith.mulf %156, %159 : vector<32x128xf32>
    %161 = arith.addf %142, %160 : vector<32x128xf32>
    %c0_58 = arith.constant 0 : index
    %c0_59 = arith.constant 0 : index
    %162 = vector.load %arg8[%c0_58, %c0_59] : memref<1x128xf32, #tpu.memory_space<vmem>>, vector<1x128xf32>
    %163 = vector.broadcast %162 : vector<1x128xf32> to vector<32x128xf32>
    %164 = arith.mulf %161, %163 : vector<32x128xf32>
    %c0_60 = arith.constant 0 : index
    %c0_61 = arith.constant 0 : index
    %165 = vector.load %arg9[%c0_60, %c0_61] : memref<1x128xf32, #tpu.memory_space<vmem>>, vector<1x128xf32>
    %166 = vector.broadcast %165 : vector<1x128xf32> to vector<32x128xf32>
    %167 = arith.addf %164, %166 : vector<32x128xf32>
    %168 = arith.negf %167 : vector<32x128xf32>
    %169 = math.exp %168 : vector<32x128xf32>
    %cst_62 = arith.constant 1.000000e+00 : f32
    %170 = vector.broadcast %cst_62 : f32 to vector<32x128xf32>
    %171 = arith.addf %170, %169 : vector<32x128xf32>
    %172 = arith.divf %170, %171 : vector<32x128xf32>
    %173 = arith.mulf %167, %172 : vector<32x128xf32>
    %174 = arith.truncf %173 : vector<32x128xf32> to vector<32x128xbf16>
    %c0_63 = arith.constant 0 : index
    %c0_64 = arith.constant 0 : index
    %175 = vector.load %arg10[%c0_63, %c0_64] : memref<128x128xbf16, #tpu.memory_space<vmem>>, vector<128x128xbf16>
    %cst_65 = arith.constant dense<0.000000e+00> : vector<32x128xf32>
    %176 = tpu.matmul %174, %175, %cst_65 {dimension_numbers = #tpu.dot_dimension_numbers<[1], [0], [0], [1], [0, 0, 1, 1], [], []>} : vector<32x128xbf16>, vector<128x128xbf16>, vector<32x128xf32> -> vector<32x128xf32>
    %c0_66 = arith.constant 0 : index
    %c0_67 = arith.constant 0 : index
    %177 = vector.load %arg11[%c0_66, %c0_67] : memref<1x128xf32, #tpu.memory_space<vmem>>, vector<1x128xf32>
    %178 = vector.broadcast %177 : vector<1x128xf32> to vector<32x128xf32>
    %179 = arith.addf %176, %178 : vector<32x128xf32>
    %180 = arith.addf %179, %2 : vector<32x128xf32>
    %181 = arith.truncf %180 : vector<32x128xf32> to vector<32x128xbf16>
    %c0_68 = arith.constant 0 : index
    %c0_69 = arith.constant 0 : index
    %c0_70 = arith.constant 0 : index
    %182 = vector.load %arg12[%c0_68, %c0_69, %c0_70] : memref<1x32x128xbf16, #tpu.memory_space<vmem>>, vector<1x32x128xbf16>
    %183 = vector.shape_cast %182 : vector<1x32x128xbf16> to vector<32x128xbf16>
    %184 = vector.shape_cast %181 : vector<32x128xbf16> to vector<1x32x128xbf16>
    tpu.vector_store %arg12[%c0_68, %c0_69, %c0_70], %184 {strides = array<i32>} : memref<1x32x128xbf16, #tpu.memory_space<vmem>>, vector<1x32x128xbf16>,
    return
  }
  func.func @transform_0(%arg0: i32) -> (i32, i32, i32) {
    %c0_i32 = arith.constant 0 : i32
    %c0_i32_0 = arith.constant 0 : i32
    %c0_i32_1 = arith.constant 0 : i32
    return %arg0, %c0_i32, %c0_i32_0 : i32, i32, i32
  }
  func.func @transform_1(%arg0: i32) -> (i32, i32) {
    %c0_i32 = arith.constant 0 : i32
    %c0_i32_0 = arith.constant 0 : i32
    %c0_i32_1 = arith.constant 0 : i32
    return %c0_i32, %c0_i32_0 : i32, i32
  }
  func.func @transform_2(%arg0: i32) -> (i32, i32) {
    %c0_i32 = arith.constant 0 : i32
    %c0_i32_0 = arith.constant 0 : i32
    %c0_i32_1 = arith.constant 0 : i32
    return %c0_i32, %c0_i32_0 : i32, i32
  }
  func.func @transform_3(%arg0: i32) -> (i32, i32) {
    %c0_i32 = arith.constant 0 : i32
    %c0_i32_0 = arith.constant 0 : i32
    %c0_i32_1 = arith.constant 0 : i32
    return %c0_i32, %c0_i32_0 : i32, i32
  }
  func.func @transform_4(%arg0: i32) -> (i32, i32) {
    %c0_i32 = arith.constant 0 : i32
    %c0_i32_0 = arith.constant 0 : i32
    %c0_i32_1 = arith.constant 0 : i32
    return %c0_i32, %c0_i32_0 : i32, i32
  }
  func.func @transform_5(%arg0: i32) -> (i32, i32, i32) {
    %c0_i32 = arith.constant 0 : i32
    %c0_i32_0 = arith.constant 0 : i32
    %c0_i32_1 = arith.constant 0 : i32
    %c0_i32_2 = arith.constant 0 : i32
    return %c0_i32, %c0_i32_0, %c0_i32_1 : i32, i32, i32
  }
  func.func @transform_6(%arg0: i32) -> (i32, i32) {
    %c0_i32 = arith.constant 0 : i32
    %c0_i32_0 = arith.constant 0 : i32
    %c0_i32_1 = arith.constant 0 : i32
    return %c0_i32, %c0_i32_0 : i32, i32
  }
  func.func @transform_7(%arg0: i32) -> (i32, i32) {
    %c0_i32 = arith.constant 0 : i32
    %c0_i32_0 = arith.constant 0 : i32
    %c0_i32_1 = arith.constant 0 : i32
    return %c0_i32, %c0_i32_0 : i32, i32
  }
  func.func @transform_8(%arg0: i32) -> (i32, i32) {
    %c0_i32 = arith.constant 0 : i32
    %c0_i32_0 = arith.constant 0 : i32
    %c0_i32_1 = arith.constant 0 : i32
    return %c0_i32, %c0_i32_0 : i32, i32
  }
  func.func @transform_9(%arg0: i32) -> (i32, i32) {
    %c0_i32 = arith.constant 0 : i32
    %c0_i32_0 = arith.constant 0 : i32
    %c0_i32_1 = arith.constant 0 : i32
    return %c0_i32, %c0_i32_0 : i32, i32
  }
  func.func @transform_10(%arg0: i32) -> (i32, i32) {
    %c0_i32 = arith.constant 0 : i32
    %c0_i32_0 = arith.constant 0 : i32
    %c0_i32_1 = arith.constant 0 : i32
    return %c0_i32, %c0_i32_0 : i32, i32
  }
  func.func @transform_11(%arg0: i32) -> (i32, i32, i32) {
    %c0_i32 = arith.constant 0 : i32
    %c0_i32_0 = arith.constant 0 : i32
    %c0_i32_1 = arith.constant 0 : i32
    return %arg0, %c0_i32, %c0_i32_0 : i32, i32, i32
  }
}

module attributes {stable_mosaic.version = 11 : i64} {
  func.func @_ff_kernel(%arg0: i32, %arg1: memref<64x128xbf16, #tpu.memory_space<vmem>>, %arg2: memref<1x128xf32, #tpu.memory_space<vmem>>, %arg3: memref<1x128xf32, #tpu.memory_space<vmem>>, %arg4: memref<128x512xbf16, #tpu.memory_space<vmem>>, %arg5: memref<1x512xf32, #tpu.memory_space<vmem>>, %arg6: memref<512x128xbf16, #tpu.memory_space<vmem>>, %arg7: memref<1x128xf32, #tpu.memory_space<vmem>>, %arg8: memref<64x128xbf16, #tpu.memory_space<vmem>>) attributes {dimension_semantics = [#tpu.dimension_semantics<parallel>], iteration_bounds = array<i64: 1>, scalar_prefetch = 0 : i64, scratch_operands = 0 : i64, tpu.core_type = #tpu.core_type<tc>, window_params = [{transform_indices = @transform_0, window_bounds = array<i64: 64, 128>}, {pipeline_mode = #tpu.pipeline_mode<synchronous>, transform_indices = @transform_1, window_bounds = array<i64: 1, 128>}, {pipeline_mode = #tpu.pipeline_mode<synchronous>, transform_indices = @transform_2, window_bounds = array<i64: 1, 128>}, {pipeline_mode = #tpu.pipeline_mode<synchronous>, transform_indices = @transform_3, window_bounds = array<i64: 128, 512>}, {pipeline_mode = #tpu.pipeline_mode<synchronous>, transform_indices = @transform_4, window_bounds = array<i64: 1, 512>}, {pipeline_mode = #tpu.pipeline_mode<synchronous>, transform_indices = @transform_5, window_bounds = array<i64: 512, 128>}, {pipeline_mode = #tpu.pipeline_mode<synchronous>, transform_indices = @transform_6, window_bounds = array<i64: 1, 128>}, {transform_indices = @transform_7, window_bounds = array<i64: 64, 128>}]} {
    %c0 = arith.constant 0 : index
    %c0_0 = arith.constant 0 : index
    %0 = vector.load %arg1[%c0, %c0_0] : memref<64x128xbf16, #tpu.memory_space<vmem>>, vector<64x128xbf16>
    %1 = arith.extf %0 : vector<64x128xbf16> to vector<64x128xf32>
    %c0_1 = arith.constant 0 : index
    %c0_2 = arith.constant 0 : index
    %2 = vector.load %arg2[%c0_1, %c0_2] : memref<1x128xf32, #tpu.memory_space<vmem>>, vector<1x128xf32>
    %c0_3 = arith.constant 0 : index
    %c0_4 = arith.constant 0 : index
    %3 = vector.load %arg3[%c0_3, %c0_4] : memref<1x128xf32, #tpu.memory_space<vmem>>, vector<1x128xf32>
    %cst = arith.constant dense<0.000000e+00> : vector<64xf32>
    %4 = vector.multi_reduction <add>, %1, %cst [1] : vector<64x128xf32> to vector<64xf32>
    %5 = vector.shape_cast %4 : vector<64xf32> to vector<64x1xf32>
    %cst_5 = arith.constant 1.280000e+02 : f32
    %6 = vector.broadcast %cst_5 : f32 to vector<64x1xf32>
    %7 = arith.divf %5, %6 : vector<64x1xf32>
    %8 = vector.broadcast %7 : vector<64x1xf32> to vector<64x128xf32>
    %9 = arith.subf %1, %8 : vector<64x128xf32>
    %10 = arith.mulf %9, %9 : vector<64x128xf32>
    %cst_6 = arith.constant dense<0.000000e+00> : vector<64xf32>
    %11 = vector.multi_reduction <add>, %10, %cst_6 [1] : vector<64x128xf32> to vector<64xf32>
    %12 = vector.shape_cast %11 : vector<64xf32> to vector<64x1xf32>
    %cst_7 = arith.constant 1.280000e+02 : f32
    %13 = vector.broadcast %cst_7 : f32 to vector<64x1xf32>
    %14 = arith.divf %12, %13 : vector<64x1xf32>
    %cst_8 = arith.constant 9.99999974E-6 : f32
    %15 = vector.broadcast %cst_8 : f32 to vector<64x1xf32>
    %16 = arith.addf %14, %15 : vector<64x1xf32>
    %17 = math.rsqrt %16 : vector<64x1xf32>
    %18 = vector.broadcast %17 : vector<64x1xf32> to vector<64x128xf32>
    %19 = arith.mulf %9, %18 : vector<64x128xf32>
    %20 = vector.broadcast %2 : vector<1x128xf32> to vector<64x128xf32>
    %21 = arith.mulf %19, %20 : vector<64x128xf32>
    %22 = vector.broadcast %3 : vector<1x128xf32> to vector<64x128xf32>
    %23 = arith.addf %21, %22 : vector<64x128xf32>
    %24 = arith.truncf %23 : vector<64x128xf32> to vector<64x128xbf16>
    %c0_9 = arith.constant 0 : index
    %c0_10 = arith.constant 0 : index
    %25 = vector.load %arg4[%c0_9, %c0_10] : memref<128x512xbf16, #tpu.memory_space<vmem>>, vector<128x512xbf16>
    %cst_11 = arith.constant dense<0.000000e+00> : vector<64x512xf32>
    %26 = tpu.matmul %24, %25, %cst_11 {dimension_numbers = #tpu.dot_dimension_numbers<[1], [0], [0], [1], [0, 0, 1, 1], [], []>} : vector<64x128xbf16>, vector<128x512xbf16>, vector<64x512xf32> -> vector<64x512xf32>
    %c0_12 = arith.constant 0 : index
    %c0_13 = arith.constant 0 : index
    %27 = vector.load %arg5[%c0_12, %c0_13] : memref<1x512xf32, #tpu.memory_space<vmem>>, vector<1x512xf32>
    %28 = vector.broadcast %27 : vector<1x512xf32> to vector<64x512xf32>
    %29 = arith.addf %26, %28 : vector<64x512xf32>
    %30 = arith.negf %29 : vector<64x512xf32>
    %31 = math.exp %30 : vector<64x512xf32>
    %cst_14 = arith.constant 1.000000e+00 : f32
    %32 = vector.broadcast %cst_14 : f32 to vector<64x512xf32>
    %33 = arith.addf %32, %31 : vector<64x512xf32>
    %34 = arith.divf %32, %33 : vector<64x512xf32>
    %35 = arith.mulf %29, %34 : vector<64x512xf32>
    %36 = arith.truncf %35 : vector<64x512xf32> to vector<64x512xbf16>
    %c0_15 = arith.constant 0 : index
    %c0_16 = arith.constant 0 : index
    %37 = vector.load %arg6[%c0_15, %c0_16] : memref<512x128xbf16, #tpu.memory_space<vmem>>, vector<512x128xbf16>
    %cst_17 = arith.constant dense<0.000000e+00> : vector<64x128xf32>
    %38 = tpu.matmul %36, %37, %cst_17 {dimension_numbers = #tpu.dot_dimension_numbers<[1], [0], [0], [1], [0, 0, 1, 1], [], []>} : vector<64x512xbf16>, vector<512x128xbf16>, vector<64x128xf32> -> vector<64x128xf32>
    %c0_18 = arith.constant 0 : index
    %c0_19 = arith.constant 0 : index
    %39 = vector.load %arg7[%c0_18, %c0_19] : memref<1x128xf32, #tpu.memory_space<vmem>>, vector<1x128xf32>
    %40 = vector.broadcast %39 : vector<1x128xf32> to vector<64x128xf32>
    %41 = arith.addf %38, %40 : vector<64x128xf32>
    %cst_20 = arith.constant 5.000000e-01 : f32
    %42 = vector.broadcast %cst_20 : f32 to vector<64x128xf32>
    %43 = arith.mulf %42, %41 : vector<64x128xf32>
    %44 = arith.addf %43, %1 : vector<64x128xf32>
    %45 = arith.truncf %44 : vector<64x128xf32> to vector<64x128xbf16>
    %c0_21 = arith.constant 0 : index
    %c0_22 = arith.constant 0 : index
    %46 = vector.load %arg8[%c0_21, %c0_22] : memref<64x128xbf16, #tpu.memory_space<vmem>>, vector<64x128xbf16>
    tpu.vector_store %arg8[%c0_21, %c0_22], %45 {strides = array<i32>} : memref<64x128xbf16, #tpu.memory_space<vmem>>, vector<64x128xbf16>,
    return
  }
  func.func @transform_0(%arg0: i32) -> (i32, i32) {
    %c0_i32 = arith.constant 0 : i32
    %c0_i32_0 = arith.constant 0 : i32
    return %arg0, %c0_i32 : i32, i32
  }
  func.func @transform_1(%arg0: i32) -> (i32, i32) {
    %c0_i32 = arith.constant 0 : i32
    %c0_i32_0 = arith.constant 0 : i32
    %c0_i32_1 = arith.constant 0 : i32
    return %c0_i32, %c0_i32_0 : i32, i32
  }
  func.func @transform_2(%arg0: i32) -> (i32, i32) {
    %c0_i32 = arith.constant 0 : i32
    %c0_i32_0 = arith.constant 0 : i32
    %c0_i32_1 = arith.constant 0 : i32
    return %c0_i32, %c0_i32_0 : i32, i32
  }
  func.func @transform_3(%arg0: i32) -> (i32, i32) {
    %c0_i32 = arith.constant 0 : i32
    %c0_i32_0 = arith.constant 0 : i32
    %c0_i32_1 = arith.constant 0 : i32
    return %c0_i32, %c0_i32_0 : i32, i32
  }
  func.func @transform_4(%arg0: i32) -> (i32, i32) {
    %c0_i32 = arith.constant 0 : i32
    %c0_i32_0 = arith.constant 0 : i32
    %c0_i32_1 = arith.constant 0 : i32
    return %c0_i32, %c0_i32_0 : i32, i32
  }
  func.func @transform_5(%arg0: i32) -> (i32, i32) {
    %c0_i32 = arith.constant 0 : i32
    %c0_i32_0 = arith.constant 0 : i32
    %c0_i32_1 = arith.constant 0 : i32
    return %c0_i32, %c0_i32_0 : i32, i32
  }
  func.func @transform_6(%arg0: i32) -> (i32, i32) {
    %c0_i32 = arith.constant 0 : i32
    %c0_i32_0 = arith.constant 0 : i32
    %c0_i32_1 = arith.constant 0 : i32
    return %c0_i32, %c0_i32_0 : i32, i32
  }
  func.func @transform_7(%arg0: i32) -> (i32, i32) {
    %c0_i32 = arith.constant 0 : i32
    %c0_i32_0 = arith.constant 0 : i32
    return %arg0, %c0_i32 : i32, i32
  }
}

module attributes {stable_mosaic.version = 11 : i64} {
  func.func @_mhsa_kernel(%arg0: i32, %arg1: memref<1x32x128xbf16, #tpu.memory_space<vmem>>, %arg2: memref<1x1x32xf32, #tpu.memory_space<vmem>>, %arg3: memref<1x128xf32, #tpu.memory_space<vmem>>, %arg4: memref<1x128xf32, #tpu.memory_space<vmem>>, %arg5: memref<128x128xbf16, #tpu.memory_space<vmem>>, %arg6: memref<1x128xf32, #tpu.memory_space<vmem>>, %arg7: memref<128x128xbf16, #tpu.memory_space<vmem>>, %arg8: memref<1x128xf32, #tpu.memory_space<vmem>>, %arg9: memref<128x128xbf16, #tpu.memory_space<vmem>>, %arg10: memref<1x128xf32, #tpu.memory_space<vmem>>, %arg11: memref<128x128xbf16, #tpu.memory_space<vmem>>, %arg12: memref<1x128xf32, #tpu.memory_space<vmem>>, %arg13: memref<1x32x128xbf16, #tpu.memory_space<vmem>>) attributes {dimension_semantics = [#tpu.dimension_semantics<parallel>], iteration_bounds = array<i64: 2>, scalar_prefetch = 0 : i64, scratch_operands = 0 : i64, tpu.core_type = #tpu.core_type<tc>, window_params = [{transform_indices = @transform_0, window_bounds = array<i64: 1, 32, 128>}, {transform_indices = @transform_1, window_bounds = array<i64: 1, 1, 32>}, {pipeline_mode = #tpu.pipeline_mode<synchronous>, transform_indices = @transform_2, window_bounds = array<i64: 1, 128>}, {pipeline_mode = #tpu.pipeline_mode<synchronous>, transform_indices = @transform_3, window_bounds = array<i64: 1, 128>}, {pipeline_mode = #tpu.pipeline_mode<synchronous>, transform_indices = @transform_4, window_bounds = array<i64: 128, 128>}, {pipeline_mode = #tpu.pipeline_mode<synchronous>, transform_indices = @transform_5, window_bounds = array<i64: 1, 128>}, {pipeline_mode = #tpu.pipeline_mode<synchronous>, transform_indices = @transform_6, window_bounds = array<i64: 128, 128>}, {pipeline_mode = #tpu.pipeline_mode<synchronous>, transform_indices = @transform_7, window_bounds = array<i64: 1, 128>}, {pipeline_mode = #tpu.pipeline_mode<synchronous>, transform_indices = @transform_8, window_bounds = array<i64: 128, 128>}, {pipeline_mode = #tpu.pipeline_mode<synchronous>, transform_indices = @transform_9, window_bounds = array<i64: 1, 128>}, {pipeline_mode = #tpu.pipeline_mode<synchronous>, transform_indices = @transform_10, window_bounds = array<i64: 128, 128>}, {pipeline_mode = #tpu.pipeline_mode<synchronous>, transform_indices = @transform_11, window_bounds = array<i64: 1, 128>}, {transform_indices = @transform_12, window_bounds = array<i64: 1, 32, 128>}]} {
    %c0 = arith.constant 0 : index
    %c0_0 = arith.constant 0 : index
    %c0_1 = arith.constant 0 : index
    %0 = vector.load %arg1[%c0, %c0_0, %c0_1] : memref<1x32x128xbf16, #tpu.memory_space<vmem>>, vector<1x32x128xbf16>
    %1 = vector.shape_cast %0 : vector<1x32x128xbf16> to vector<32x128xbf16>
    %2 = arith.extf %1 : vector<32x128xbf16> to vector<32x128xf32>
    %c0_2 = arith.constant 0 : index
    %c0_3 = arith.constant 0 : index
    %3 = vector.load %arg3[%c0_2, %c0_3] : memref<1x128xf32, #tpu.memory_space<vmem>>, vector<1x128xf32>
    %c0_4 = arith.constant 0 : index
    %c0_5 = arith.constant 0 : index
    %4 = vector.load %arg4[%c0_4, %c0_5] : memref<1x128xf32, #tpu.memory_space<vmem>>, vector<1x128xf32>
    %cst = arith.constant dense<0.000000e+00> : vector<32xf32>
    %5 = vector.multi_reduction <add>, %2, %cst [1] : vector<32x128xf32> to vector<32xf32>
    %6 = vector.shape_cast %5 : vector<32xf32> to vector<32x1xf32>
    %cst_6 = arith.constant 1.280000e+02 : f32
    %7 = vector.broadcast %cst_6 : f32 to vector<32x1xf32>
    %8 = arith.divf %6, %7 : vector<32x1xf32>
    %9 = vector.broadcast %8 : vector<32x1xf32> to vector<32x128xf32>
    %10 = arith.subf %2, %9 : vector<32x128xf32>
    %11 = arith.mulf %10, %10 : vector<32x128xf32>
    %cst_7 = arith.constant dense<0.000000e+00> : vector<32xf32>
    %12 = vector.multi_reduction <add>, %11, %cst_7 [1] : vector<32x128xf32> to vector<32xf32>
    %13 = vector.shape_cast %12 : vector<32xf32> to vector<32x1xf32>
    %cst_8 = arith.constant 1.280000e+02 : f32
    %14 = vector.broadcast %cst_8 : f32 to vector<32x1xf32>
    %15 = arith.divf %13, %14 : vector<32x1xf32>
    %cst_9 = arith.constant 9.99999974E-6 : f32
    %16 = vector.broadcast %cst_9 : f32 to vector<32x1xf32>
    %17 = arith.addf %15, %16 : vector<32x1xf32>
    %18 = math.rsqrt %17 : vector<32x1xf32>
    %19 = vector.broadcast %18 : vector<32x1xf32> to vector<32x128xf32>
    %20 = arith.mulf %10, %19 : vector<32x128xf32>
    %21 = vector.broadcast %3 : vector<1x128xf32> to vector<32x128xf32>
    %22 = arith.mulf %20, %21 : vector<32x128xf32>
    %23 = vector.broadcast %4 : vector<1x128xf32> to vector<32x128xf32>
    %24 = arith.addf %22, %23 : vector<32x128xf32>
    %25 = arith.truncf %24 : vector<32x128xf32> to vector<32x128xbf16>
    %c0_10 = arith.constant 0 : index
    %c0_11 = arith.constant 0 : index
    %c0_12 = arith.constant 0 : index
    %26 = vector.load %arg2[%c0_10, %c0_11, %c0_12] : memref<1x1x32xf32, #tpu.memory_space<vmem>>, vector<1x1x32xf32>
    %27 = vector.shape_cast %26 : vector<1x1x32xf32> to vector<1x32xf32>
    %c0_13 = arith.constant 0 : index
    %c0_14 = arith.constant 0 : index
    %28 = vector.load %arg5[%c0_13, %c0_14] : memref<128x128xbf16, #tpu.memory_space<vmem>>, vector<128x128xbf16>
    %cst_15 = arith.constant dense<0.000000e+00> : vector<32x128xf32>
    %29 = tpu.matmul %25, %28, %cst_15 {dimension_numbers = #tpu.dot_dimension_numbers<[1], [0], [0], [1], [0, 0, 1, 1], [], []>} : vector<32x128xbf16>, vector<128x128xbf16>, vector<32x128xf32> -> vector<32x128xf32>
    %c0_16 = arith.constant 0 : index
    %c0_17 = arith.constant 0 : index
    %30 = vector.load %arg6[%c0_16, %c0_17] : memref<1x128xf32, #tpu.memory_space<vmem>>, vector<1x128xf32>
    %31 = vector.broadcast %30 : vector<1x128xf32> to vector<32x128xf32>
    %32 = arith.addf %29, %31 : vector<32x128xf32>
    %c0_18 = arith.constant 0 : index
    %c0_19 = arith.constant 0 : index
    %33 = vector.load %arg7[%c0_18, %c0_19] : memref<128x128xbf16, #tpu.memory_space<vmem>>, vector<128x128xbf16>
    %cst_20 = arith.constant dense<0.000000e+00> : vector<32x128xf32>
    %34 = tpu.matmul %25, %33, %cst_20 {dimension_numbers = #tpu.dot_dimension_numbers<[1], [0], [0], [1], [0, 0, 1, 1], [], []>} : vector<32x128xbf16>, vector<128x128xbf16>, vector<32x128xf32> -> vector<32x128xf32>
    %c0_21 = arith.constant 0 : index
    %c0_22 = arith.constant 0 : index
    %35 = vector.load %arg8[%c0_21, %c0_22] : memref<1x128xf32, #tpu.memory_space<vmem>>, vector<1x128xf32>
    %36 = vector.broadcast %35 : vector<1x128xf32> to vector<32x128xf32>
    %37 = arith.addf %34, %36 : vector<32x128xf32>
    %c0_23 = arith.constant 0 : index
    %c0_24 = arith.constant 0 : index
    %38 = vector.load %arg9[%c0_23, %c0_24] : memref<128x128xbf16, #tpu.memory_space<vmem>>, vector<128x128xbf16>
    %cst_25 = arith.constant dense<0.000000e+00> : vector<32x128xf32>
    %39 = tpu.matmul %25, %38, %cst_25 {dimension_numbers = #tpu.dot_dimension_numbers<[1], [0], [0], [1], [0, 0, 1, 1], [], []>} : vector<32x128xbf16>, vector<128x128xbf16>, vector<32x128xf32> -> vector<32x128xf32>
    %c0_26 = arith.constant 0 : index
    %c0_27 = arith.constant 0 : index
    %40 = vector.load %arg10[%c0_26, %c0_27] : memref<1x128xf32, #tpu.memory_space<vmem>>, vector<1x128xf32>
    %41 = vector.broadcast %40 : vector<1x128xf32> to vector<32x128xf32>
    %42 = arith.addf %39, %41 : vector<32x128xf32>
    %43 = vector.extract_strided_slice %32 {offsets = [0, 0], sizes = [32, 64], strides = [1, 1]} : vector<32x128xf32> to vector<32x64xf32>
    %44 = arith.truncf %43 : vector<32x64xf32> to vector<32x64xbf16>
    %45 = vector.extract_strided_slice %37 {offsets = [0, 0], sizes = [32, 64], strides = [1, 1]} : vector<32x128xf32> to vector<32x64xf32>
    %46 = arith.truncf %45 : vector<32x64xf32> to vector<32x64xbf16>
    %47 = vector.extract_strided_slice %42 {offsets = [0, 0], sizes = [32, 64], strides = [1, 1]} : vector<32x128xf32> to vector<32x64xf32>
    %48 = arith.truncf %47 : vector<32x64xf32> to vector<32x64xbf16>
    %cst_28 = arith.constant dense<0.000000e+00> : vector<32x32xf32>
    %49 = tpu.matmul %44, %46, %cst_28 {dimension_numbers = #tpu.dot_dimension_numbers<[1], [1], [0], [0], [0, 0, 1, 0], [], []>} : vector<32x64xbf16>, vector<32x64xbf16>, vector<32x32xf32> -> vector<32x32xf32>
    %cst_29 = arith.constant 1.250000e-01 : f32
    %50 = vector.broadcast %cst_29 : f32 to vector<32x32xf32>
    %51 = arith.mulf %49, %50 : vector<32x32xf32>
    %52 = vector.broadcast %27 : vector<1x32xf32> to vector<32x32xf32>
    %53 = arith.addf %51, %52 : vector<32x32xf32>
    %cst_30 = arith.constant dense<0xFF800000> : vector<32xf32>
    %54 = vector.multi_reduction <maximumf>, %53, %cst_30 [1] : vector<32x32xf32> to vector<32xf32>
    %55 = vector.shape_cast %54 : vector<32xf32> to vector<32x1xf32>
    %56 = vector.broadcast %55 : vector<32x1xf32> to vector<32x32xf32>
    %57 = arith.subf %53, %56 : vector<32x32xf32>
    %58 = math.exp %57 : vector<32x32xf32>
    %cst_31 = arith.constant dense<0.000000e+00> : vector<32xf32>
    %59 = vector.multi_reduction <add>, %58, %cst_31 [1] : vector<32x32xf32> to vector<32xf32>
    %60 = vector.shape_cast %59 : vector<32xf32> to vector<32x1xf32>
    %61 = tpu.reciprocal %60 {approx = true} : vector<32x1xf32> -> vector<32x1xf32>
    %62 = vector.broadcast %61 : vector<32x1xf32> to vector<32x32xf32>
    %63 = arith.mulf %58, %62 : vector<32x32xf32>
    %64 = arith.truncf %63 : vector<32x32xf32> to vector<32x32xbf16>
    %cst_32 = arith.constant dense<0.000000e+00> : vector<32x64xf32>
    %65 = tpu.matmul %64, %48, %cst_32 {dimension_numbers = #tpu.dot_dimension_numbers<[1], [0], [0], [1], [0, 0, 1, 1], [], []>} : vector<32x32xbf16>, vector<32x64xbf16>, vector<32x64xf32> -> vector<32x64xf32>
    %66 = vector.extract_strided_slice %32 {offsets = [0, 64], sizes = [32, 64], strides = [1, 1]} : vector<32x128xf32> to vector<32x64xf32>
    %67 = arith.truncf %66 : vector<32x64xf32> to vector<32x64xbf16>
    %68 = vector.extract_strided_slice %37 {offsets = [0, 64], sizes = [32, 64], strides = [1, 1]} : vector<32x128xf32> to vector<32x64xf32>
    %69 = arith.truncf %68 : vector<32x64xf32> to vector<32x64xbf16>
    %70 = vector.extract_strided_slice %42 {offsets = [0, 64], sizes = [32, 64], strides = [1, 1]} : vector<32x128xf32> to vector<32x64xf32>
    %71 = arith.truncf %70 : vector<32x64xf32> to vector<32x64xbf16>
    %cst_33 = arith.constant dense<0.000000e+00> : vector<32x32xf32>
    %72 = tpu.matmul %67, %69, %cst_33 {dimension_numbers = #tpu.dot_dimension_numbers<[1], [1], [0], [0], [0, 0, 1, 0], [], []>} : vector<32x64xbf16>, vector<32x64xbf16>, vector<32x32xf32> -> vector<32x32xf32>
    %cst_34 = arith.constant 1.250000e-01 : f32
    %73 = vector.broadcast %cst_34 : f32 to vector<32x32xf32>
    %74 = arith.mulf %72, %73 : vector<32x32xf32>
    %75 = vector.broadcast %27 : vector<1x32xf32> to vector<32x32xf32>
    %76 = arith.addf %74, %75 : vector<32x32xf32>
    %cst_35 = arith.constant dense<0xFF800000> : vector<32xf32>
    %77 = vector.multi_reduction <maximumf>, %76, %cst_35 [1] : vector<32x32xf32> to vector<32xf32>
    %78 = vector.shape_cast %77 : vector<32xf32> to vector<32x1xf32>
    %79 = vector.broadcast %78 : vector<32x1xf32> to vector<32x32xf32>
    %80 = arith.subf %76, %79 : vector<32x32xf32>
    %81 = math.exp %80 : vector<32x32xf32>
    %cst_36 = arith.constant dense<0.000000e+00> : vector<32xf32>
    %82 = vector.multi_reduction <add>, %81, %cst_36 [1] : vector<32x32xf32> to vector<32xf32>
    %83 = vector.shape_cast %82 : vector<32xf32> to vector<32x1xf32>
    %84 = tpu.reciprocal %83 {approx = true} : vector<32x1xf32> -> vector<32x1xf32>
    %85 = vector.broadcast %84 : vector<32x1xf32> to vector<32x32xf32>
    %86 = arith.mulf %81, %85 : vector<32x32xf32>
    %87 = arith.truncf %86 : vector<32x32xf32> to vector<32x32xbf16>
    %cst_37 = arith.constant dense<0.000000e+00> : vector<32x64xf32>
    %88 = tpu.matmul %87, %71, %cst_37 {dimension_numbers = #tpu.dot_dimension_numbers<[1], [0], [0], [1], [0, 0, 1, 1], [], []>} : vector<32x32xbf16>, vector<32x64xbf16>, vector<32x64xf32> -> vector<32x64xf32>
    %89 = tpu.concatenate %65, %88 in 1 : vector<32x64xf32>, vector<32x64xf32> -> vector<32x128xf32>
    %90 = arith.truncf %89 : vector<32x128xf32> to vector<32x128xbf16>
    %c0_38 = arith.constant 0 : index
    %c0_39 = arith.constant 0 : index
    %91 = vector.load %arg11[%c0_38, %c0_39] : memref<128x128xbf16, #tpu.memory_space<vmem>>, vector<128x128xbf16>
    %cst_40 = arith.constant dense<0.000000e+00> : vector<32x128xf32>
    %92 = tpu.matmul %90, %91, %cst_40 {dimension_numbers = #tpu.dot_dimension_numbers<[1], [0], [0], [1], [0, 0, 1, 1], [], []>} : vector<32x128xbf16>, vector<128x128xbf16>, vector<32x128xf32> -> vector<32x128xf32>
    %c0_41 = arith.constant 0 : index
    %c0_42 = arith.constant 0 : index
    %93 = vector.load %arg12[%c0_41, %c0_42] : memref<1x128xf32, #tpu.memory_space<vmem>>, vector<1x128xf32>
    %94 = vector.broadcast %93 : vector<1x128xf32> to vector<32x128xf32>
    %95 = arith.addf %92, %94 : vector<32x128xf32>
    %96 = arith.addf %95, %2 : vector<32x128xf32>
    %97 = arith.truncf %96 : vector<32x128xf32> to vector<32x128xbf16>
    %c0_43 = arith.constant 0 : index
    %c0_44 = arith.constant 0 : index
    %c0_45 = arith.constant 0 : index
    %98 = vector.load %arg13[%c0_43, %c0_44, %c0_45] : memref<1x32x128xbf16, #tpu.memory_space<vmem>>, vector<1x32x128xbf16>
    %99 = vector.shape_cast %98 : vector<1x32x128xbf16> to vector<32x128xbf16>
    %100 = vector.shape_cast %97 : vector<32x128xbf16> to vector<1x32x128xbf16>
    tpu.vector_store %arg13[%c0_43, %c0_44, %c0_45], %100 {strides = array<i32>} : memref<1x32x128xbf16, #tpu.memory_space<vmem>>, vector<1x32x128xbf16>,
    return
  }
  func.func @transform_0(%arg0: i32) -> (i32, i32, i32) {
    %c0_i32 = arith.constant 0 : i32
    %c0_i32_0 = arith.constant 0 : i32
    %c0_i32_1 = arith.constant 0 : i32
    return %arg0, %c0_i32, %c0_i32_0 : i32, i32, i32
  }
  func.func @transform_1(%arg0: i32) -> (i32, i32, i32) {
    %c0_i32 = arith.constant 0 : i32
    %c0_i32_0 = arith.constant 0 : i32
    %c0_i32_1 = arith.constant 0 : i32
    return %arg0, %c0_i32, %c0_i32_0 : i32, i32, i32
  }
  func.func @transform_2(%arg0: i32) -> (i32, i32) {
    %c0_i32 = arith.constant 0 : i32
    %c0_i32_0 = arith.constant 0 : i32
    %c0_i32_1 = arith.constant 0 : i32
    return %c0_i32, %c0_i32_0 : i32, i32
  }
  func.func @transform_3(%arg0: i32) -> (i32, i32) {
    %c0_i32 = arith.constant 0 : i32
    %c0_i32_0 = arith.constant 0 : i32
    %c0_i32_1 = arith.constant 0 : i32
    return %c0_i32, %c0_i32_0 : i32, i32
  }
  func.func @transform_4(%arg0: i32) -> (i32, i32) {
    %c0_i32 = arith.constant 0 : i32
    %c0_i32_0 = arith.constant 0 : i32
    %c0_i32_1 = arith.constant 0 : i32
    return %c0_i32, %c0_i32_0 : i32, i32
  }
  func.func @transform_5(%arg0: i32) -> (i32, i32) {
    %c0_i32 = arith.constant 0 : i32
    %c0_i32_0 = arith.constant 0 : i32
    %c0_i32_1 = arith.constant 0 : i32
    return %c0_i32, %c0_i32_0 : i32, i32
  }
  func.func @transform_6(%arg0: i32) -> (i32, i32) {
    %c0_i32 = arith.constant 0 : i32
    %c0_i32_0 = arith.constant 0 : i32
    %c0_i32_1 = arith.constant 0 : i32
    return %c0_i32, %c0_i32_0 : i32, i32
  }
  func.func @transform_7(%arg0: i32) -> (i32, i32) {
    %c0_i32 = arith.constant 0 : i32
    %c0_i32_0 = arith.constant 0 : i32
    %c0_i32_1 = arith.constant 0 : i32
    return %c0_i32, %c0_i32_0 : i32, i32
  }
  func.func @transform_8(%arg0: i32) -> (i32, i32) {
    %c0_i32 = arith.constant 0 : i32
    %c0_i32_0 = arith.constant 0 : i32
    %c0_i32_1 = arith.constant 0 : i32
    return %c0_i32, %c0_i32_0 : i32, i32
  }
  func.func @transform_9(%arg0: i32) -> (i32, i32) {
    %c0_i32 = arith.constant 0 : i32
    %c0_i32_0 = arith.constant 0 : i32
    %c0_i32_1 = arith.constant 0 : i32
    return %c0_i32, %c0_i32_0 : i32, i32
  }
  func.func @transform_10(%arg0: i32) -> (i32, i32) {
    %c0_i32 = arith.constant 0 : i32
    %c0_i32_0 = arith.constant 0 : i32
    %c0_i32_1 = arith.constant 0 : i32
    return %c0_i32, %c0_i32_0 : i32, i32
  }
  func.func @transform_11(%arg0: i32) -> (i32, i32) {
    %c0_i32 = arith.constant 0 : i32
    %c0_i32_0 = arith.constant 0 : i32
    %c0_i32_1 = arith.constant 0 : i32
    return %c0_i32, %c0_i32_0 : i32, i32
  }
  func.func @transform_12(%arg0: i32) -> (i32, i32, i32) {
    %c0_i32 = arith.constant 0 : i32
    %c0_i32_0 = arith.constant 0 : i32
    %c0_i32_1 = arith.constant 0 : i32
    return %arg0, %c0_i32, %c0_i32_0 : i32, i32, i32
  }
}

module attributes {stable_mosaic.version = 11 : i64} {
  func.func @_ff_final_ln_kernel(%arg0: i32, %arg1: memref<64x128xbf16, #tpu.memory_space<vmem>>, %arg2: memref<1x128xf32, #tpu.memory_space<vmem>>, %arg3: memref<1x128xf32, #tpu.memory_space<vmem>>, %arg4: memref<128x512xbf16, #tpu.memory_space<vmem>>, %arg5: memref<1x512xf32, #tpu.memory_space<vmem>>, %arg6: memref<512x128xbf16, #tpu.memory_space<vmem>>, %arg7: memref<1x128xf32, #tpu.memory_space<vmem>>, %arg8: memref<1x128xf32, #tpu.memory_space<vmem>>, %arg9: memref<1x128xf32, #tpu.memory_space<vmem>>, %arg10: memref<64x128xbf16, #tpu.memory_space<vmem>>) attributes {dimension_semantics = [#tpu.dimension_semantics<parallel>], iteration_bounds = array<i64: 1>, scalar_prefetch = 0 : i64, scratch_operands = 0 : i64, tpu.core_type = #tpu.core_type<tc>, window_params = [{transform_indices = @transform_0, window_bounds = array<i64: 64, 128>}, {pipeline_mode = #tpu.pipeline_mode<synchronous>, transform_indices = @transform_1, window_bounds = array<i64: 1, 128>}, {pipeline_mode = #tpu.pipeline_mode<synchronous>, transform_indices = @transform_2, window_bounds = array<i64: 1, 128>}, {pipeline_mode = #tpu.pipeline_mode<synchronous>, transform_indices = @transform_3, window_bounds = array<i64: 128, 512>}, {pipeline_mode = #tpu.pipeline_mode<synchronous>, transform_indices = @transform_4, window_bounds = array<i64: 1, 512>}, {pipeline_mode = #tpu.pipeline_mode<synchronous>, transform_indices = @transform_5, window_bounds = array<i64: 512, 128>}, {pipeline_mode = #tpu.pipeline_mode<synchronous>, transform_indices = @transform_6, window_bounds = array<i64: 1, 128>}, {pipeline_mode = #tpu.pipeline_mode<synchronous>, transform_indices = @transform_7, window_bounds = array<i64: 1, 128>}, {pipeline_mode = #tpu.pipeline_mode<synchronous>, transform_indices = @transform_8, window_bounds = array<i64: 1, 128>}, {transform_indices = @transform_9, window_bounds = array<i64: 64, 128>}]} {
    %c0 = arith.constant 0 : index
    %c0_0 = arith.constant 0 : index
    %0 = vector.load %arg1[%c0, %c0_0] : memref<64x128xbf16, #tpu.memory_space<vmem>>, vector<64x128xbf16>
    %1 = arith.extf %0 : vector<64x128xbf16> to vector<64x128xf32>
    %c0_1 = arith.constant 0 : index
    %c0_2 = arith.constant 0 : index
    %2 = vector.load %arg2[%c0_1, %c0_2] : memref<1x128xf32, #tpu.memory_space<vmem>>, vector<1x128xf32>
    %c0_3 = arith.constant 0 : index
    %c0_4 = arith.constant 0 : index
    %3 = vector.load %arg3[%c0_3, %c0_4] : memref<1x128xf32, #tpu.memory_space<vmem>>, vector<1x128xf32>
    %cst = arith.constant dense<0.000000e+00> : vector<64xf32>
    %4 = vector.multi_reduction <add>, %1, %cst [1] : vector<64x128xf32> to vector<64xf32>
    %5 = vector.shape_cast %4 : vector<64xf32> to vector<64x1xf32>
    %cst_5 = arith.constant 1.280000e+02 : f32
    %6 = vector.broadcast %cst_5 : f32 to vector<64x1xf32>
    %7 = arith.divf %5, %6 : vector<64x1xf32>
    %8 = vector.broadcast %7 : vector<64x1xf32> to vector<64x128xf32>
    %9 = arith.subf %1, %8 : vector<64x128xf32>
    %10 = arith.mulf %9, %9 : vector<64x128xf32>
    %cst_6 = arith.constant dense<0.000000e+00> : vector<64xf32>
    %11 = vector.multi_reduction <add>, %10, %cst_6 [1] : vector<64x128xf32> to vector<64xf32>
    %12 = vector.shape_cast %11 : vector<64xf32> to vector<64x1xf32>
    %cst_7 = arith.constant 1.280000e+02 : f32
    %13 = vector.broadcast %cst_7 : f32 to vector<64x1xf32>
    %14 = arith.divf %12, %13 : vector<64x1xf32>
    %cst_8 = arith.constant 9.99999974E-6 : f32
    %15 = vector.broadcast %cst_8 : f32 to vector<64x1xf32>
    %16 = arith.addf %14, %15 : vector<64x1xf32>
    %17 = math.rsqrt %16 : vector<64x1xf32>
    %18 = vector.broadcast %17 : vector<64x1xf32> to vector<64x128xf32>
    %19 = arith.mulf %9, %18 : vector<64x128xf32>
    %20 = vector.broadcast %2 : vector<1x128xf32> to vector<64x128xf32>
    %21 = arith.mulf %19, %20 : vector<64x128xf32>
    %22 = vector.broadcast %3 : vector<1x128xf32> to vector<64x128xf32>
    %23 = arith.addf %21, %22 : vector<64x128xf32>
    %24 = arith.truncf %23 : vector<64x128xf32> to vector<64x128xbf16>
    %c0_9 = arith.constant 0 : index
    %c0_10 = arith.constant 0 : index
    %25 = vector.load %arg4[%c0_9, %c0_10] : memref<128x512xbf16, #tpu.memory_space<vmem>>, vector<128x512xbf16>
    %cst_11 = arith.constant dense<0.000000e+00> : vector<64x512xf32>
    %26 = tpu.matmul %24, %25, %cst_11 {dimension_numbers = #tpu.dot_dimension_numbers<[1], [0], [0], [1], [0, 0, 1, 1], [], []>} : vector<64x128xbf16>, vector<128x512xbf16>, vector<64x512xf32> -> vector<64x512xf32>
    %c0_12 = arith.constant 0 : index
    %c0_13 = arith.constant 0 : index
    %27 = vector.load %arg5[%c0_12, %c0_13] : memref<1x512xf32, #tpu.memory_space<vmem>>, vector<1x512xf32>
    %28 = vector.broadcast %27 : vector<1x512xf32> to vector<64x512xf32>
    %29 = arith.addf %26, %28 : vector<64x512xf32>
    %30 = arith.negf %29 : vector<64x512xf32>
    %31 = math.exp %30 : vector<64x512xf32>
    %cst_14 = arith.constant 1.000000e+00 : f32
    %32 = vector.broadcast %cst_14 : f32 to vector<64x512xf32>
    %33 = arith.addf %32, %31 : vector<64x512xf32>
    %34 = arith.divf %32, %33 : vector<64x512xf32>
    %35 = arith.mulf %29, %34 : vector<64x512xf32>
    %36 = arith.truncf %35 : vector<64x512xf32> to vector<64x512xbf16>
    %c0_15 = arith.constant 0 : index
    %c0_16 = arith.constant 0 : index
    %37 = vector.load %arg6[%c0_15, %c0_16] : memref<512x128xbf16, #tpu.memory_space<vmem>>, vector<512x128xbf16>
    %cst_17 = arith.constant dense<0.000000e+00> : vector<64x128xf32>
    %38 = tpu.matmul %36, %37, %cst_17 {dimension_numbers = #tpu.dot_dimension_numbers<[1], [0], [0], [1], [0, 0, 1, 1], [], []>} : vector<64x512xbf16>, vector<512x128xbf16>, vector<64x128xf32> -> vector<64x128xf32>
    %c0_18 = arith.constant 0 : index
    %c0_19 = arith.constant 0 : index
    %39 = vector.load %arg7[%c0_18, %c0_19] : memref<1x128xf32, #tpu.memory_space<vmem>>, vector<1x128xf32>
    %40 = vector.broadcast %39 : vector<1x128xf32> to vector<64x128xf32>
    %41 = arith.addf %38, %40 : vector<64x128xf32>
    %cst_20 = arith.constant 5.000000e-01 : f32
    %42 = vector.broadcast %cst_20 : f32 to vector<64x128xf32>
    %43 = arith.mulf %42, %41 : vector<64x128xf32>
    %44 = arith.addf %43, %1 : vector<64x128xf32>
    %c0_21 = arith.constant 0 : index
    %c0_22 = arith.constant 0 : index
    %45 = vector.load %arg8[%c0_21, %c0_22] : memref<1x128xf32, #tpu.memory_space<vmem>>, vector<1x128xf32>
    %c0_23 = arith.constant 0 : index
    %c0_24 = arith.constant 0 : index
    %46 = vector.load %arg9[%c0_23, %c0_24] : memref<1x128xf32, #tpu.memory_space<vmem>>, vector<1x128xf32>
    %cst_25 = arith.constant dense<0.000000e+00> : vector<64xf32>
    %47 = vector.multi_reduction <add>, %44, %cst_25 [1] : vector<64x128xf32> to vector<64xf32>
    %48 = vector.shape_cast %47 : vector<64xf32> to vector<64x1xf32>
    %cst_26 = arith.constant 1.280000e+02 : f32
    %49 = vector.broadcast %cst_26 : f32 to vector<64x1xf32>
    %50 = arith.divf %48, %49 : vector<64x1xf32>
    %51 = vector.broadcast %50 : vector<64x1xf32> to vector<64x128xf32>
    %52 = arith.subf %44, %51 : vector<64x128xf32>
    %53 = arith.mulf %52, %52 : vector<64x128xf32>
    %cst_27 = arith.constant dense<0.000000e+00> : vector<64xf32>
    %54 = vector.multi_reduction <add>, %53, %cst_27 [1] : vector<64x128xf32> to vector<64xf32>
    %55 = vector.shape_cast %54 : vector<64xf32> to vector<64x1xf32>
    %cst_28 = arith.constant 1.280000e+02 : f32
    %56 = vector.broadcast %cst_28 : f32 to vector<64x1xf32>
    %57 = arith.divf %55, %56 : vector<64x1xf32>
    %cst_29 = arith.constant 9.99999974E-6 : f32
    %58 = vector.broadcast %cst_29 : f32 to vector<64x1xf32>
    %59 = arith.addf %57, %58 : vector<64x1xf32>
    %60 = math.rsqrt %59 : vector<64x1xf32>
    %61 = vector.broadcast %60 : vector<64x1xf32> to vector<64x128xf32>
    %62 = arith.mulf %52, %61 : vector<64x128xf32>
    %63 = vector.broadcast %45 : vector<1x128xf32> to vector<64x128xf32>
    %64 = arith.mulf %62, %63 : vector<64x128xf32>
    %65 = vector.broadcast %46 : vector<1x128xf32> to vector<64x128xf32>
    %66 = arith.addf %64, %65 : vector<64x128xf32>
    %67 = arith.truncf %66 : vector<64x128xf32> to vector<64x128xbf16>
    %c0_30 = arith.constant 0 : index
    %c0_31 = arith.constant 0 : index
    %68 = vector.load %arg10[%c0_30, %c0_31] : memref<64x128xbf16, #tpu.memory_space<vmem>>, vector<64x128xbf16>
    tpu.vector_store %arg10[%c0_30, %c0_31], %67 {strides = array<i32>} : memref<64x128xbf16, #tpu.memory_space<vmem>>, vector<64x128xbf16>,
    return
  }
  func.func @transform_0(%arg0: i32) -> (i32, i32) {
    %c0_i32 = arith.constant 0 : i32
    %c0_i32_0 = arith.constant 0 : i32
    return %arg0, %c0_i32 : i32, i32
  }
  func.func @transform_1(%arg0: i32) -> (i32, i32) {
    %c0_i32 = arith.constant 0 : i32
    %c0_i32_0 = arith.constant 0 : i32
    %c0_i32_1 = arith.constant 0 : i32
    return %c0_i32, %c0_i32_0 : i32, i32
  }
  func.func @transform_2(%arg0: i32) -> (i32, i32) {
    %c0_i32 = arith.constant 0 : i32
    %c0_i32_0 = arith.constant 0 : i32
    %c0_i32_1 = arith.constant 0 : i32
    return %c0_i32, %c0_i32_0 : i32, i32
  }
  func.func @transform_3(%arg0: i32) -> (i32, i32) {
    %c0_i32 = arith.constant 0 : i32
    %c0_i32_0 = arith.constant 0 : i32
    %c0_i32_1 = arith.constant 0 : i32
    return %c0_i32, %c0_i32_0 : i32, i32
  }
  func.func @transform_4(%arg0: i32) -> (i32, i32) {
    %c0_i32 = arith.constant 0 : i32
    %c0_i32_0 = arith.constant 0 : i32
    %c0_i32_1 = arith.constant 0 : i32
    return %c0_i32, %c0_i32_0 : i32, i32
  }
  func.func @transform_5(%arg0: i32) -> (i32, i32) {
    %c0_i32 = arith.constant 0 : i32
    %c0_i32_0 = arith.constant 0 : i32
    %c0_i32_1 = arith.constant 0 : i32
    return %c0_i32, %c0_i32_0 : i32, i32
  }
  func.func @transform_6(%arg0: i32) -> (i32, i32) {
    %c0_i32 = arith.constant 0 : i32
    %c0_i32_0 = arith.constant 0 : i32
    %c0_i32_1 = arith.constant 0 : i32
    return %c0_i32, %c0_i32_0 : i32, i32
  }
  func.func @transform_7(%arg0: i32) -> (i32, i32) {
    %c0_i32 = arith.constant 0 : i32
    %c0_i32_0 = arith.constant 0 : i32
    %c0_i32_1 = arith.constant 0 : i32
    return %c0_i32, %c0_i32_0 : i32, i32
  }
  func.func @transform_8(%arg0: i32) -> (i32, i32) {
    %c0_i32 = arith.constant 0 : i32
    %c0_i32_0 = arith.constant 0 : i32
    %c0_i32_1 = arith.constant 0 : i32
    return %c0_i32, %c0_i32_0 : i32, i32
  }
  func.func @transform_9(%arg0: i32) -> (i32, i32) {
    %c0_i32 = arith.constant 0 : i32
    %c0_i32_0 = arith.constant 0 : i32
    return %arg0, %c0_i32 : i32, i32
  }
}

module attributes {stable_mosaic.version = 11 : i64} {
  func.func @_ff_kernel(%arg0: i32, %arg1: memref<64x128xbf16, #tpu.memory_space<vmem>>, %arg2: memref<1x128xf32, #tpu.memory_space<vmem>>, %arg3: memref<1x128xf32, #tpu.memory_space<vmem>>, %arg4: memref<128x512xbf16, #tpu.memory_space<vmem>>, %arg5: memref<1x512xf32, #tpu.memory_space<vmem>>, %arg6: memref<512x128xbf16, #tpu.memory_space<vmem>>, %arg7: memref<1x128xf32, #tpu.memory_space<vmem>>, %arg8: memref<64x128xbf16, #tpu.memory_space<vmem>>) attributes {dimension_semantics = [#tpu.dimension_semantics<parallel>], iteration_bounds = array<i64: 1>, scalar_prefetch = 0 : i64, scratch_operands = 0 : i64, tpu.core_type = #tpu.core_type<tc>, window_params = [{transform_indices = @transform_0, window_bounds = array<i64: 64, 128>}, {pipeline_mode = #tpu.pipeline_mode<synchronous>, transform_indices = @transform_1, window_bounds = array<i64: 1, 128>}, {pipeline_mode = #tpu.pipeline_mode<synchronous>, transform_indices = @transform_2, window_bounds = array<i64: 1, 128>}, {pipeline_mode = #tpu.pipeline_mode<synchronous>, transform_indices = @transform_3, window_bounds = array<i64: 128, 512>}, {pipeline_mode = #tpu.pipeline_mode<synchronous>, transform_indices = @transform_4, window_bounds = array<i64: 1, 512>}, {pipeline_mode = #tpu.pipeline_mode<synchronous>, transform_indices = @transform_5, window_bounds = array<i64: 512, 128>}, {pipeline_mode = #tpu.pipeline_mode<synchronous>, transform_indices = @transform_6, window_bounds = array<i64: 1, 128>}, {transform_indices = @transform_7, window_bounds = array<i64: 64, 128>}]} {
    %c0 = arith.constant 0 : index
    %c0_0 = arith.constant 0 : index
    %0 = vector.load %arg1[%c0, %c0_0] : memref<64x128xbf16, #tpu.memory_space<vmem>>, vector<64x128xbf16>
    %1 = arith.extf %0 : vector<64x128xbf16> to vector<64x128xf32>
    %c0_1 = arith.constant 0 : index
    %c0_2 = arith.constant 0 : index
    %2 = vector.load %arg2[%c0_1, %c0_2] : memref<1x128xf32, #tpu.memory_space<vmem>>, vector<1x128xf32>
    %c0_3 = arith.constant 0 : index
    %c0_4 = arith.constant 0 : index
    %3 = vector.load %arg3[%c0_3, %c0_4] : memref<1x128xf32, #tpu.memory_space<vmem>>, vector<1x128xf32>
    %cst = arith.constant dense<0.000000e+00> : vector<64xf32>
    %4 = vector.multi_reduction <add>, %1, %cst [1] : vector<64x128xf32> to vector<64xf32>
    %5 = vector.shape_cast %4 : vector<64xf32> to vector<64x1xf32>
    %cst_5 = arith.constant 1.280000e+02 : f32
    %6 = vector.broadcast %cst_5 : f32 to vector<64x1xf32>
    %7 = arith.divf %5, %6 : vector<64x1xf32>
    %8 = vector.broadcast %7 : vector<64x1xf32> to vector<64x128xf32>
    %9 = arith.subf %1, %8 : vector<64x128xf32>
    %10 = arith.mulf %9, %9 : vector<64x128xf32>
    %cst_6 = arith.constant dense<0.000000e+00> : vector<64xf32>
    %11 = vector.multi_reduction <add>, %10, %cst_6 [1] : vector<64x128xf32> to vector<64xf32>
    %12 = vector.shape_cast %11 : vector<64xf32> to vector<64x1xf32>
    %cst_7 = arith.constant 1.280000e+02 : f32
    %13 = vector.broadcast %cst_7 : f32 to vector<64x1xf32>
    %14 = arith.divf %12, %13 : vector<64x1xf32>
    %cst_8 = arith.constant 9.99999974E-6 : f32
    %15 = vector.broadcast %cst_8 : f32 to vector<64x1xf32>
    %16 = arith.addf %14, %15 : vector<64x1xf32>
    %17 = math.rsqrt %16 : vector<64x1xf32>
    %18 = vector.broadcast %17 : vector<64x1xf32> to vector<64x128xf32>
    %19 = arith.mulf %9, %18 : vector<64x128xf32>
    %20 = vector.broadcast %2 : vector<1x128xf32> to vector<64x128xf32>
    %21 = arith.mulf %19, %20 : vector<64x128xf32>
    %22 = vector.broadcast %3 : vector<1x128xf32> to vector<64x128xf32>
    %23 = arith.addf %21, %22 : vector<64x128xf32>
    %24 = arith.truncf %23 : vector<64x128xf32> to vector<64x128xbf16>
    %c0_9 = arith.constant 0 : index
    %c0_10 = arith.constant 0 : index
    %25 = vector.load %arg4[%c0_9, %c0_10] : memref<128x512xbf16, #tpu.memory_space<vmem>>, vector<128x512xbf16>
    %cst_11 = arith.constant dense<0.000000e+00> : vector<64x512xf32>
    %26 = tpu.matmul %24, %25, %cst_11 {dimension_numbers = #tpu.dot_dimension_numbers<[1], [0], [0], [1], [0, 0, 1, 1], [], []>} : vector<64x128xbf16>, vector<128x512xbf16>, vector<64x512xf32> -> vector<64x512xf32>
    %c0_12 = arith.constant 0 : index
    %c0_13 = arith.constant 0 : index
    %27 = vector.load %arg5[%c0_12, %c0_13] : memref<1x512xf32, #tpu.memory_space<vmem>>, vector<1x512xf32>
    %28 = vector.broadcast %27 : vector<1x512xf32> to vector<64x512xf32>
    %29 = arith.addf %26, %28 : vector<64x512xf32>
    %30 = arith.negf %29 : vector<64x512xf32>
    %31 = math.exp %30 : vector<64x512xf32>
    %cst_14 = arith.constant 1.000000e+00 : f32
    %32 = vector.broadcast %cst_14 : f32 to vector<64x512xf32>
    %33 = arith.addf %32, %31 : vector<64x512xf32>
    %34 = arith.divf %32, %33 : vector<64x512xf32>
    %35 = arith.mulf %29, %34 : vector<64x512xf32>
    %36 = arith.truncf %35 : vector<64x512xf32> to vector<64x512xbf16>
    %c0_15 = arith.constant 0 : index
    %c0_16 = arith.constant 0 : index
    %37 = vector.load %arg6[%c0_15, %c0_16] : memref<512x128xbf16, #tpu.memory_space<vmem>>, vector<512x128xbf16>
    %cst_17 = arith.constant dense<0.000000e+00> : vector<64x128xf32>
    %38 = tpu.matmul %36, %37, %cst_17 {dimension_numbers = #tpu.dot_dimension_numbers<[1], [0], [0], [1], [0, 0, 1, 1], [], []>} : vector<64x512xbf16>, vector<512x128xbf16>, vector<64x128xf32> -> vector<64x128xf32>
    %c0_18 = arith.constant 0 : index
    %c0_19 = arith.constant 0 : index
    %39 = vector.load %arg7[%c0_18, %c0_19] : memref<1x128xf32, #tpu.memory_space<vmem>>, vector<1x128xf32>
    %40 = vector.broadcast %39 : vector<1x128xf32> to vector<64x128xf32>
    %41 = arith.addf %38, %40 : vector<64x128xf32>
    %cst_20 = arith.constant 5.000000e-01 : f32
    %42 = vector.broadcast %cst_20 : f32 to vector<64x128xf32>
    %43 = arith.mulf %42, %41 : vector<64x128xf32>
    %44 = arith.addf %43, %1 : vector<64x128xf32>
    %45 = arith.truncf %44 : vector<64x128xf32> to vector<64x128xbf16>
    %c0_21 = arith.constant 0 : index
    %c0_22 = arith.constant 0 : index
    %46 = vector.load %arg8[%c0_21, %c0_22] : memref<64x128xbf16, #tpu.memory_space<vmem>>, vector<64x128xbf16>
    tpu.vector_store %arg8[%c0_21, %c0_22], %45 {strides = array<i32>} : memref<64x128xbf16, #tpu.memory_space<vmem>>, vector<64x128xbf16>,
    return
  }
  func.func @transform_0(%arg0: i32) -> (i32, i32) {
    %c0_i32 = arith.constant 0 : i32
    %c0_i32_0 = arith.constant 0 : i32
    return %arg0, %c0_i32 : i32, i32
  }
  func.func @transform_1(%arg0: i32) -> (i32, i32) {
    %c0_i32 = arith.constant 0 : i32
    %c0_i32_0 = arith.constant 0 : i32
    %c0_i32_1 = arith.constant 0 : i32
    return %c0_i32, %c0_i32_0 : i32, i32
  }
  func.func @transform_2(%arg0: i32) -> (i32, i32) {
    %c0_i32 = arith.constant 0 : i32
    %c0_i32_0 = arith.constant 0 : i32
    %c0_i32_1 = arith.constant 0 : i32
    return %c0_i32, %c0_i32_0 : i32, i32
  }
  func.func @transform_3(%arg0: i32) -> (i32, i32) {
    %c0_i32 = arith.constant 0 : i32
    %c0_i32_0 = arith.constant 0 : i32
    %c0_i32_1 = arith.constant 0 : i32
    return %c0_i32, %c0_i32_0 : i32, i32
  }
  func.func @transform_4(%arg0: i32) -> (i32, i32) {
    %c0_i32 = arith.constant 0 : i32
    %c0_i32_0 = arith.constant 0 : i32
    %c0_i32_1 = arith.constant 0 : i32
    return %c0_i32, %c0_i32_0 : i32, i32
  }
  func.func @transform_5(%arg0: i32) -> (i32, i32) {
    %c0_i32 = arith.constant 0 : i32
    %c0_i32_0 = arith.constant 0 : i32
    %c0_i32_1 = arith.constant 0 : i32
    return %c0_i32, %c0_i32_0 : i32, i32
  }
  func.func @transform_6(%arg0: i32) -> (i32, i32) {
    %c0_i32 = arith.constant 0 : i32
    %c0_i32_0 = arith.constant 0 : i32
    %c0_i32_1 = arith.constant 0 : i32
    return %c0_i32, %c0_i32_0 : i32, i32
  }
  func.func @transform_7(%arg0: i32) -> (i32, i32) {
    %c0_i32 = arith.constant 0 : i32
    %c0_i32_0 = arith.constant 0 : i32
    return %arg0, %c0_i32 : i32, i32
  }
}

</mosaic_0001>

<bundles_post_ra>
// kernel: conformer_encoder_forward.9
= control target key start
LH: loop header
LB: loop body
LE: loop exit
PB: predicated region body
PF: predicated region fallthrough
CT: control target
= control target key end

     0   :  { %s1522_s17 = smov 0   ;;  %s1919_s0 = inlined_call_operand.vmem [shape: bf16[2,32,128], index: 0, kind: input, shape index: {}]   ;;  %s1920_s1 = inlined_call_operand.vmem [shape: f32[1,128], index: 1, kind: input, shape index: {}]   ;;  %s1921_s2 = inlined_call_operand.vmem [shape: f32[1,128], index: 2, kind: input, shape index: {}]   ;;  %s1922_s3 = inlined_call_operand.vmem [shape: bf16[128,256], index: 3, kind: input, shape index: {}]   ;;  %s1923_s4 = inlined_call_operand.vmem [shape: f32[1,256], index: 4, kind: input, shape index: {}]   ;;  %s1924_s5 = inlined_call_operand.vmem [shape: f32[7,1,128], index: 5, kind: input, shape index: {}]   ;;  %s1925_s6 = inlined_call_operand.vmem [shape: f32[1,128], index: 6, kind: input, shape index: {}]   ;;  %s1926_s7 = inlined_call_operand.vmem [shape: f32[1,128], index: 7, kind: input, shape index: {}]   ;;  %s1927_s8 = inlined_call_operand.vmem [shape: f32[1,128], index: 8, kind: input, shape index: {}]   ;;  %s1928_s9 = inlined_call_operand.vmem [shape: bf16[128,128], index: 9, kind: input, shape index: {}]   ;;  %s1929_s10 = inlined_call_operand.vmem [shape: f32[1,128], index: 10, kind: input, shape index: {}]   ;;  %s1930_s11 = inlined_call_operand.vmem [shape: bf16[2,32,128], index: 11, kind: output, shape index: {}]  }
   0x1 LB: > { %s1250_s18 = sadd.s32 4294967295, %s1459_s17   ;;  %p1254_p0 = scmp.ge.s32.totalorder %s1459_s17, 1  ;;  %s1459_s17 = sphi %s1522_s17, %s21_s17  }
   0x2   : > { %p337_p1 = scmp.lt.s32.totalorder %s1459_s17, 3 }
   0x4   : > { %p338_p2 = pnand %p1254_p0, %p337_p1 }
   0x5   : > { %p377_p3 = scmp.lt.s32.totalorder (!%p338_p2), %s1250_s18, 1 }
   0x6   : > { %341 = sbr.rel (%p338_p2) target bundleno = 841 (0x349), region = 64 }
   0xb   : > { %s1932_s18 = smov (!%p377_p3, %s1250_s18), 1  ;;  %v1381_v6 = vld [vmem:[%s1922_s3 + $0x74] ss:$8 sps:$4 sm:$0xff]   ;;  %v1383_v7 = vld [vmem:[%s1922_s3 + $0x70] ss:$8 sps:$4 sm:$0xff]   ;;  %v1461_v33 = vmov 0  }
   0xc   : > { %s1316_s19 = sshll.u32 %s1932_s18, 4  ;;  %573 = vmatprep.subr.bf16.mxu0 %v1381_v6  ;;  %v1384_v24 = vld [vmem:[%s1922_s3 + $0x64] ss:$8 sps:$4 sm:$0xff]   ;;  %v1386_v25 = vld [vmem:[%s1922_s3 + $0x60] ss:$8 sps:$4 sm:$0xff]   ;;  %605 = vmatprep.mubr.bf16.mxu0 %v1461_v33 }
   0xd   : > { %s381_s22 = scalar_lea.vmem %s1919_s0, %s1316_s19  ;;  %574 = vmatpush1.bf16.msra.mxu0 %v1383_v7  ;;  %v1387_v26 = vld [vmem:[%s1922_s3 + $0x54] ss:$8 sps:$4 sm:$0xff]   ;;  %v1389_v27 = vld [vmem:[%s1922_s3 + $0x50] ss:$8 sps:$4 sm:$0xff]   ;;  %v1390_v28 = vld [vmem:[%s1922_s3 + $0x44] ss:$8 sps:$4 sm:$0xff]   ;;  %s386_s21 = scalar_lea.vmem %s1930_s11, %s1316_s19 }
   0xe   : > { %v1323_v0 = vld [vmem:[%s381_s22] sm:$0xff]   ;;  %v1340_v1 = vld [vmem:[%s381_s22 + $0x8] sm:$0xff]   ;;  %575 = vmatprep.subr.bf16.mxu0 %v1384_v24  ;;  %v1393_v30 = vld [vmem:[%s1922_s3 + $0x34] ss:$8 sps:$4 sm:$0xff]  }
   0xf   : > { %v1538_v2 = vunpack.c.l.bf16 %v1323_v0  ;;  %v1540_v3 = vunpack.c.l.bf16 %v1340_v1  ;;  %v1544_v4 = vunpack.c.h.bf16 %v1323_v0  ;;  %v1546_v5 = vunpack.c.h.bf16 %v1340_v1  ;;  %v1392_v29 = vld [vmem:[%s1922_s3 + $0x40] ss:$8 sps:$4 sm:$0xff]   ;;  %v1395_v31 = vld [vmem:[%s1922_s3 + $0x30] ss:$8 sps:$4 sm:$0xff]   ;;  %v1396_v32 = vld [vmem:[%s1922_s3 + $0x24] ss:$8 sps:$4 sm:$0xff]  }
  0x10   : > { %v1398_v34 = vld [vmem:[%s1922_s3 + $0x20] ss:$8 sps:$4 sm:$0xff]   ;;  %v1399_v35 = vld [vmem:[%s1922_s3 + $0x14] ss:$8 sps:$4 sm:$0xff]   ;;  %v1401_v36 = vld [vmem:[%s1922_s3 + $0x10] ss:$8 sps:$4 sm:$0xff]  }
  0x11   : > { %398 = vadd.xlane.f32.xlu0 %v1538_v2  ;;  %402 = vadd.xlane.f32.xlu1 %v1540_v3  ;;  %v1402_v37 = vld [vmem:[%s1922_s3 + $0x4] ss:$8 sps:$4 sm:$0xff]   ;;  %v1404_v38 = vld [vmem:[%s1922_s3] ss:$8 sps:$4 sm:$0xff]  }
  0x12   : > { %576 = vmatpush1.bf16.msra.mxu0 %v1386_v25  ;;  %v1259_v53 = vld [vmem:[%s1920_s1] ss:$0 sm:$0xff] }
  0x13   : > { %577 = vmatprep.subr.bf16.mxu0 %v1387_v26  ;;  %v1260_v58 = vld [vmem:[%s1921_s2] ss:$0 sm:$0xff] }
  0x15   : > { %400 = vadd.xlane.f32.xlu0 %v1544_v4  ;;  %404 = vadd.xlane.f32.xlu1 %v1546_v5 }
  0x16   : > { %578 = vmatpush1.bf16.msra.mxu0 %v1389_v27 }
  0x17   : > { %579 = vmatprep.subr.bf16.mxu0 %v1390_v28 }
  0x1a   : > { %580 = vmatpush1.bf16.msra.mxu0 %v1392_v29 }
  0x1b   : > { %581 = vmatprep.subr.bf16.mxu0 %v1393_v30 }
  0x1e   : > { %582 = vmatpush1.bf16.msra.mxu0 %v1395_v31 }
  0x1f   : > { %583 = vmatprep.subr.bf16.mxu0 %v1396_v32 }
  0x22   : > { %584 = vmatpush1.bf16.msra.mxu0 %v1398_v34 }
  0x23   : > { %585 = vmatprep.subr.bf16.mxu0 %v1399_v35 }
  0x26   : > { %586 = vmatpush1.bf16.msra.mxu0 %v1401_v36 }
  0x27   : > { %587 = vmatprep.subr.bf16.mxu0 %v1402_v37 }
  0x2a   : > { %588 = vmatpush1.bf16.msra.mxu0 %v1404_v38 }
  0x9a   : > { %v399_v8 = vpop.xlane.xlu0 %398  ;;  %v403_v9 = vpop.xlane.xlu1 %402 }
  0x9b   : > { %v407_v10 = vmul.f32 0.0078125, %v399_v8  ;;  %v409_v11 = vmul.f32 0.0078125, %v403_v9 }
  0x9d   : > { %v1557_v12 = vsub.f32 %v1538_v2, %v407_v10  ;;  %v1560_v13 = vsub.f32 %v1540_v3, %v409_v11  ;;  %v1405_v11 = vld [vmem:[%s1928_s9 + $0x38] sm:$0xff]  }
  0x9e   : > { %v401_v14 = vpop.xlane.xlu0 %400  ;;  %v405_v15 = vpop.xlane.xlu1 %404  ;;  %1352 = vmatprep.subr.bf16.mxu1 %v1405_v11 }
  0x9f   : > { %v408_v16 = vmul.f32 0.0078125, %v401_v14  ;;  %v415_v17 = vmul.f32 %v1557_v12, %v1557_v12  ;;  %v410_v18 = vmul.f32 0.0078125, %v405_v15  ;;  %v417_v21 = vmul.f32 %v1560_v13, %v1560_v13  ;;  %1353 = vmatpush3.bf16.msra.mxu1 %v1405_v11  ;;  %v1408_v14 = vld [vmem:[%s1928_s9 + $0x20] sm:$0xff]   ;;  %v1409_v15 = vld [vmem:[%s1928_s9 + $0x18] sm:$0xff]  }
  0xa1   : > { %v412_v19 = vsub.f32 %v1544_v4, %v408_v16  ;;  %419 = vadd.xlane.f32.xlu0 %v415_v17  ;;  %v1566_v20 = vsub.f32 %v1546_v5, %v410_v18  ;;  %v1410_v16 = vld [vmem:[%s1928_s9 + $0x10] sm:$0xff]   ;;  %v1411_v17 = vld [vmem:[%s1928_s9 + $0x8] sm:$0xff]   ;;  %v1412_v18 = vld [vmem:[%s1928_s9] sm:$0xff]  }
  0xa3   : > { %v416_v22 = vmul.f32 %v412_v19, %v412_v19  ;;  %v418_v23 = vmul.f32 %v1566_v20, %v1566_v20 }
  0xa5   : > { %423 = vadd.xlane.f32.xlu0 %v417_v21  ;;  %421 = vadd.xlane.f32.xlu1 %v416_v22  ;;  %v481_v22 = vld [vmem:[%s1923_s4] sm:$0x3] }
  0xa9   : > { %425 = vadd.xlane.f32.xlu1 %v418_v23 }
 0x12a   : > { %v420_v39 = vpop.xlane.xlu0 %419 }
 0x12b   : > { %v427_v40 = vmul.f32 0.0078125, %v420_v39 }
 0x12d   : > { %v431_v41 = vadd.f32 1e-05, %v427_v40 }
 0x12e   : > { %v422_v42 = vpop.xlane.xlu1 %421  ;;  %v424_v43 = vpop.xlane.xlu0 %423 }
 0x12f   : > { %1413 = vrsqrt.f32 %v431_v41  ;;  %v428_v44 = vmul.f32 0.0078125, %v422_v42  ;;  %v429_v45 = vmul.f32 0.0078125, %v424_v43 }
 0x131   : > { %v432_v46 = vadd.f32 1e-05, %v428_v44  ;;  %v433_v47 = vadd.f32 1e-05, %v429_v45 }
 0x132   : > { %v426_v48 = vpop.xlane.xlu1 %425 }
 0x133   : > { %1415 = vrsqrt.f32 %v432_v46  ;;  %v430_v49 = vmul.f32 0.0078125, %v426_v48 }
 0x134   : > { %1417 = vrsqrt.f32 %v433_v47 }
 0x135   : > { %v434_v50 = vadd.f32 1e-05, %v430_v49 }
 0x137   : > { %1419 = vrsqrt.f32 %v434_v50 }
 0x13c   : > { %v1414_v51 = vpop.eup %1413 }
 0x13d   : > { %v439_v52 = vmul.f32 %v1414_v51, %v1557_v12  ;;  %v1406_v12 = vld [vmem:[%s1928_s9 + $0x30] sm:$0xff]  }
 0x13e   : > { %1354 = vmatprep.subr.bf16.mxu1 %v1406_v12 }
 0x13f   : > { %v449_v56 = vmul.f32 %v1259_v53, %v439_v52  ;;  %1355 = vmatpush3.bf16.msra.mxu1 %v1406_v12 }
 0x140   : > { %v1416_v54 = vpop.eup %1415 }
 0x141   : > { %v440_v55 = vmul.f32 %v1416_v54, %v412_v19  ;;  %v1418_v57 = vpop.eup %1417  ;;  %v459_v61 = vadd.f32 %v1260_v58, %v449_v56  ;;  %v483_v19 = vlaneseq }
 0x142   : > { %v441_v63 = vmul.f32 %v1418_v57, %v1560_v13  ;;  %v1407_v13 = vld [vmem:[%s1928_s9 + $0x28] sm:$0xff]  }
 0x143   : > { %v450_v59 = vmul.f32 %v1259_v53, %v440_v55  ;;  %1356 = vmatprep.subr.bf16.mxu1 %v1407_v13 }
 0x144   : > { %v1420_v60 = vpop.eup %1419  ;;  %v451_v7 = vmul.f32 %v1259_v53, %v441_v63  ;;  %1357 = vmatpush3.bf16.msra.mxu1 %v1407_v13 }
 0x145   : > { %v460_v62 = vadd.f32 %v1260_v58, %v450_v59  ;;  %v442_v0 = vmul.f32 %v1420_v60, %v1566_v20  ;;  %1358 = vmatprep.subr.bf16.mxu1 %v1408_v14  ;;  %v1647_v20 = vshrl.u32 %v483_v19, 7 }
 0x146   : > { %v461_v9 = vadd.f32 %v1260_v58, %v451_v7  ;;  %v1689_v7 = vld [vmem:[%s1924_s5] ss:$0 sm:$0xff] }
 0x147   : > { %v463_v1 = vpack.c.bf16 %v460_v62, %v459_v61  ;;  %v452_v6 = vmul.f32 %v1259_v53, %v442_v0  ;;  %v489_v21 = vsub.s32 1, %v1647_v20  ;;  %v485_v44 = vsub.s32 0, %v1647_v20 }
 0x148   : > { %1359 = vmatpush3.bf16.msra.mxu1 %v1408_v14  ;;  %v658_v52 = vadd.s32 24, %v1647_v20  ;;  %vm670_vm0 = vcmp.lt.s32.totalorder %v1647_v20, 3  ;;  %vm722_vm1 = vcmp.lt.s32.totalorder %v1647_v20, 2  ;;  %vm775_vm2 = vcmp.lt.s32.totalorder %v1647_v20, 1  ;;  %v1705_v14 = vld [vmem:[%s1924_s5 + $0x1] ss:$0 sm:$0xff] }
 0x149   : > { %606 = vmatmul.mubr.bf16.vlgmr.msra.gmra.mxu0 %v463_v1  ;;  %v462_v8 = vadd.f32 %v1260_v58, %v452_v6  ;;  %1360 = vmatprep.subr.bf16.mxu1 %v1409_v15  ;;  %v490_v23 = vrot.slane %v481_v22, %v489_v21  ;;  %v486_v47 = vrot.slane %v481_v22, %v485_v44  ;;  %vm844_vm3 = vcmp.lt.s32.totalorder %v1647_v20, 7  ;;  %v1674_v58 = vld [vmem:[%s1924_s5 + $0x3] ss:$0 sm:$0xff] }
 0x14a   : > { %615 = vmatprep.mubr.bf16.mxu0 %v1461_v33  ;;  %vm897_vm4 = vcmp.lt.s32.totalorder %v1647_v20, 6  ;;  %v1663_v55 = vadd.s32 4294967293, %v1647_v20  ;;  %v1666_v56 = vadd.s32 4294967294, %v1647_v20  ;;  %v1669_v57 = vadd.s32 4294967295, %v1647_v20 }
 0x14b   : > { %v464_v10 = vpack.c.bf16 %v462_v8, %v461_v9  ;;  %vm950_vm5 = vcmp.lt.s32.totalorder %v1647_v20, 5  ;;  %v1677_v60 = vadd.s32 1, %v658_v52  ;;  %v1679_v61 = vadd.s32 2, %v658_v52 }
 0x14c   : > { %1361 = vmatpush3.bf16.msra.mxu1 %v1409_v15  ;;  %v1681_v62 = vadd.s32 3, %v658_v52  ;;  %vm679_vm6 = vcmp.ge.s32.totalorder %v1663_v55, 0  ;;  %vm731_vm7 = vcmp.ge.s32.totalorder %v1666_v56, 0  ;;  %vm784_vm8 = vcmp.ge.s32.totalorder %v1669_v57, 0 }
 0x14d   : > { %1362 = vmatprep.subr.bf16.mxu1 %v1410_v16  ;;  %vm860_vm9 = vcmp.lt.s32.totalorder %v1677_v60, 32  ;;  %vm913_vm10 = vcmp.lt.s32.totalorder %v1679_v61, 32 }
 0x14e   : > { %vm966_vm11 = vcmp.lt.s32.totalorder %v1681_v62, 32 }
 0x150   : > { %1363 = vmatpush3.bf16.msra.mxu1 %v1410_v16 }
 0x151   : > { %616 = vmatmul.mubr.bf16.gmra.mxu0 %v464_v10  ;;  %1364 = vmatprep.subr.bf16.mxu1 %v1411_v17 }
 0x154   : > { %1365 = vmatpush3.bf16.msra.mxu1 %v1411_v17 }
 0x155   : > { %1366 = vmatprep.subr.bf16.mxu1 %v1412_v18 }
 0x158   : > { %1367 = vmatpush3.bf16.msra.mxu1 %v1412_v18  ;;  %v1713_v18 = vld [vmem:[%s1924_s5 + $0x2] ss:$0 sm:$0xff] }
 0x209   : > { %v607_v24 = vpop.f32.mrf.mxu0 }
 0x20a   : > { %v608_v50 = vadd.f32 %v607_v24, %v486_v47 }
 0x20b   : > { %v609_v25 = vpop.f32.mrf.mxu0 }
 0x20c   : > { %v610_v26 = vadd.f32 %v609_v25, %v490_v23  ;;  %v1724_v25 = vld [vmem:[%s1925_s6] ss:$0 sm:$0xff] }
 0x20d   : > { %v611_v27 = vpop.f32.mrf.mxu0 }
 0x20e   : > { %v1277_v28 = vmul.f32 -1.442695, %v610_v26  ;;  %v612_v54 = vadd.f32 %v611_v27, %v486_v47 }
 0x20f   : > { %v613_v29 = vpop.f32.mrf.mxu0 }
 0x210   : > { %1421 = vpow2.f32 %v1277_v28  ;;  %v614_v30 = vadd.f32 %v613_v29, %v490_v23  ;;  %v1741_v29 = vld [vmem:[%s1924_s5 + $0x4] ss:$0 sm:$0xff] }
 0x211   : > { %v617_v31 = vpop.f32.mrf.mxu0 }
 0x212   : > { %v1278_v32 = vmul.f32 -1.442695, %v614_v30  ;;  %v618_v0 = vadd.f32 %v617_v31, %v486_v47 }
 0x213   : > { %v619_v33 = vpop.f32.mrf.mxu0 }
 0x214   : > { %1423 = vpow2.f32 %v1278_v32  ;;  %v620_v34 = vadd.f32 %v619_v33, %v490_v23 }
 0x215   : > { %v621_v35 = vpop.f32.mrf.mxu0 }
 0x216   : > { %v1279_v36 = vmul.f32 -1.442695, %v620_v34  ;;  %v622_v1 = vadd.f32 %v621_v35, %v486_v47  ;;  %v1754_v34 = vld [vmem:[%s1924_s5 + $0x5] ss:$0 sm:$0xff] }
 0x217   : > { %v623_v37 = vpop.f32.mrf.mxu0 }
 0x218   : > { %1425 = vpow2.f32 %v1279_v36  ;;  %v624_v38 = vadd.f32 %v623_v37, %v490_v23 }
 0x21a   : > { %v1280_v39 = vmul.f32 -1.442695, %v624_v38 }
 0x21c   : > { %1427 = vpow2.f32 %v1280_v39  ;;  %v1766_v39 = vld [vmem:[%s1924_s5 + $0x6] ss:$0 sm:$0xff] }
 0x21d   : > { %v1422_v40 = vpop.eup %1421 }
 0x21e   : > { %v638_v41 = vadd.f32 1.0, %v1422_v40 }
 0x220   : > { %1429 = vrcp.f32 %v638_v41 }
 0x221   : > { %v1424_v42 = vpop.eup %1423 }
 0x222   : > { %v639_v43 = vadd.f32 1.0, %v1424_v42 }
 0x224   : > { %1431 = vrcp.f32 %v639_v43 }
 0x225   : > { %v1426_v45 = vpop.eup %1425 }
 0x226   : > { %v640_v46 = vadd.f32 1.0, %v1426_v45 }
 0x228   : > { %1433 = vrcp.f32 %v640_v46 }
 0x229   : > { %v1428_v48 = vpop.eup %1427 }
 0x22a   : > { %v641_v49 = vadd.f32 1.0, %v1428_v48 }
 0x22c   : > { %1435 = vrcp.f32 %v641_v49 }
 0x22d   : > { %v1430_v51 = vpop.eup %1429 }
 0x22e   : > { %v1655_v53 = vmul.f32 %v1430_v51, %v608_v50 }
 0x230   : > { %v666_v6 = vrot.slane %v1655_v53, 5  ;;  %v718_v8 = vrot.slane %v1655_v53, 6  ;;  %v771_v9 = vrot.slane %v1655_v53, 7  ;;  %v1695_v10 = vmul.f32 %v1674_v58, %v1655_v53 }
 0x231   : > { %v1432_v59 = vpop.eup %1431  ;;  %v840_v11 = vrot.slane %v1655_v53, 1  ;;  %v893_v16 = vrot.slane %v1655_v53, 2  ;;  %v946_v22 = vrot.slane %v1655_v53, 3 }
 0x232   : > { %v1683_v63 = vmul.f32 %v1432_v59, %v612_v54 }
 0x234   : > { %v667_v12 = vrot.slane %v1683_v63, 5  ;;  %v719_v13 = vrot.slane %v1683_v63, 6  ;;  %v772_v15 = vrot.slane %v1683_v63, 7  ;;  %v841_v19 = vrot.slane %v1683_v63, 1 }
 0x235   : > { %v1434_v17 = vpop.eup %1433  ;;  %v894_v21 = vrot.slane %v1683_v63, 2  ;;  %v947_v23 = vrot.slane %v1683_v63, 3  ;;  %v833_v32 = vmul.f32 %v1674_v58, %v1683_v63 }
 0x236   : > { %v1719_v24 = vmul.f32 %v1434_v17, %v618_v0  ;;  %v673_v26 = vsel %vm670_vm0, %v666_v6, %v667_v12  ;;  %v725_v27 = vsel %vm722_vm1, %v718_v8, %v719_v13  ;;  %v778_v28 = vsel %vm775_vm2, %v771_v9, %v772_v15 }
 0x237   : > { %v711_v30 = vmul.f32 %v1689_v7, %v673_v26  ;;  %v764_v31 = vmul.f32 %v1705_v14, %v725_v27  ;;  %v847_v33 = vsel %vm844_vm3, %v840_v11, %v841_v19  ;;  %v817_v35 = vmul.f32 %v1713_v18, %v778_v28 }
 0x238   : > { %v842_v36 = vrot.slane %v1719_v24, 1  ;;  %v895_v37 = vrot.slane %v1719_v24, 2  ;;  %v900_v38 = vsel %vm897_vm4, %v893_v16, %v894_v21  ;;  %v1770_v42 = vmul.f32 %v1741_v29, %v847_v33 }
 0x239   : > { %v1436_v40 = vpop.eup %1435  ;;  %v715_v41 = vadd.f32 %v1724_v25, %v711_v30  ;;  %v948_v43 = vrot.slane %v1719_v24, 3  ;;  %v953_v44 = vsel %vm950_vm5, %v946_v22, %v947_v23  ;;  %v1788_v48 = vmul.f32 %v1754_v34, %v900_v38 }
 0x23a   : > { %v1777_v45 = vmul.f32 %v1436_v40, %v622_v1  ;;  %v846_v46 = vsel %vm844_vm3, %v841_v19, %v842_v36  ;;  %v899_v47 = vsel %vm897_vm4, %v894_v21, %v895_v37  ;;  %v1796_v52 = vmul.f32 %v1766_v39, %v953_v44 }
 0x23b   : > { %v768_v49 = vadd.f32 %v764_v31, %v715_v41  ;;  %v886_v50 = vmul.f32 %v1741_v29, %v846_v46  ;;  %v952_v51 = vsel %vm950_vm5, %v947_v23, %v948_v43  ;;  %v939_v1 = vmul.f32 %v1754_v34, %v899_v47 }
 0x23c   : > { %v669_v54 = vrot.slane %v1777_v45, 5  ;;  %v721_v59 = vrot.slane %v1777_v45, 6  ;;  %v774_v0 = vrot.slane %v1777_v45, 7  ;;  %v992_v19 = vmul.f32 %v1766_v39, %v952_v51 }
 0x23d   : > { %v821_v17 = vadd.f32 %v817_v35, %v768_v49  ;;  %v668_v21 = vrot.slane %v1719_v24, 5  ;;  %v720_v26 = vrot.slane %v1719_v24, 6  ;;  %v773_v30 = vrot.slane %v1719_v24, 7 }
 0x23e   : > { %v674_v23 = vsel %vm670_vm0, %v669_v54, %v666_v6  ;;  %v726_v27 = vsel %vm722_vm1, %v721_v59, %v718_v8  ;;  %v779_v28 = vsel %vm775_vm2, %v774_v0, %v771_v9  ;;  %v834_v40 = vmul.f32 %v1674_v58, %v1719_v24 }
 0x23f   : > { %v699_v31 = vsel %vm679_vm6, %v674_v23, 0.0  ;;  %v751_v33 = vsel %vm731_vm7, %v726_v27, 0.0  ;;  %v804_v35 = vsel %vm784_vm8, %v779_v28, 0.0  ;;  %v837_v6 = vadd.f32 %v833_v32, %v821_v17  ;;  %v1296_v27 = vld [vmem:[%s1927_s8] ss:$0 sm:$0xff] }
 0x240   : > { %v710_v38 = vmul.f32 %v1689_v7, %v699_v31  ;;  %v763_v8 = vmul.f32 %v1705_v14, %v751_v33  ;;  %v671_v9 = vsel %vm670_vm0, %v668_v21, %v669_v54  ;;  %v672_v55 = vsel %vm670_vm0, %v667_v12, %v668_v21 }
 0x241   : > { %v890_v41 = vadd.f32 %v886_v50, %v837_v6  ;;  %v713_v56 = vmul.f32 %v1689_v7, %v671_v9  ;;  %v723_v57 = vsel %vm722_vm1, %v720_v26, %v721_v59  ;;  %v816_v44 = vmul.f32 %v1713_v18, %v804_v35 }
 0x242   : > { %v714_v32 = vadd.f32 %v1724_v25, %v710_v38  ;;  %v712_v46 = vmul.f32 %v1689_v7, %v672_v55  ;;  %v724_v47 = vsel %vm722_vm1, %v719_v13, %v720_v26  ;;  %v766_v50 = vmul.f32 %v1705_v14, %v723_v57  ;;  %v1295_v7 = vld [vmem:[%s1926_s7] ss:$0 sm:$0xff] }
 0x243   : > { %v943_v49 = vadd.f32 %v939_v1, %v890_v41  ;;  %v717_v12 = vadd.f32 %v1724_v25, %v713_v56  ;;  %v776_v51 = vsel %vm775_vm2, %v773_v30, %v774_v0  ;;  %v765_v17 = vmul.f32 %v1705_v14, %v724_v47 }
 0x244   : > { %v767_v54 = vadd.f32 %v763_v8, %v714_v32  ;;  %v716_v59 = vadd.f32 %v1724_v25, %v712_v46  ;;  %v777_v13 = vsel %vm775_vm2, %v772_v15, %v773_v30  ;;  %v819_v26 = vmul.f32 %v1713_v18, %v776_v51 }
 0x245   : > { %v996_v1 = vadd.f32 %v992_v19, %v943_v49  ;;  %v770_v21 = vadd.f32 %v766_v50, %v717_v12  ;;  %v818_v0 = vmul.f32 %v1713_v18, %v777_v13  ;;  %v843_v25 = vrot.slane %v1777_v45, 1 }
 0x246   : > { %v820_v23 = vadd.f32 %v816_v44, %v767_v54  ;;  %v769_v28 = vadd.f32 %v765_v17, %v716_v59  ;;  %v896_v14 = vrot.slane %v1777_v45, 2  ;;  %v835_v15 = vmul.f32 %v1674_v58, %v1777_v45 }
 0x247   : > { %v1007_v63 = vmul.f32 %v1295_v7, %v996_v1  ;;  %v823_v31 = vadd.f32 %v819_v26, %v770_v21  ;;  %v949_v19 = vrot.slane %v1777_v45, 3  ;;  %v845_v33 = vsel %vm844_vm3, %v842_v36, %v843_v25 }
 0x248   : > { %v836_v30 = vadd.f32 %v1695_v10, %v820_v23  ;;  %v822_v18 = vadd.f32 %v818_v0, %v769_v28  ;;  %v848_v35 = vsel %vm844_vm3, %v843_v25, %v840_v11  ;;  %v887_v45 = vmul.f32 %v1741_v29, %v845_v33 }
 0x249   : > { %v1018_v6 = vadd.f32 %v1296_v27, %v1007_v63  ;;  %v839_v38 = vadd.f32 %v835_v15, %v823_v31  ;;  %v876_v58 = vsel %vm860_vm9, %v848_v35, 0.0  ;;  %v898_v36 = vsel %vm897_vm4, %v895_v37, %v896_v14  ;;  %v1301_v15 = vld [vmem:[%s1929_s10] ss:$0 sm:$0xff] }
 0x24a   : > { %v889_v10 = vadd.f32 %v1770_v42, %v836_v30  ;;  %v838_v8 = vadd.f32 %v834_v40, %v822_v18  ;;  %v888_v9 = vmul.f32 %v1741_v29, %v876_v58  ;;  %v901_v11 = vsel %vm897_vm4, %v896_v14, %v893_v16 }
 0x24b   : > { %v1298_v41 = vmul.f32 -1.442695, %v1018_v6  ;;  %v940_v60 = vmul.f32 %v1754_v34, %v898_v36  ;;  %v951_v42 = vsel %vm950_vm5, %v948_v43, %v949_v19  ;;  %v929_v37 = vsel %vm913_vm10, %v901_v11, 0.0 }
 0x24c   : > { %v942_v29 = vadd.f32 %v1788_v48, %v889_v10  ;;  %v891_v40 = vadd.f32 %v887_v45, %v838_v8  ;;  %v892_v55 = vadd.f32 %v888_v9, %v839_v38  ;;  %v941_v56 = vmul.f32 %v1754_v34, %v929_v37 }
 0x24d   : > { %v954_v16 = vsel %vm950_vm5, %v949_v19, %v946_v22  ;;  %v993_v48 = vmul.f32 %v1766_v39, %v951_v42  ;;  %1437 = vpow2.f32 %v1298_v41 }
 0x24e   : > { %v995_v57 = vadd.f32 %v1796_v52, %v942_v29  ;;  %v944_v24 = vadd.f32 %v940_v60, %v891_v40  ;;  %v982_v43 = vsel %vm966_vm11, %v954_v16, 0.0  ;;  %v945_v32 = vadd.f32 %v941_v56, %v892_v55 }
 0x24f   : > { %v994_v44 = vmul.f32 %v1766_v39, %v982_v43 }
 0x250   : > { %v1006_v61 = vmul.f32 %v1295_v7, %v995_v57  ;;  %v997_v46 = vadd.f32 %v993_v48, %v944_v24 }
 0x251   : > { %v998_v34 = vadd.f32 %v994_v44, %v945_v32 }
 0x252   : > { %v1017_v47 = vadd.f32 %v1296_v27, %v1006_v61  ;;  %v1008_v53 = vmul.f32 %v1295_v7, %v997_v46 }
 0x253   : > { %v1009_v49 = vmul.f32 %v1295_v7, %v998_v34 }
 0x254   : > { %v1297_v20 = vmul.f32 -1.442695, %v1017_v47  ;;  %v1019_v22 = vadd.f32 %v1296_v27, %v1008_v53 }
 0x255   : > { %v1020_v12 = vadd.f32 %v1296_v27, %v1009_v49 }
 0x256   : > { %1439 = vpow2.f32 %v1297_v20  ;;  %v1299_v52 = vmul.f32 -1.442695, %v1019_v22 }
 0x257   : > { %v1300_v50 = vmul.f32 -1.442695, %v1020_v12 }
 0x258   : > { %1441 = vpow2.f32 %v1299_v52 }
 0x259   : > { %1443 = vpow2.f32 %v1300_v50 }
 0x25a   : > { %v1438_v62 = vpop.eup %1437 }
 0x25b   : > { %v1034_v51 = vadd.f32 1.0, %v1438_v62 }
 0x25d   : > { %1445 = vrcp.f32 %v1034_v51 }
 0x263   : > { %v1440_v54 = vpop.eup %1439 }
 0x264   : > { %v1033_v59 = vadd.f32 1.0, %v1440_v54 }
 0x265   : > { %v1442_v39 = vpop.eup %1441 }
 0x266   : > { %v1444_v17 = vpop.eup %1443  ;;  %1447 = vrcp.f32 %v1033_v59  ;;  %v1035_v13 = vadd.f32 1.0, %v1442_v39 }
 0x267   : > { %v1036_v1 = vadd.f32 1.0, %v1444_v17 }
 0x268   : > { %1449 = vrcp.f32 %v1035_v13 }
 0x269   : > { %1451 = vrcp.f32 %v1036_v1 }
 0x26a   : > { %v1446_v7 = vpop.eup %1445 }
 0x26b   : > { %v1046_v26 = vmul.f32 %v1446_v7, %v1018_v6 }
 0x273   : > { %v1448_v21 = vpop.eup %1447 }
 0x274   : > { %v1045_v0 = vmul.f32 %v1448_v21, %v1017_v47 }
 0x275   : > { %v1450_v23 = vpop.eup %1449 }
 0x276   : > { %v1452_v27 = vpop.eup %1451  ;;  %v1049_v28 = vpack.c.bf16 %v1046_v26, %v1045_v0  ;;  %v1047_v25 = vmul.f32 %v1450_v23, %v1019_v22 }
 0x277   : > { %v1048_v14 = vmul.f32 %v1452_v27, %v1020_v12 }
 0x278   : > { %1368 = vmatprep.mubr.bf16.mxu1 %v1049_v28 }
 0x279   : > { %v1050_v63 = vpack.c.bf16 %v1048_v14, %v1047_v25 }
 0x27b   : > { %1369 = vmatmul.mubr.bf16.vlgmr.msra.gmra.mxu1 %v1050_v63 }
 0x33b   : > { %v1370_v31 = vpop.f32.mrf.mxu1 }
 0x33c   : > { %v1165_v30 = vadd.f32 %v1370_v31, %v1301_v15 }
 0x33d   : > { %v1156_v19 = vpop.f32.mrf.mxu1 }
 0x33e   : > { %v1157_v33 = vadd.f32 %v1301_v15, %v1156_v19  ;;  %v1173_v38 = vadd.f32 %v1540_v3, %v1165_v30 }
 0x33f   : > { %v1371_v18 = vpop.f32.mrf.mxu1 }
 0x340   : > { %v1168_v35 = vadd.f32 %v1371_v18, %v1301_v15  ;;  %v1171_v10 = vadd.f32 %v1538_v2, %v1157_v33 }
 0x341   : > { %v1159_v6 = vpop.f32.mrf.mxu1 }
 0x342   : > { %v1174_v58 = vadd.f32 %v1546_v5, %v1168_v35  ;;  %v1160_v45 = vadd.f32 %v1301_v15, %v1159_v6 }
 0x344   : > { %v1338_v8 = vpack.c.bf16 %v1174_v58, %v1173_v38  ;;  %v1172_v9 = vadd.f32 %v1544_v4, %v1160_v45 }
 0x346   : > { %1341 = vst [vmem:[%s386_s21 + $0x8] sm:$0xff] %v1338_v8   ;;  %v1333_v36 = vpack.c.bf16 %v1172_v9, %v1171_v10 }
 0x348   : > { %1334 = vst [vmem:[%s386_s21] sm:$0xff] %v1333_v36  }
 0x349 PF: > { %s21_s17 = sadd.s32 1, %s1459_s17  }
 0x34a   : > { %p18_p4 = scmp.ge.s32.totalorder %s21_s17, 4  }
 0x34c   :  { %20 = sbr.rel (!%p18_p4) target bundleno = 1 (0x1), region = 100 }

// kernel: conformer_encoder_forward.8
= control target key start
LH: loop header
LB: loop body
LE: loop exit
PB: predicated region body
PF: predicated region fallthrough
CT: control target
= control target key end

     0   :  { %12 = vsyncpa [#allocation3], 0  ;;  %s2116_s0 = inlined_call_operand.vmem [shape: bf16[64,128], index: 0, kind: input, shape index: {}]   ;;  %s2117_s1 = inlined_call_operand.vmem [shape: f32[1,128], index: 1, kind: input, shape index: {}]   ;;  %s2118_s2 = inlined_call_operand.vmem [shape: f32[1,128], index: 2, kind: input, shape index: {}]   ;;  %s2119_s3 = inlined_call_operand.hbm [shape: bf16[128,512], index: 3, kind: input, shape index: {}]   ;;  %s2120_s4 = inlined_call_operand.vmem [shape: f32[1,512], index: 4, kind: input, shape index: {}]   ;;  %s2121_s5 = inlined_call_operand.hbm [shape: bf16[512,128], index: 5, kind: input, shape index: {}]   ;;  %s2122_s6 = inlined_call_operand.vmem [shape: f32[1,128], index: 6, kind: input, shape index: {}]   ;;  %s2123_s7 = inlined_call_operand.vmem [shape: bf16[64,128], index: 7, kind: output, shape index: {}]  }
   0x1   :  { %13 = vsyncpa [#allocation5], 0  ;;  %s1761_s24 = smov [#allocation2]  }
   0x2   :  { %s25_s25 = sshll.u32 %s1761_s24, 4  ;;  %s26_s25 = int_to_ptr.vmem [resolvable:$true] %s25_s25 }
   0x3   :  { %s1725_s26 = scalar_lea.vmem %s26_s25, 4096  ;;  %p1730_p1 = scmp.lt.s32.totalorder %s26_s25, %s26_s25 }
   0x4   :  { %p1726_p0 = scmp.ne.s32.totalorder %s26_s25, %s1725_s26  ;;  %p1731_p2 = scmp.lt.s32.totalorder %s1725_s26, %s1725_s26 }
   0x6   :  { %p1732_p3 = por %p1731_p2, %p1730_p1 }
   0x8   :  { %p1733_p4 = pnand %p1732_p3, %p1726_p0 }
   0xa   :  { %1736 = shalt.err (!%p1733_p4)
}
   0xb   :  { %s1762_s27 = smov 256   ;;  %s1763_s28 = smov 16  }
   0xc   :  { %31 = dma.hbm_to_vmem [thread:$0]  %s2119_s3, 4096, %s26_s25, [#allocation3], %s1762_s27, %s1762_s27, %s1763_s28  }
   0xd   :  { %s1764_s8 = smov [#allocation4]  }
   0xe   :  { %s39_s9 = sshll.u32 %s1764_s8, 4  ;;  %s40_s9 = int_to_ptr.vmem [resolvable:$true] %s39_s9 }
   0xf   :  { %s1745_s10 = scalar_lea.vmem %s40_s9, 4096  ;;  %p1750_p6 = scmp.lt.s32.totalorder %s40_s9, %s40_s9 }
  0x10   :  { %p1746_p5 = scmp.ne.s32.totalorder %s40_s9, %s1745_s10  ;;  %p1751_p7 = scmp.lt.s32.totalorder %s1745_s10, %s1745_s10 }
  0x12   :  { %p1752_p8 = por %p1751_p7, %p1750_p6 }
  0x14   :  { %p1753_p9 = pnand %p1752_p8, %p1746_p5 }
  0x16   :  { %1756 = shalt.err (!%p1753_p9)
}
  0x17   :  { %s1765_s11 = smov 64   ;;  %s1766_s12 = smov 4  }
  0x18   :  { %45 = dma.hbm_to_vmem [thread:$0]  %s2121_s5, 4096, %s40_s9, [#allocation5], %s1765_s11, %s1765_s11, %s1766_s12  }
  0x19   :  { %1757 = dma.done.wait [#allocation3], 4096  }
  0x1a   :  { %1758 = vsyncadd [#allocation3], 4294963200 }
  0x1b   :  { %1759 = dma.done.wait [#allocation5], 4096  }
  0x1c   :  { %1760 = vsyncadd [#allocation5], 4294963200  ;;  %v1365_v0 = vld [vmem:[%s2116_s0] sm:$0xff]   ;;  %v1400_v1 = vld [vmem:[%s2116_s0 + $0x8] sm:$0xff]  }
  0x1d   :  { %v1820_v2 = vunpack.c.l.bf16 %v1365_v0  ;;  %v1822_v3 = vunpack.c.l.bf16 %v1400_v1  ;;  %v1401_v4 = vld [vmem:[%s2116_s0 + $0x10] sm:$0xff]   ;;  %v1829_v5 = vunpack.c.h.bf16 %v1365_v0  ;;  %v1831_v6 = vunpack.c.h.bf16 %v1400_v1  ;;  %v1402_v7 = vld [vmem:[%s2116_s0 + $0x18] sm:$0xff]  }
  0x1e   :  { %v1838_v8 = vunpack.c.l.bf16 %v1401_v4  ;;  %v1840_v9 = vunpack.c.h.bf16 %v1401_v4  ;;  %v1844_v10 = vunpack.c.l.bf16 %v1402_v7  ;;  %v1846_v11 = vunpack.c.h.bf16 %v1402_v7  ;;  %v1493_v12 = vld [vmem:[#allocation2 + $0xe4] ss:$16 sps:$4 sm:$0xff]   ;;  %v1495_v13 = vld [vmem:[#allocation2 + $0xec] ss:$16 sps:$4 sm:$0xff]   ;;  %v1497_v14 = vld [vmem:[#allocation2 + $0xe0] ss:$16 sps:$4 sm:$0xff]  }
  0x1f   :  { %73 = vadd.xlane.f32.xlu0 %v1820_v2  ;;  %77 = vadd.xlane.f32.xlu1 %v1822_v3  ;;  %v1498_v15 = vld [vmem:[#allocation2 + $0xe8] ss:$16 sps:$4 sm:$0xff]   ;;  %v1499_v47 = vld [vmem:[#allocation2 + $0xc4] ss:$16 sps:$4 sm:$0xff]   ;;  %v1501_v48 = vld [vmem:[#allocation2 + $0xcc] ss:$16 sps:$4 sm:$0xff]  }
  0x20   :  { %2127 = vst [vmem:[#allocation8_spill] sm:$0xff] %v1840_v9  ;;  %2128 = vst [vmem:[#allocation9_spill] sm:$0xff] %v1844_v10  ;;  %408 = vmatprep.subr.bf16.mxu0 %v1493_v12  ;;  %481 = vmatprep.subr.bf16.mxu1 %v1495_v13  ;;  %v1503_v49 = vld [vmem:[#allocation2 + $0xc0] ss:$16 sps:$4 sm:$0xff]   ;;  %v1504_v50 = vld [vmem:[#allocation2 + $0xc8] ss:$16 sps:$4 sm:$0xff]  }
  0x21   :  { %2129 = vst [vmem:[#allocation10_spill] sm:$0xff] %v1846_v11  ;;  %409 = vmatpush1.bf16.msra.mxu0 %v1497_v14  ;;  %482 = vmatpush1.bf16.msra.mxu1 %v1498_v15  ;;  %v1505_v52 = vld [vmem:[#allocation2 + $0xa4] ss:$16 sps:$4 sm:$0xff]   ;;  %v1507_v53 = vld [vmem:[#allocation2 + $0xac] ss:$16 sps:$4 sm:$0xff]  }
  0x22   :  { %410 = vmatprep.subr.bf16.mxu0 %v1499_v47  ;;  %483 = vmatprep.subr.bf16.mxu1 %v1501_v48  ;;  %v1509_v54 = vld [vmem:[#allocation2 + $0xa0] ss:$16 sps:$4 sm:$0xff]   ;;  %v1510_v55 = vld [vmem:[#allocation2 + $0xa8] ss:$16 sps:$4 sm:$0xff]   ;;  %v1511_v56 = vld [vmem:[#allocation2 + $0x84] ss:$16 sps:$4 sm:$0xff]  }
  0x23   :  { %75 = vadd.xlane.f32.xlu0 %v1829_v5  ;;  %79 = vadd.xlane.f32.xlu1 %v1831_v6  ;;  %v1513_v57 = vld [vmem:[#allocation2 + $0x8c] ss:$16 sps:$4 sm:$0xff]   ;;  %v1515_v58 = vld [vmem:[#allocation2 + $0x80] ss:$16 sps:$4 sm:$0xff]   ;;  %v1516_v59 = vld [vmem:[#allocation2 + $0x88] ss:$16 sps:$4 sm:$0xff]  }
  0x24   :  { %v1517_v60 = vld [vmem:[#allocation2 + $0x64] ss:$16 sps:$4 sm:$0xff]   ;;  %v1519_v61 = vld [vmem:[#allocation2 + $0x6c] ss:$16 sps:$4 sm:$0xff]   ;;  %v1521_v62 = vld [vmem:[#allocation2 + $0x60] ss:$16 sps:$4 sm:$0xff]  }
  0x25   :  { %411 = vmatpush1.bf16.msra.mxu0 %v1503_v49  ;;  %484 = vmatpush1.bf16.msra.mxu1 %v1504_v50  ;;  %v1522_v63 = vld [vmem:[#allocation2 + $0x68] ss:$16 sps:$4 sm:$0xff]   ;;  %v1523_v0 = vld [vmem:[#allocation2 + $0x44] ss:$16 sps:$4 sm:$0xff]   ;;  %v1525_v1 = vld [vmem:[#allocation2 + $0x4c] ss:$16 sps:$4 sm:$0xff]  }
  0x26   :  { %412 = vmatprep.subr.bf16.mxu0 %v1505_v52  ;;  %485 = vmatprep.subr.bf16.mxu1 %v1507_v53  ;;  %v1527_v4 = vld [vmem:[#allocation2 + $0x40] ss:$16 sps:$4 sm:$0xff]   ;;  %v1528_v7 = vld [vmem:[#allocation2 + $0x48] ss:$16 sps:$4 sm:$0xff]   ;;  %v1529_v12 = vld [vmem:[#allocation2 + $0x24] ss:$16 sps:$4 sm:$0xff]  }
  0x27   :  { %81 = vadd.xlane.f32.xlu0 %v1838_v8  ;;  %83 = vadd.xlane.f32.xlu1 %v1840_v9  ;;  %v1531_v13 = vld [vmem:[#allocation2 + $0x2c] ss:$16 sps:$4 sm:$0xff]   ;;  %v1533_v14 = vld [vmem:[#allocation2 + $0x20] ss:$16 sps:$4 sm:$0xff]   ;;  %v1534_v15 = vld [vmem:[#allocation2 + $0x28] ss:$16 sps:$4 sm:$0xff]  }
  0x28   :  { %v1249_v53 = vld [vmem:[%s2117_s1] ss:$0 sm:$0xff] }
  0x29   :  { %413 = vmatpush1.bf16.msra.mxu0 %v1509_v54  ;;  %486 = vmatpush1.bf16.msra.mxu1 %v1510_v55 }
  0x2a   :  { %414 = vmatprep.subr.bf16.mxu0 %v1511_v56  ;;  %487 = vmatprep.subr.bf16.mxu1 %v1513_v57 }
  0x2b   :  { %85 = vadd.xlane.f32.xlu0 %v1844_v10  ;;  %87 = vadd.xlane.f32.xlu1 %v1846_v11 }
  0x2d   :  { %415 = vmatpush1.bf16.msra.mxu0 %v1515_v58  ;;  %488 = vmatpush1.bf16.msra.mxu1 %v1516_v59 }
  0x2e   :  { %416 = vmatprep.subr.bf16.mxu0 %v1517_v60  ;;  %489 = vmatprep.subr.bf16.mxu1 %v1519_v61  ;;  %v1250_v60 = vld [vmem:[%s2118_s2] ss:$0 sm:$0xff] }
  0x31   :  { %417 = vmatpush1.bf16.msra.mxu0 %v1521_v62  ;;  %490 = vmatpush1.bf16.msra.mxu1 %v1522_v63 }
  0x32   :  { %418 = vmatprep.subr.bf16.mxu0 %v1523_v0  ;;  %491 = vmatprep.subr.bf16.mxu1 %v1525_v1 }
  0x35   :  { %419 = vmatpush1.bf16.msra.mxu0 %v1527_v4  ;;  %492 = vmatpush1.bf16.msra.mxu1 %v1528_v7 }
  0x36   :  { %420 = vmatprep.subr.bf16.mxu0 %v1529_v12  ;;  %493 = vmatprep.subr.bf16.mxu1 %v1531_v13 }
  0x39   :  { %421 = vmatpush1.bf16.msra.mxu0 %v1533_v14  ;;  %494 = vmatpush1.bf16.msra.mxu1 %v1534_v15 }
  0xa8   :  { %v74_v16 = vpop.xlane.xlu0 %73  ;;  %v78_v17 = vpop.xlane.xlu1 %77 }
  0xa9   :  { %v90_v18 = vmul.f32 0.0078125, %v74_v16  ;;  %v92_v19 = vmul.f32 0.0078125, %v78_v17  ;;  %v1535_v16 = vld [vmem:[#allocation2 + $0x4] ss:$16 sps:$4 sm:$0xff]   ;;  %v1537_v17 = vld [vmem:[#allocation2 + $0xc] ss:$16 sps:$4 sm:$0xff]  }
  0xaa   :  { %422 = vmatprep.subr.bf16.mxu0 %v1535_v16  ;;  %495 = vmatprep.subr.bf16.mxu1 %v1537_v17 }
  0xab   :  { %v1851_v20 = vsub.f32 %v1820_v2, %v90_v18  ;;  %v1854_v21 = vsub.f32 %v1822_v3, %v92_v19  ;;  %v1767_v18 = vmov 0   ;;  %v1539_v19 = vld [vmem:[#allocation2] ss:$16 sps:$4 sm:$0xff]  }
  0xac   :  { %v76_v22 = vpop.xlane.xlu0 %75  ;;  %v80_v23 = vpop.xlane.xlu1 %79  ;;  %440 = vmatprep.mubr.bf16.mxu0 %v1767_v18  ;;  %513 = vmatprep.mubr.bf16.mxu1 %v1767_v18 }
  0xad   :  { %v91_v24 = vmul.f32 0.0078125, %v76_v22  ;;  %v106_v25 = vmul.f32 %v1851_v20, %v1851_v20  ;;  %v93_v26 = vmul.f32 0.0078125, %v80_v23  ;;  %v108_v29 = vmul.f32 %v1854_v21, %v1854_v21  ;;  %v1540_v22 = vld [vmem:[#allocation2 + $0x8] ss:$16 sps:$4 sm:$0xff]   ;;  %423 = vmatpush1.bf16.msra.mxu0 %v1539_v19 }
  0xae   :  { %496 = vmatpush1.bf16.msra.mxu1 %v1540_v22 }
  0xaf   :  { %v1859_v27 = vsub.f32 %v1829_v5, %v91_v24  ;;  %114 = vadd.xlane.f32.xlu0 %v106_v25  ;;  %v1862_v28 = vsub.f32 %v1831_v6, %v93_v26 }
  0xb0   :  { %v82_v30 = vpop.xlane.xlu0 %81  ;;  %v84_v31 = vpop.xlane.xlu1 %83 }
  0xb1   :  { %v94_v32 = vmul.f32 0.0078125, %v82_v30  ;;  %v107_v33 = vmul.f32 %v1859_v27, %v1859_v27  ;;  %v95_v34 = vmul.f32 0.0078125, %v84_v31  ;;  %v109_v37 = vmul.f32 %v1862_v28, %v1862_v28 }
  0xb3   :  { %v1869_v35 = vsub.f32 %v1838_v8, %v94_v32  ;;  %118 = vadd.xlane.f32.xlu0 %v108_v29  ;;  %116 = vadd.xlane.f32.xlu1 %v107_v33  ;;  %v1872_v36 = vsub.f32 %v1840_v9, %v95_v34 }
  0xb4   :  { %v86_v38 = vpop.xlane.xlu0 %85  ;;  %v88_v39 = vpop.xlane.xlu1 %87 }
  0xb5   :  { %v96_v40 = vmul.f32 0.0078125, %v86_v38  ;;  %v110_v41 = vmul.f32 %v1869_v35, %v1869_v35  ;;  %v97_v42 = vmul.f32 0.0078125, %v88_v39  ;;  %v111_v45 = vmul.f32 %v1872_v36, %v1872_v36 }
  0xb7   :  { %v1879_v43 = vsub.f32 %v1844_v10, %v96_v40  ;;  %120 = vadd.xlane.f32.xlu1 %v109_v37  ;;  %122 = vadd.xlane.f32.xlu0 %v110_v41  ;;  %v1882_v44 = vsub.f32 %v1846_v11, %v97_v42 }
  0xb9   :  { %v112_v46 = vmul.f32 %v1879_v43, %v1879_v43  ;;  %v113_v51 = vmul.f32 %v1882_v44, %v1882_v44 }
  0xbb   :  { %124 = vadd.xlane.f32.xlu1 %v111_v45  ;;  %126 = vadd.xlane.f32.xlu0 %v112_v46 }
  0xbf   :  { %128 = vadd.xlane.f32.xlu1 %v113_v51 }
 0x138   :  { %v115_v23 = vpop.xlane.xlu0 %114 }
 0x139   :  { %v130_v24 = vmul.f32 0.0078125, %v115_v23 }
 0x13b   :  { %v138_v25 = vadd.f32 1e-05, %v130_v24 }
 0x13c   :  { %v117_v26 = vpop.xlane.xlu1 %116  ;;  %v119_v29 = vpop.xlane.xlu0 %118 }
 0x13d   :  { %1573 = vrsqrt.f32 %v138_v25  ;;  %v131_v30 = vmul.f32 0.0078125, %v117_v26  ;;  %v132_v31 = vmul.f32 0.0078125, %v119_v29 }
 0x13f   :  { %v139_v32 = vadd.f32 1e-05, %v131_v30  ;;  %v140_v33 = vadd.f32 1e-05, %v132_v31 }
 0x140   :  { %v121_v34 = vpop.xlane.xlu1 %120  ;;  %v123_v37 = vpop.xlane.xlu0 %122 }
 0x141   :  { %1575 = vrsqrt.f32 %v139_v32  ;;  %v133_v38 = vmul.f32 0.0078125, %v121_v34  ;;  %v134_v40 = vmul.f32 0.0078125, %v123_v37  ;;  %v1541_v34 = vld [vmem:[#allocation4 + $0x78] sm:$0xff]  }
 0x142   :  { %1577 = vrsqrt.f32 %v140_v33  ;;  %v1543_v37 = vld [vmem:[#allocation4 + $0xf8] sm:$0xff]   ;;  %1406 = vmatprep.subr.bf16.mxu0 %v1541_v34 }
 0x143   :  { %v141_v39 = vadd.f32 1e-05, %v133_v38  ;;  %v142_v45 = vadd.f32 1e-05, %v134_v40  ;;  %v1544_v38 = vld [vmem:[#allocation4 + $0xb8] sm:$0xff]   ;;  %1446 = vmatprep.subr.bf16.mxu1 %v1543_v37  ;;  %v1546_v40 = vld [vmem:[#allocation4 + $0x30] sm:$0xff]  }
 0x144   :  { %v125_v41 = vpop.xlane.xlu1 %124  ;;  %v127_v47 = vpop.xlane.xlu0 %126 }
 0x145   :  { %1579 = vrsqrt.f32 %v141_v39  ;;  %v135_v42 = vmul.f32 0.0078125, %v125_v41  ;;  %v136_v51 = vmul.f32 0.0078125, %v127_v47  ;;  %v1547_v39 = vld [vmem:[#allocation4 + $0xf0] sm:$0xff]   ;;  %v1553_v47 = vld [vmem:[#allocation4 + $0x60] sm:$0xff]  }
 0x146   :  { %v1548_v41 = vld [vmem:[#allocation4 + $0xb0] sm:$0xff]  }
 0x147   :  { %v143_v46 = vadd.f32 1e-05, %v135_v42  ;;  %v144_v56 = vadd.f32 1e-05, %v136_v51  ;;  %v1551_v42 = vld [vmem:[#allocation4 + $0xe8] sm:$0xff]   ;;  %v1557_v51 = vld [vmem:[#allocation4 + $0x58] sm:$0xff]  }
 0x148   :  { %v129_v48 = vpop.xlane.xlu1 %128 }
 0x149   :  { %1581 = vrsqrt.f32 %v143_v46  ;;  %v137_v49 = vmul.f32 0.0078125, %v129_v48  ;;  %v1552_v46 = vld [vmem:[#allocation4 + $0xa8] sm:$0xff]   ;;  %v1555_v48 = vld [vmem:[#allocation4 + $0xe0] sm:$0xff]  }
 0x14a   :  { %v1574_v50 = vpop.eup %1573  ;;  %1583 = vrsqrt.f32 %v142_v45  ;;  %v1550_v45 = vld [vmem:[#allocation4 + $0x28] sm:$0xff]  }
 0x14b   :  { %v154_v52 = vmul.f32 %v1574_v50, %v1851_v20  ;;  %v145_v54 = vadd.f32 1e-05, %v137_v49  ;;  %v1554_v49 = vld [vmem:[#allocation4 + $0x20] sm:$0xff]  }
 0x14c   :  { %v1556_v50 = vld [vmem:[#allocation4 + $0xa0] sm:$0xff]  }
 0x14d   :  { %v168_v58 = vmul.f32 %v1249_v53, %v154_v52  ;;  %1585 = vrsqrt.f32 %v145_v54  ;;  %v1559_v52 = vld [vmem:[#allocation4 + $0xd8] sm:$0xff]  }
 0x14e   :  { %v1576_v55 = vpop.eup %1575  ;;  %1587 = vrsqrt.f32 %v144_v56  ;;  %v1560_v54 = vld [vmem:[#allocation4 + $0x98] sm:$0xff]   ;;  %v1563_v56 = vld [vmem:[#allocation4 + $0xd0] sm:$0xff]  }
 0x14f   :  { %v155_v57 = vmul.f32 %v1576_v55, %v1859_v27  ;;  %v1578_v59 = vpop.eup %1577  ;;  %v182_v20 = vadd.f32 %v1250_v60, %v168_v58  ;;  %v1561_v55 = vld [vmem:[#allocation4 + $0x50] sm:$0xff]  }
 0x150   :  { %v156_v0 = vmul.f32 %v1578_v59, %v1854_v21  ;;  %v1564_v58 = vld [vmem:[#allocation4 + $0x90] sm:$0xff]   ;;  %v1565_v59 = vld [vmem:[#allocation4 + $0x48] sm:$0xff]  }
 0x151   :  { %v169_v61 = vmul.f32 %v1249_v53, %v155_v57  ;;  %v1562_v57 = vld [vmem:[#allocation4 + $0x10] sm:$0xff]  }
 0x152   :  { %v1580_v62 = vpop.eup %1579  ;;  %v170_v27 = vmul.f32 %v1249_v53, %v156_v0  ;;  %v1570_v0 = vld [vmem:[#allocation4] sm:$0xff]  }
 0x153   :  { %v183_v63 = vadd.f32 %v1250_v60, %v169_v61  ;;  %v157_v1 = vmul.f32 %v1580_v62, %v1862_v28  ;;  %v1566_v61 = vld [vmem:[#allocation4 + $0x8] sm:$0xff]  }
 0x154   :  { %v184_v16 = vadd.f32 %v1250_v60, %v170_v27  ;;  %v1568_v62 = vld [vmem:[#allocation4 + $0x88] sm:$0xff]  }
 0x155   :  { %v190_v4 = vpack.c.bf16 %v183_v63, %v182_v20  ;;  %v171_v7 = vmul.f32 %v1249_v53, %v157_v1  ;;  %v1569_v20 = vld [vmem:[#allocation4 + $0x40] sm:$0xff]  }
 0x156   :  { %v1582_v12 = vpop.eup %1581  ;;  %v1571_v63 = vld [vmem:[#allocation4 + $0xc0] sm:$0xff]  }
 0x157   :  { %441 = vmatmul.mubr.bf16.vlgmr.msra.gmra.mxu0 %v190_v4  ;;  %514 = vmatmul.mubr.bf16.vlgmr.msra.gmra.mxu1 %v190_v4  ;;  %v1584_v13 = vpop.eup %1583  ;;  %v185_v14 = vadd.f32 %v1250_v60, %v171_v7  ;;  %v159_v15 = vmul.f32 %v1582_v12, %v1872_v36  ;;  %v1572_v1 = vld [vmem:[#allocation4 + $0x80] sm:$0xff]   ;;  %v228_v4 = vlaneseq }
 0x158   :  { %450 = vmatprep.mubr.bf16.mxu0 %v1767_v18  ;;  %523 = vmatprep.mubr.bf16.mxu1 %v1767_v18  ;;  %v158_v17 = vmul.f32 %v1584_v13, %v1869_v35  ;;  %v226_v13 = vld [vmem:[%s2120_s4] sm:$0xf] }
 0x159   :  { %v191_v21 = vpack.c.bf16 %v185_v14, %v184_v16  ;;  %v173_v19 = vmul.f32 %v1249_v53, %v159_v15  ;;  %1447 = vmatpush3.bf16.msra.mxu1 %v1544_v38  ;;  %v229_v7 = vshrl.u32 %v228_v4, 7 }
 0x15a   :  { %v1586_v28 = vpop.eup %1585  ;;  %v172_v23 = vmul.f32 %v1249_v53, %v158_v17  ;;  %1448 = vmatprep.subr.bf16.mxu1 %v1547_v39 }
 0x15b   :  { %v1588_v22 = vpop.eup %1587  ;;  %v187_v24 = vadd.f32 %v1250_v60, %v173_v19  ;;  %v161_v25 = vmul.f32 %v1586_v28, %v1882_v44  ;;  %v1542_v44 = vld [vmem:[#allocation4 + $0x38] sm:$0xff]   ;;  %v230_v12 = vsub.s32 0, %v229_v7  ;;  %v238_v27 = vsub.s32 2, %v229_v7 }
 0x15c   :  { %v186_v26 = vadd.f32 %v1250_v60, %v172_v23  ;;  %v160_v36 = vmul.f32 %v1588_v22, %v1879_v43  ;;  %1407 = vmatpush3.bf16.msra.mxu0 %v1542_v44  ;;  %v1545_v43 = vld [vmem:[#allocation4 + $0x70] sm:$0xff]   ;;  %v234_v14 = vsub.s32 1, %v229_v7  ;;  %v242_v15 = vsub.s32 3, %v229_v7 }
 0x15d   :  { %v175_v30 = vmul.f32 %v1249_v53, %v161_v25  ;;  %1408 = vmatprep.subr.bf16.mxu0 %v1545_v43  ;;  %1449 = vmatpush3.bf16.msra.mxu1 %v1548_v41  ;;  %v1915_v16 = vrot.slane %v226_v13, %v230_v12  ;;  %v1917_v17 = vrot.slane %v226_v13, %v238_v27 }
 0x15e   :  { %v192_v29 = vpack.c.bf16 %v187_v24, %v186_v26  ;;  %v174_v35 = vmul.f32 %v1249_v53, %v160_v36  ;;  %1450 = vmatprep.subr.bf16.mxu1 %v1551_v42  ;;  %v1558_v53 = vld [vmem:[#allocation4 + $0x18] sm:$0xff]   ;;  %v1921_v19 = vrot.slane %v226_v13, %v242_v15 }
 0x15f   :  { %451 = vmatmul.mubr.bf16.gmra.mxu0 %v191_v21  ;;  %524 = vmatmul.mubr.bf16.gmra.mxu1 %v191_v21  ;;  %v189_v31 = vadd.f32 %v1250_v60, %v175_v30  ;;  %v1919_v21 = vrot.slane %v226_v13, %v234_v14 }
 0x160   :  { %460 = vmatprep.mubr.bf16.mxu0 %v1767_v18  ;;  %533 = vmatprep.mubr.bf16.mxu1 %v1767_v18  ;;  %v188_v32 = vadd.f32 %v1250_v60, %v174_v35  ;;  %v1567_v60 = vld [vmem:[#allocation4 + $0xc8] sm:$0xff]  }
 0x161   :  { %1409 = vmatpush3.bf16.msra.mxu0 %v1546_v40  ;;  %1451 = vmatpush3.bf16.msra.mxu1 %v1552_v46 }
 0x162   :  { %v193_v33 = vpack.c.bf16 %v189_v31, %v188_v32  ;;  %1452 = vmatprep.subr.bf16.mxu1 %v1555_v48 }
 0x165   :  { %1453 = vmatpush3.bf16.msra.mxu1 %v1556_v50 }
 0x166   :  { %1454 = vmatprep.subr.bf16.mxu1 %v1559_v52 }
 0x167   :  { %461 = vmatmul.mubr.bf16.gmra.mxu0 %v192_v29  ;;  %534 = vmatmul.mubr.bf16.gmra.mxu1 %v192_v29 }
 0x168   :  { %470 = vmatprep.mubr.bf16.mxu0 %v1767_v18  ;;  %543 = vmatprep.mubr.bf16.mxu1 %v1767_v18  ;;  %v1549_v18 = vld [vmem:[#allocation4 + $0x68] sm:$0xff]  }
 0x169   :  { %1410 = vmatprep.subr.bf16.mxu0 %v1549_v18  ;;  %1455 = vmatpush3.bf16.msra.mxu1 %v1560_v54 }
 0x16a   :  { %1411 = vmatpush3.bf16.msra.mxu0 %v1550_v45  ;;  %1456 = vmatprep.subr.bf16.mxu1 %v1563_v56 }
 0x16b   :  { %1412 = vmatprep.subr.bf16.mxu0 %v1553_v47 }
 0x16d   :  { %1457 = vmatpush3.bf16.msra.mxu1 %v1564_v58 }
 0x16e   :  { %1413 = vmatpush3.bf16.msra.mxu0 %v1554_v49  ;;  %1458 = vmatprep.subr.bf16.mxu1 %v1567_v60 }
 0x16f   :  { %471 = vmatmul.mubr.bf16.gmra.mxu0 %v193_v33  ;;  %544 = vmatmul.mubr.bf16.gmra.mxu1 %v193_v33 }
 0x170   :  { %1414 = vmatprep.subr.bf16.mxu0 %v1557_v51 }
 0x171   :  { %1459 = vmatpush3.bf16.msra.mxu1 %v1568_v62 }
 0x172   :  { %1415 = vmatpush3.bf16.msra.mxu0 %v1558_v53  ;;  %1460 = vmatprep.subr.bf16.mxu1 %v1571_v63 }
 0x173   :  { %1416 = vmatprep.subr.bf16.mxu0 %v1561_v55 }
 0x175   :  { %1461 = vmatpush3.bf16.msra.mxu1 %v1572_v1 }
 0x176   :  { %1417 = vmatpush3.bf16.msra.mxu0 %v1562_v57 }
 0x177   :  { %1418 = vmatprep.subr.bf16.mxu0 %v1565_v59 }
 0x17a   :  { %1419 = vmatpush3.bf16.msra.mxu0 %v1566_v61 }
 0x17b   :  { %1420 = vmatprep.subr.bf16.mxu0 %v1569_v20 }
 0x17e   :  { %1421 = vmatpush3.bf16.msra.mxu0 %v1570_v0 }
 0x217   :  { %v442_v28 = vpop.f32.mrf.mxu0  ;;  %v515_v22 = vpop.f32.mrf.mxu1 }
 0x218   :  { %v1924_v23 = vadd.f32 %v442_v28, %v1915_v16  ;;  %v1927_v24 = vadd.f32 %v515_v22, %v1917_v17 }
 0x219   :  { %v444_v25 = vpop.f32.mrf.mxu0  ;;  %v517_v26 = vpop.f32.mrf.mxu1 }
 0x21a   :  { %v1283_v36 = vmul.f32 -1.442695, %v1924_v23  ;;  %v1285_v29 = vmul.f32 -1.442695, %v1927_v24  ;;  %v1932_v30 = vadd.f32 %v444_v25, %v1919_v21  ;;  %v1935_v35 = vadd.f32 %v517_v26, %v1921_v19 }
 0x21b   :  { %v446_v31 = vpop.f32.mrf.mxu0  ;;  %v519_v32 = vpop.f32.mrf.mxu1 }
 0x21c   :  { %1589 = vpow2.f32 %v1283_v36  ;;  %v1284_v33 = vmul.f32 -1.442695, %v1932_v30  ;;  %v1286_v34 = vmul.f32 -1.442695, %v1935_v35  ;;  %v1940_v37 = vadd.f32 %v446_v31, %v1915_v16 }
 0x21d   :  { %1591 = vpow2.f32 %v1285_v29  ;;  %v1943_v44 = vadd.f32 %v519_v32, %v1917_v17  ;;  %v448_v38 = vpop.f32.mrf.mxu0  ;;  %v521_v43 = vpop.f32.mrf.mxu1 }
 0x21e   :  { %1593 = vpow2.f32 %v1284_v33  ;;  %v1287_v39 = vmul.f32 -1.442695, %v1940_v37  ;;  %v1947_v40 = vadd.f32 %v448_v38, %v1919_v21  ;;  %v1950_v41 = vadd.f32 %v521_v43, %v1921_v19 }
 0x21f   :  { %1595 = vpow2.f32 %v1286_v34  ;;  %v1289_v18 = vmul.f32 -1.442695, %v1943_v44  ;;  %v452_v42 = vpop.f32.mrf.mxu0  ;;  %v525_v45 = vpop.f32.mrf.mxu1 }
 0x220   :  { %1597 = vpow2.f32 %v1287_v39  ;;  %v1288_v46 = vmul.f32 -1.442695, %v1947_v40  ;;  %v1290_v47 = vmul.f32 -1.442695, %v1950_v41  ;;  %v1956_v48 = vadd.f32 %v452_v42, %v1915_v16 }
 0x221   :  { %1599 = vpow2.f32 %v1289_v18  ;;  %v1959_v49 = vadd.f32 %v525_v45, %v1917_v17  ;;  %v454_v50 = vpop.f32.mrf.mxu0  ;;  %v527_v51 = vpop.f32.mrf.mxu1 }
 0x222   :  { %1601 = vpow2.f32 %v1288_v46  ;;  %v1291_v52 = vmul.f32 -1.442695, %v1956_v48  ;;  %v1963_v53 = vadd.f32 %v454_v50, %v1919_v21  ;;  %v1966_v54 = vadd.f32 %v527_v51, %v1921_v19 }
 0x223   :  { %1603 = vpow2.f32 %v1290_v47  ;;  %v1293_v55 = vmul.f32 -1.442695, %v1959_v49  ;;  %v456_v56 = vpop.f32.mrf.mxu0  ;;  %v529_v57 = vpop.f32.mrf.mxu1 }
 0x224   :  { %1605 = vpow2.f32 %v1291_v52  ;;  %v1292_v58 = vmul.f32 -1.442695, %v1963_v53  ;;  %v1294_v59 = vmul.f32 -1.442695, %v1966_v54  ;;  %v1972_v60 = vadd.f32 %v456_v56, %v1915_v16 }
 0x225   :  { %1607 = vpow2.f32 %v1293_v55  ;;  %v1975_v61 = vadd.f32 %v529_v57, %v1917_v17  ;;  %v458_v62 = vpop.f32.mrf.mxu0  ;;  %v531_v20 = vpop.f32.mrf.mxu1 }
 0x226   :  { %1609 = vpow2.f32 %v1292_v58  ;;  %v1295_v63 = vmul.f32 -1.442695, %v1972_v60  ;;  %v1979_v0 = vadd.f32 %v458_v62, %v1919_v21  ;;  %v1982_v1 = vadd.f32 %v531_v20, %v1921_v19 }
 0x227   :  { %1611 = vpow2.f32 %v1294_v59  ;;  %v1297_v4 = vmul.f32 -1.442695, %v1975_v61  ;;  %v462_v7 = vpop.f32.mrf.mxu0  ;;  %v535_v12 = vpop.f32.mrf.mxu1 }
 0x228   :  { %1613 = vpow2.f32 %v1295_v63  ;;  %v1296_v27 = vmul.f32 -1.442695, %v1979_v0  ;;  %v1298_v13 = vmul.f32 -1.442695, %v1982_v1  ;;  %v1988_v55 = vadd.f32 %v462_v7, %v1915_v16 }
 0x229   :  { %v1590_v14 = vpop.eup %1589  ;;  %1615 = vpow2.f32 %v1297_v4  ;;  %v464_v15 = vpop.f32.mrf.mxu0  ;;  %v1991_v58 = vadd.f32 %v535_v12, %v1917_v17 }
 0x22a   :  { %v537_v28 = vpop.f32.mrf.mxu1  ;;  %v1592_v22 = vpop.eup %1591  ;;  %v650_v25 = vadd.f32 1.0, %v1590_v14  ;;  %1617 = vpow2.f32 %v1296_v27  ;;  %v1299_v7 = vmul.f32 -1.442695, %v1988_v55  ;;  %v1996_v12 = vadd.f32 %v464_v15, %v1919_v21 }
 0x22b   :  { %v1594_v26 = vpop.eup %1593  ;;  %v652_v36 = vadd.f32 1.0, %v1592_v22  ;;  %1619 = vpow2.f32 %v1298_v13  ;;  %v466_v29 = vpop.f32.mrf.mxu0 }
 0x22c   :  { %v1596_v31 = vpop.eup %1595  ;;  %1621 = vrcp.f32 %v650_v25  ;;  %v651_v32 = vadd.f32 1.0, %v1594_v26  ;;  %v539_v33 = vpop.f32.mrf.mxu1  ;;  %v1301_v26 = vmul.f32 -1.442695, %v1991_v58 }
 0x22d   :  { %v1598_v34 = vpop.eup %1597  ;;  %1623 = vrcp.f32 %v652_v36  ;;  %v653_v38 = vadd.f32 1.0, %v1596_v31  ;;  %v468_v45 = vpop.f32.mrf.mxu0 }
 0x22e   :  { %v1600_v43 = vpop.eup %1599  ;;  %1625 = vrcp.f32 %v651_v32  ;;  %v654_v39 = vadd.f32 1.0, %v1598_v34  ;;  %v541_v50 = vpop.f32.mrf.mxu1  ;;  %v1999_v32 = vadd.f32 %v537_v28, %v1921_v19  ;;  %v2002_v34 = vadd.f32 %v466_v29, %v1915_v16 }
 0x22f   :  { %v1602_v18 = vpop.eup %1601  ;;  %1627 = vrcp.f32 %v653_v38  ;;  %v656_v42 = vadd.f32 1.0, %v1600_v43  ;;  %v472_v20 = vpop.f32.mrf.mxu0  ;;  %v2011_v28 = vadd.f32 %v541_v50, %v1921_v19 }
 0x230   :  { %v1604_v46 = vpop.eup %1603  ;;  %1629 = vrcp.f32 %v654_v39  ;;  %v655_v47 = vadd.f32 1.0, %v1602_v18  ;;  %v545_v27 = vpop.f32.mrf.mxu1  ;;  %v2005_v18 = vadd.f32 %v539_v33, %v1917_v17  ;;  %v2014_v29 = vadd.f32 %v472_v20, %v1915_v16 }
 0x231   :  { %v1606_v51 = vpop.eup %1605  ;;  %1631 = vrcp.f32 %v656_v42  ;;  %v657_v52 = vadd.f32 1.0, %v1604_v46  ;;  %v474_v38 = vpop.f32.mrf.mxu0  ;;  %v2008_v42 = vadd.f32 %v468_v45, %v1919_v21  ;;  %v2018_v33 = vadd.f32 %v545_v27, %v1917_v17 }
 0x232   :  { %v1608_v56 = vpop.eup %1607  ;;  %1633 = vrcp.f32 %v655_v47  ;;  %v658_v57 = vadd.f32 1.0, %v1606_v51  ;;  %v547_v15 = vpop.f32.mrf.mxu1  ;;  %v2021_v45 = vadd.f32 %v474_v38, %v1919_v21  ;;  %v1303_v20 = vmul.f32 -1.442695, %v2002_v34 }
 0x233   :  { %v1610_v59 = vpop.eup %1609  ;;  %1635 = vrcp.f32 %v657_v52  ;;  %v660_v62 = vadd.f32 1.0, %v1608_v56  ;;  %v1300_v52 = vmul.f32 -1.442695, %v1996_v12  ;;  %v2025_v50 = vadd.f32 %v547_v15, %v1921_v19 }
 0x234   :  { %v1612_v63 = vpop.eup %1611  ;;  %1637 = vrcp.f32 %v658_v57  ;;  %v659_v4 = vadd.f32 1.0, %v1610_v59  ;;  %v1302_v57 = vmul.f32 -1.442695, %v1999_v32  ;;  %v476_v59 = vpop.f32.mrf.mxu0 }
 0x235   :  { %v1614_v13 = vpop.eup %1613  ;;  %1639 = vrcp.f32 %v660_v62  ;;  %v661_v14 = vadd.f32 1.0, %v1612_v63  ;;  %v1305_v63 = vmul.f32 -1.442695, %v2005_v18 }
 0x236   :  { %v1616_v22 = vpop.eup %1615  ;;  %1641 = vrcp.f32 %v659_v4  ;;  %v662_v25 = vadd.f32 1.0, %v1614_v13  ;;  %v549_v4 = vpop.f32.mrf.mxu1  ;;  %v1304_v13 = vmul.f32 -1.442695, %v2008_v42 }
 0x237   :  { %v1618_v36 = vpop.eup %1617  ;;  %1643 = vrcp.f32 %v661_v14  ;;  %v664_v31 = vadd.f32 1.0, %v1616_v22  ;;  %v1306_v14 = vmul.f32 -1.442695, %v2011_v28  ;;  %v1307_v22 = vmul.f32 -1.442695, %v2014_v29  ;;  %v478_v15 = vpop.f32.mrf.mxu0 }
 0x238   :  { %v1620_v43 = vpop.eup %1619  ;;  %1645 = vrcp.f32 %v662_v25  ;;  %v663_v39 = vadd.f32 1.0, %v1618_v36  ;;  %v1309_v36 = vmul.f32 -1.442695, %v2018_v33 }
 0x239   :  { %v1622_v46 = vpop.eup %1621  ;;  %1647 = vrcp.f32 %v664_v31  ;;  %v665_v47 = vadd.f32 1.0, %v1620_v43  ;;  %v1308_v31 = vmul.f32 -1.442695, %v2021_v45 }
 0x23a   :  { %v1624_v51 = vpop.eup %1623  ;;  %1649 = vrcp.f32 %v663_v39  ;;  %v2040_v39 = vadd.f32 %v549_v4, %v1917_v17  ;;  %v746_v9 = vmul.f32 %v1622_v46, %v1924_v23 }
 0x23b   :  { %v1626_v56 = vpop.eup %1625  ;;  %1651 = vrcp.f32 %v665_v47  ;;  %v748_v4 = vmul.f32 %v1624_v51, %v1927_v24 }
 0x23c   :  { %v1628_v62 = vpop.eup %1627  ;;  %1653 = vpow2.f32 %v1299_v7  ;;  %v2035_v7 = vadd.f32 %v476_v59, %v1915_v16  ;;  %v551_v16 = vpop.f32.mrf.mxu1  ;;  %v1313_v24 = vmul.f32 -1.442695, %v2040_v39 }
 0x23d   :  { %v1630_v27 = vpop.eup %1629  ;;  %1655 = vpow2.f32 %v1301_v26  ;;  %v1310_v26 = vmul.f32 -1.442695, %v2025_v50 }
 0x23e   :  { %v1632_v25 = vpop.eup %1631  ;;  %1657 = vpow2.f32 %v1300_v52  ;;  %v750_v43 = vmul.f32 %v1630_v27, %v1940_v37  ;;  %v747_v52 = vmul.f32 %v1626_v56, %v1932_v30  ;;  %v749_v37 = vmul.f32 %v1628_v62, %v1935_v35 }
 0x23f   :  { %v1634_v38 = vpop.eup %1633  ;;  %1659 = vpow2.f32 %v1302_v57  ;;  %v752_v11 = vmul.f32 %v1632_v25, %v1943_v44  ;;  %v2050_v30 = vadd.f32 %v478_v15, %v1919_v21 }
 0x240   :  { %v1636_v47 = vpop.eup %1635  ;;  %v751_v10 = vmul.f32 %v1634_v38, %v1947_v40  ;;  %1661 = vpow2.f32 %v1303_v20  ;;  %v778_v40 = vpack.c.bf16 %v750_v43, %v746_v9  ;;  %v2053_v20 = vadd.f32 %v551_v16, %v1921_v19 }
 0x241   :  { %v1638_v59 = vpop.eup %1637  ;;  %v753_v57 = vmul.f32 %v1636_v47, %v1950_v41  ;;  %1663 = vpow2.f32 %v1305_v63  ;;  %v780_v35 = vpack.c.bf16 %v752_v11, %v748_v4  ;;  %v1311_v41 = vmul.f32 -1.442695, %v2035_v7 }
 0x242   :  { %v1640_v17 = vpop.eup %1639  ;;  %1665 = vpow2.f32 %v1304_v13  ;;  %v779_v44 = vpack.c.bf16 %v751_v10, %v747_v52  ;;  %v1312_v9 = vmul.f32 -1.442695, %v2050_v30  ;;  %v1314_v11 = vmul.f32 -1.442695, %v2053_v20 }
 0x243   :  { %v1642_v56 = vpop.eup %1641  ;;  %1667 = vpow2.f32 %v1306_v14  ;;  %v781_v23 = vpack.c.bf16 %v753_v57, %v749_v37 }
 0x244   :  { %v1644_v46 = vpop.eup %1643  ;;  %1669 = vpow2.f32 %v1307_v22  ;;  %1089 = vmatprep.mubr.bf16.mxu0 %v779_v44  ;;  %v755_v63 = vmul.f32 %v1642_v56, %v1963_v53  ;;  %v754_v22 = vmul.f32 %v1638_v59, %v1956_v48 }
 0x245   :  { %v1646_v62 = vpop.eup %1645  ;;  %1671 = vpow2.f32 %v1309_v36  ;;  %1154 = vmatprep.mubr.bf16.mxu1 %v781_v23  ;;  %1090 = vmatmul.mubr.bf16.vlgmr.msra.gmra.mxu0 %v778_v40  ;;  %v757_v25 = vmul.f32 %v1644_v46, %v1966_v54 }
 0x246   :  { %v1648_v10 = vpop.eup %1647  ;;  %1673 = vpow2.f32 %v1308_v31  ;;  %1155 = vmatmul.mubr.bf16.vlgmr.msra.gmra.mxu1 %v780_v35  ;;  %v758_v19 = vmul.f32 %v1646_v62, %v1972_v60  ;;  %v756_v31 = vmul.f32 %v1640_v17, %v1959_v49 }
 0x247   :  { %v1650_v21 = vpop.eup %1649  ;;  %1675 = vpow2.f32 %v1310_v26  ;;  %v760_v27 = vmul.f32 %v1648_v10, %v1975_v61 }
 0x248   :  { %v1652_v51 = vpop.eup %1651  ;;  %v759_v13 = vmul.f32 %v1650_v21, %v1979_v0  ;;  %1677 = vpow2.f32 %v1311_v41  ;;  %v782_v0 = vpack.c.bf16 %v758_v19, %v754_v22 }
 0x249   :  { %v1654_v14 = vpop.eup %1653  ;;  %v761_v36 = vmul.f32 %v1652_v51, %v1982_v1  ;;  %1679 = vpow2.f32 %v1313_v24  ;;  %v784_v48 = vpack.c.bf16 %v760_v27, %v756_v31 }
 0x24a   :  { %v1656_v60 = vpop.eup %1655  ;;  %v666_v38 = vadd.f32 1.0, %v1654_v14  ;;  %1681 = vpow2.f32 %v1312_v9  ;;  %v783_v43 = vpack.c.bf16 %v759_v13, %v755_v63 }
 0x24b   :  { %v1658_v53 = vpop.eup %1657  ;;  %v668_v26 = vadd.f32 1.0, %v1656_v60  ;;  %1683 = vpow2.f32 %v1314_v11  ;;  %v785_v61 = vpack.c.bf16 %v761_v36, %v757_v25 }
 0x24c   :  { %v1660_v15 = vpop.eup %1659  ;;  %1685 = vrcp.f32 %v666_v38  ;;  %v667_v47 = vadd.f32 1.0, %v1658_v53  ;;  %1097 = vmatprep.mubr.bf16.mxu0 %v783_v43 }
 0x24d   :  { %v1662_v54 = vpop.eup %1661  ;;  %1687 = vrcp.f32 %v668_v26  ;;  %v669_v1 = vadd.f32 1.0, %v1660_v15  ;;  %1162 = vmatprep.mubr.bf16.mxu1 %v785_v61  ;;  %1098 = vmatmul.mubr.bf16.gmra.mxu0 %v782_v0 }
 0x24e   :  { %v1664_v52 = vpop.eup %1663  ;;  %1689 = vrcp.f32 %v667_v47  ;;  %v670_v49 = vadd.f32 1.0, %v1662_v54  ;;  %1163 = vmatmul.mubr.bf16.gmra.mxu1 %v784_v48 }
 0x24f   :  { %v1666_v16 = vpop.eup %1665  ;;  %1691 = vrcp.f32 %v669_v1  ;;  %v672_v59 = vadd.f32 1.0, %v1664_v52 }
 0x250   :  { %v1668_v37 = vpop.eup %1667  ;;  %1693 = vrcp.f32 %v670_v49  ;;  %v671_v57 = vadd.f32 1.0, %v1666_v16 }
 0x251   :  { %v1670_v17 = vpop.eup %1669  ;;  %1695 = vrcp.f32 %v672_v59  ;;  %v673_v4 = vadd.f32 1.0, %v1668_v37 }
 0x252   :  { %v1672_v44 = vpop.eup %1671  ;;  %1697 = vrcp.f32 %v671_v57  ;;  %v674_v56 = vadd.f32 1.0, %v1670_v17 }
 0x253   :  { %v1674_v40 = vpop.eup %1673  ;;  %1699 = vrcp.f32 %v673_v4  ;;  %v676_v23 = vadd.f32 1.0, %v1672_v44 }
 0x254   :  { %v1676_v46 = vpop.eup %1675  ;;  %1701 = vrcp.f32 %v674_v56  ;;  %v675_v35 = vadd.f32 1.0, %v1674_v40 }
 0x255   :  { %v1678_v41 = vpop.eup %1677  ;;  %1703 = vrcp.f32 %v676_v23  ;;  %v677_v62 = vadd.f32 1.0, %v1676_v46 }
 0x256   :  { %v1680_v24 = vpop.eup %1679  ;;  %1705 = vrcp.f32 %v675_v35  ;;  %v678_v10 = vadd.f32 1.0, %v1678_v41 }
 0x257   :  { %v1682_v9 = vpop.eup %1681  ;;  %1707 = vrcp.f32 %v677_v62  ;;  %v680_v21 = vadd.f32 1.0, %v1680_v24 }
 0x258   :  { %v1684_v19 = vpop.eup %1683  ;;  %1709 = vrcp.f32 %v678_v10  ;;  %v679_v11 = vadd.f32 1.0, %v1682_v9 }
 0x259   :  { %v1686_v51 = vpop.eup %1685  ;;  %1711 = vrcp.f32 %v680_v21  ;;  %v681_v63 = vadd.f32 1.0, %v1684_v19 }
 0x25a   :  { %v1688_v27 = vpop.eup %1687  ;;  %1713 = vrcp.f32 %v679_v11  ;;  %v762_v61 = vmul.f32 %v1686_v51, %v1988_v55 }
 0x25b   :  { %v1690_v13 = vpop.eup %1689  ;;  %1715 = vrcp.f32 %v681_v63  ;;  %v764_v48 = vmul.f32 %v1688_v27, %v1991_v58 }
 0x25c   :  { %v1692_v14 = vpop.eup %1691  ;;  %v763_v38 = vmul.f32 %v1690_v13, %v1996_v12 }
 0x25d   :  { %v1694_v22 = vpop.eup %1693  ;;  %v765_v0 = vmul.f32 %v1692_v14, %v1999_v32 }
 0x25e   :  { %v1696_v25 = vpop.eup %1695  ;;  %v766_v60 = vmul.f32 %v1694_v22, %v2002_v34 }
 0x25f   :  { %v1698_v36 = vpop.eup %1697  ;;  %v768_v43 = vmul.f32 %v1696_v25, %v2005_v18 }
 0x260   :  { %v1700_v31 = vpop.eup %1699  ;;  %v767_v53 = vmul.f32 %v1698_v36, %v2008_v42  ;;  %v786_v52 = vpack.c.bf16 %v766_v60, %v762_v61 }
 0x261   :  { %v1702_v26 = vpop.eup %1701  ;;  %v769_v15 = vmul.f32 %v1700_v31, %v2011_v28  ;;  %v788_v12 = vpack.c.bf16 %v768_v43, %v764_v48 }
 0x262   :  { %v1704_v47 = vpop.eup %1703  ;;  %v787_v54 = vpack.c.bf16 %v767_v53, %v763_v38  ;;  %v770_v37 = vmul.f32 %v1702_v26, %v2014_v29  ;;  %v2086_v29 = vld [vmem:[%s2122_s6] ss:$0 sm:$0xff] }
 0x263   :  { %v1706_v1 = vpop.eup %1705  ;;  %v789_v34 = vpack.c.bf16 %v769_v15, %v765_v0  ;;  %v772_v4 = vmul.f32 %v1704_v47, %v2018_v33 }
 0x264   :  { %v1708_v49 = vpop.eup %1707  ;;  %1105 = vmatprep.mubr.bf16.mxu0 %v787_v54  ;;  %v771_v28 = vmul.f32 %v1706_v1, %v2021_v45 }
 0x265   :  { %v1710_v18 = vpop.eup %1709  ;;  %1170 = vmatprep.mubr.bf16.mxu1 %v789_v34  ;;  %1106 = vmatmul.mubr.bf16.gmra.mxu0 %v786_v52  ;;  %v773_v57 = vmul.f32 %v1708_v49, %v2025_v50 }
 0x266   :  { %v1712_v42 = vpop.eup %1711  ;;  %1171 = vmatmul.mubr.bf16.gmra.mxu1 %v788_v12  ;;  %v774_v32 = vmul.f32 %v1710_v18, %v2035_v7 }
 0x267   :  { %v1714_v55 = vpop.eup %1713  ;;  %v776_v58 = vmul.f32 %v1712_v42, %v2040_v39 }
 0x268   :  { %v1716_v16 = vpop.eup %1715  ;;  %v775_v59 = vmul.f32 %v1714_v55, %v2050_v30  ;;  %v790_v40 = vpack.c.bf16 %v774_v32, %v770_v37 }
 0x269   :  { %v777_v17 = vmul.f32 %v1716_v16, %v2053_v20  ;;  %v792_v7 = vpack.c.bf16 %v776_v58, %v772_v4 }
 0x26a   :  { %v791_v44 = vpack.c.bf16 %v775_v59, %v771_v28 }
 0x26b   :  { %v793_v56 = vpack.c.bf16 %v777_v17, %v773_v57 }
 0x26c   :  { %1113 = vmatprep.mubr.bf16.mxu0 %v791_v44 }
 0x26d   :  { %1178 = vmatprep.mubr.bf16.mxu1 %v793_v56  ;;  %1114 = vmatmul.mubr.bf16.gmra.mxu0 %v790_v40 }
 0x26e   :  { %1179 = vmatmul.mubr.bf16.gmra.mxu1 %v792_v7 }
 0x305   :  { %v1422_v45 = vpop.f32.mrf.mxu0 }
 0x306   :  { %v1462_v39 = vpop.f32.mrf.mxu1 }
 0x307   :  { %v1423_v50 = vpop.f32.mrf.mxu0 }
 0x308   :  { %v1424_v30 = vadd.f32 %v1423_v50, %v1422_v45  ;;  %v1463_v20 = vpop.f32.mrf.mxu1 }
 0x309   :  { %v1425_v23 = vpop.f32.mrf.mxu0  ;;  %v1464_v46 = vadd.f32 %v1463_v20, %v1462_v39 }
 0x30a   :  { %v1092_v33 = vadd.f32 %v1424_v30, %v2086_v29  ;;  %v1465_v35 = vpop.f32.mrf.mxu1 }
 0x30b   :  { %v1426_v41 = vpop.f32.mrf.mxu0 }
 0x30c   :  { %v1157_v62 = vadd.f32 %v1464_v46, %v1092_v33  ;;  %v1427_v24 = vadd.f32 %v1426_v41, %v1425_v23  ;;  %v1466_v10 = vpop.f32.mrf.mxu1  ;;  %v2130_v41 = vld [vmem:[#allocation8_spill] sm:$0xff] }
 0x30d   :  { %v1428_v9 = vpop.f32.mrf.mxu0  ;;  %v1467_v19 = vadd.f32 %v1466_v10, %v1465_v35 }
 0x30e   :  { %v1095_v21 = vadd.f32 %v1427_v24, %v2086_v29  ;;  %v1468_v11 = vpop.f32.mrf.mxu1  ;;  %v1187_v63 = vmul.f32 0.5, %v1157_v62 }
 0x30f   :  { %v1429_v51 = vpop.f32.mrf.mxu0 }
 0x310   :  { %v1160_v27 = vadd.f32 %v1467_v19, %v1095_v21  ;;  %v1430_v13 = vadd.f32 %v1429_v51, %v1428_v9  ;;  %v1469_v14 = vpop.f32.mrf.mxu1  ;;  %v1195_v43 = vadd.f32 %v1820_v2, %v1187_v63 }
 0x311   :  { %v1431_v22 = vpop.f32.mrf.mxu0  ;;  %v1470_v60 = vadd.f32 %v1469_v14, %v1468_v11 }
 0x312   :  { %v1188_v25 = vmul.f32 0.5, %v1160_v27  ;;  %v1100_v36 = vadd.f32 %v1430_v13, %v2086_v29  ;;  %v1471_v31 = vpop.f32.mrf.mxu1  ;;  %v2131_v13 = vld [vmem:[#allocation9_spill] sm:$0xff] }
 0x313   :  { %v1432_v38 = vpop.f32.mrf.mxu0 }
 0x314   :  { %v1196_v53 = vadd.f32 %v1829_v5, %v1188_v25  ;;  %v1165_v26 = vadd.f32 %v1470_v60, %v1100_v36  ;;  %v1433_v61 = vadd.f32 %v1432_v38, %v1431_v22  ;;  %v1472_v0 = vpop.f32.mrf.mxu1  ;;  %v2132_v22 = vld [vmem:[#allocation10_spill] sm:$0xff] }
 0x315   :  { %v1473_v48 = vadd.f32 %v1472_v0, %v1471_v31 }
 0x316   :  { %v1383_v15 = vpack.c.bf16 %v1196_v53, %v1195_v43  ;;  %v1103_v47 = vadd.f32 %v1433_v61, %v2086_v29  ;;  %v1189_v54 = vmul.f32 0.5, %v1165_v26 }
 0x318   :  { %1384 = vst [vmem:[%s2123_s7] sm:$0xff] %v1383_v15   ;;  %v1168_v1 = vadd.f32 %v1473_v48, %v1103_v47  ;;  %v1197_v52 = vadd.f32 %v1822_v3, %v1189_v54 }
 0x31a   :  { %v1190_v34 = vmul.f32 0.5, %v1168_v1 }
 0x31c   :  { %v1198_v2 = vadd.f32 %v1831_v6, %v1190_v34 }
 0x31e   :  { %v1388_v49 = vpack.c.bf16 %v1198_v2, %v1197_v52 }
 0x320   :  { %1403 = vst [vmem:[%s2123_s7 + $0x8] sm:$0xff] %v1388_v49  }
 0x325   :  { %v1434_v5 = vpop.f32.mrf.mxu0 }
 0x326   :  { %v1474_v12 = vpop.f32.mrf.mxu1 }
 0x327   :  { %v1435_v18 = vpop.f32.mrf.mxu0 }
 0x328   :  { %v1436_v42 = vadd.f32 %v1435_v18, %v1434_v5  ;;  %v1475_v55 = vpop.f32.mrf.mxu1 }
 0x329   :  { %v1437_v32 = vpop.f32.mrf.mxu0  ;;  %v1476_v28 = vadd.f32 %v1475_v55, %v1474_v12 }
 0x32a   :  { %v1108_v16 = vadd.f32 %v1436_v42, %v2086_v29  ;;  %v1477_v58 = vpop.f32.mrf.mxu1 }
 0x32b   :  { %v1438_v59 = vpop.f32.mrf.mxu0 }
 0x32c   :  { %v1173_v37 = vadd.f32 %v1476_v28, %v1108_v16  ;;  %v1439_v3 = vadd.f32 %v1438_v59, %v1437_v32  ;;  %v1478_v57 = vpop.f32.mrf.mxu1 }
 0x32d   :  { %v1440_v6 = vpop.f32.mrf.mxu0  ;;  %v1479_v4 = vadd.f32 %v1478_v57, %v1477_v58 }
 0x32e   :  { %v1111_v17 = vadd.f32 %v1439_v3, %v2086_v29  ;;  %v1480_v44 = vpop.f32.mrf.mxu1  ;;  %v1191_v40 = vmul.f32 0.5, %v1173_v37 }
 0x32f   :  { %v1441_v56 = vpop.f32.mrf.mxu0 }
 0x330   :  { %v1176_v7 = vadd.f32 %v1479_v4, %v1111_v17  ;;  %v1442_v45 = vadd.f32 %v1441_v56, %v1440_v6  ;;  %v1481_v39 = vpop.f32.mrf.mxu1  ;;  %v1199_v35 = vadd.f32 %v1838_v8, %v1191_v40 }
 0x331   :  { %v1443_v50 = vpop.f32.mrf.mxu0  ;;  %v1482_v23 = vadd.f32 %v1481_v39, %v1480_v44 }
 0x332   :  { %v1192_v30 = vmul.f32 0.5, %v1176_v7  ;;  %v1116_v20 = vadd.f32 %v1442_v45, %v2086_v29  ;;  %v1483_v33 = vpop.f32.mrf.mxu1 }
 0x333   :  { %v1444_v46 = vpop.f32.mrf.mxu0 }
 0x334   :  { %v1200_v62 = vadd.f32 %v2130_v41, %v1192_v30  ;;  %v1181_v24 = vadd.f32 %v1482_v23, %v1116_v20  ;;  %v1445_v10 = vadd.f32 %v1444_v46, %v1443_v50  ;;  %v1484_v9 = vpop.f32.mrf.mxu1 }
 0x335   :  { %v1485_v11 = vadd.f32 %v1484_v9, %v1483_v33 }
 0x336   :  { %v1393_v21 = vpack.c.bf16 %v1200_v62, %v1199_v35  ;;  %v1119_v19 = vadd.f32 %v1445_v10, %v2086_v29  ;;  %v1193_v51 = vmul.f32 0.5, %v1181_v24 }
 0x338   :  { %1404 = vst [vmem:[%s2123_s7 + $0x10] sm:$0xff] %v1393_v21   ;;  %v1184_v63 = vadd.f32 %v1485_v11, %v1119_v19  ;;  %v1201_v14 = vadd.f32 %v2131_v13, %v1193_v51 }
 0x33a   :  { %v1194_v27 = vmul.f32 0.5, %v1184_v63 }
 0x33c   :  { %v1202_v8 = vadd.f32 %v2132_v22, %v1194_v27 }
 0x33e   :  { %v1398_v25 = vpack.c.bf16 %v1202_v8, %v1201_v14 }
 0x340   :  { %1405 = vst [vmem:[%s2123_s7 + $0x18] sm:$0xff] %v1398_v25  }
 0x341   :  { %1247 = vsyncpa [#allocation3], 1 }
 0x342   :  { %1248 = vsyncpa [#allocation5], 1 }

// kernel: conformer_encoder_forward.10
= control target key start
LH: loop header
LB: loop body
LE: loop exit
PB: predicated region body
PF: predicated region fallthrough
CT: control target
= control target key end

     0   :  { %s1896_s21 = smov 0   ;;  %s2172_s0 = inlined_call_operand.vmem [shape: bf16[2,32,128], index: 0, kind: input, shape index: {}]   ;;  %s2173_s1 = inlined_call_operand.vmem [shape: f32[2,1,32], index: 1, kind: input, shape index: {}]   ;;  %s2174_s2 = inlined_call_operand.vmem [shape: f32[1,128], index: 2, kind: input, shape index: {}]   ;;  %s2175_s3 = inlined_call_operand.vmem [shape: f32[1,128], index: 3, kind: input, shape index: {}]   ;;  %s2176_s4 = inlined_call_operand.vmem [shape: bf16[128,128], index: 4, kind: input, shape index: {}]   ;;  %s2177_s5 = inlined_call_operand.vmem [shape: f32[1,128], index: 5, kind: input, shape index: {}]   ;;  %s2178_s6 = inlined_call_operand.vmem [shape: bf16[128,128], index: 6, kind: input, shape index: {}]   ;;  %s2179_s7 = inlined_call_operand.vmem [shape: f32[1,128], index: 7, kind: input, shape index: {}]   ;;  %s2180_s8 = inlined_call_operand.vmem [shape: bf16[128,128], index: 8, kind: input, shape index: {}]   ;;  %s2181_s9 = inlined_call_operand.vmem [shape: f32[1,128], index: 9, kind: input, shape index: {}]   ;;  %s2182_s10 = inlined_call_operand.vmem [shape: bf16[128,128], index: 10, kind: input, shape index: {}]   ;;  %s2183_s11 = inlined_call_operand.vmem [shape: f32[1,128], index: 11, kind: input, shape index: {}]   ;;  %s2184_s12 = inlined_call_operand.vmem [shape: bf16[2,32,128], index: 12, kind: output, shape index: {}]  }
   0x1 LB: > { %s1471_s22 = sadd.s32 4294967295, %s1828_s21   ;;  %p1475_p0 = scmp.ge.s32.totalorder %s1828_s21, 1  ;;  %s1828_s21 = sphi %s1896_s21, %s22_s21  }
   0x2   : > { %p370_p1 = scmp.lt.s32.totalorder %s1828_s21, 3 }
   0x4   : > { %p371_p2 = pnand %p1475_p0, %p370_p1 }
   0x5   : > { %p415_p3 = scmp.lt.s32.totalorder (!%p371_p2), %s1471_s22, 1  ;;  %s1830_s28 = smov (!%p371_p2), 64  }
   0x6   : > { %374 = sbr.rel (%p371_p2) target bundleno = 2145 (0x861), region = 68 }
   0xb   : > { %s2186_s22 = smov (!%p415_p3, %s1471_s22), 1  ;;  %v1750_v22 = vld [vmem:[%s2176_s4 + $0x38] sm:$0xff]   ;;  %v1752_v24 = vld [vmem:[%s2176_s4 + $0x30] sm:$0xff]   ;;  %v1754_v26 = vld [vmem:[%s2176_s4 + $0x28] sm:$0xff]   ;;  %vm873_vm0 = vcmask 523264   ;;  %vm949_vm1 = vcmask 261120  }
   0xc   : > { %s1533_s23 = sshll.u32 %s2186_s22, 4  ;;  %v1751_v23 = vld [vmem:[%s2178_s6 + $0x38] sm:$0xff]   ;;  %1615 = vmatprep.subr.bf16.mxu0 %v1750_v22  ;;  %v1753_v25 = vld [vmem:[%s2178_s6 + $0x30] sm:$0xff]   ;;  %v1755_v27 = vld [vmem:[%s2178_s6 + $0x28] sm:$0xff]   ;;  %s422_s27 = scalar_lea.vmem %s2173_s1, %s2186_s22 }
   0xd   : > { %s419_s26 = scalar_lea.vmem %s2172_s0, %s1533_s23  ;;  %1616 = vmatpush3.bf16.msra.mxu0 %v1750_v22  ;;  %1635 = vmatprep.subr.bf16.mxu1 %v1751_v23  ;;  %v1756_v28 = vld [vmem:[%s2176_s4 + $0x20] sm:$0xff]   ;;  %v1758_v30 = vld [vmem:[%s2176_s4 + $0x18] sm:$0xff]   ;;  %v1760_v32 = vld [vmem:[%s2176_s4 + $0x10] sm:$0xff]   ;;  %s427_s16 = scalar_lea.vmem %s2184_s12, %s1533_s23 }
   0xe   : > { %v1540_v0 = vld [vmem:[%s419_s26] sm:$0xff]   ;;  %v1557_v1 = vld [vmem:[%s419_s26 + $0x8] sm:$0xff]   ;;  %1636 = vmatpush3.bf16.msra.mxu1 %v1751_v23  ;;  %1617 = vmatprep.subr.bf16.mxu0 %v1752_v24  ;;  %v1759_v31 = vld [vmem:[%s2178_s6 + $0x18] sm:$0xff]  }
   0xf   : > { %v1912_v2 = vunpack.c.l.bf16 %v1540_v0  ;;  %v1914_v3 = vunpack.c.l.bf16 %v1557_v1  ;;  %v1918_v4 = vunpack.c.h.bf16 %v1540_v0  ;;  %v1920_v5 = vunpack.c.h.bf16 %v1557_v1  ;;  %1637 = vmatprep.subr.bf16.mxu1 %v1753_v25  ;;  %v1757_v29 = vld [vmem:[%s2178_s6 + $0x20] sm:$0xff]   ;;  %v1761_v33 = vld [vmem:[%s2178_s6 + $0x10] sm:$0xff]   ;;  %v1762_v34 = vld [vmem:[%s2176_s4 + $0x8] sm:$0xff]  }
  0x10   : > { %v1763_v35 = vld [vmem:[%s2178_s6 + $0x8] sm:$0xff]   ;;  %v1764_v36 = vld [vmem:[%s2176_s4] sm:$0xff]   ;;  %v1766_v38 = vld [vmem:[%s2180_s8 + $0x38] sm:$0xff]  }
  0x11   : > { %439 = vadd.xlane.f32.xlu0 %v1912_v2  ;;  %443 = vadd.xlane.f32.xlu1 %v1914_v3  ;;  %v1765_v37 = vld [vmem:[%s2178_s6] sm:$0xff]  }
  0x12   : > { %1618 = vmatpush3.bf16.msra.mxu0 %v1752_v24  ;;  %1638 = vmatpush3.bf16.msra.mxu1 %v1753_v25  ;;  %v1480_v53 = vld [vmem:[%s2174_s2] ss:$0 sm:$0xff] }
  0x13   : > { %1619 = vmatprep.subr.bf16.mxu0 %v1754_v26  ;;  %1639 = vmatprep.subr.bf16.mxu1 %v1755_v27  ;;  %v1481_v58 = vld [vmem:[%s2175_s3] ss:$0 sm:$0xff] }
  0x14   : > { %v1482_v25 = vld [vmem:[%s2177_s5] ss:$0 sm:$0xff] }
  0x15   : > { %441 = vadd.xlane.f32.xlu0 %v1918_v4  ;;  %445 = vadd.xlane.f32.xlu1 %v1920_v5 }
  0x16   : > { %1620 = vmatpush3.bf16.msra.mxu0 %v1754_v26  ;;  %1640 = vmatpush3.bf16.msra.mxu1 %v1755_v27 }
  0x17   : > { %1621 = vmatprep.subr.bf16.mxu0 %v1756_v28  ;;  %1641 = vmatprep.subr.bf16.mxu1 %v1757_v29 }
  0x1a   : > { %1622 = vmatpush3.bf16.msra.mxu0 %v1756_v28  ;;  %1642 = vmatpush3.bf16.msra.mxu1 %v1757_v29 }
  0x1b   : > { %1623 = vmatprep.subr.bf16.mxu0 %v1758_v30  ;;  %1643 = vmatprep.subr.bf16.mxu1 %v1759_v31 }
  0x1e   : > { %1624 = vmatpush3.bf16.msra.mxu0 %v1758_v30  ;;  %1644 = vmatpush3.bf16.msra.mxu1 %v1759_v31 }
  0x1f   : > { %1625 = vmatprep.subr.bf16.mxu0 %v1760_v32  ;;  %1645 = vmatprep.subr.bf16.mxu1 %v1761_v33 }
  0x22   : > { %1626 = vmatpush3.bf16.msra.mxu0 %v1760_v32  ;;  %1646 = vmatpush3.bf16.msra.mxu1 %v1761_v33 }
  0x23   : > { %1627 = vmatprep.subr.bf16.mxu0 %v1762_v34  ;;  %1647 = vmatprep.subr.bf16.mxu1 %v1763_v35 }
  0x26   : > { %1628 = vmatpush3.bf16.msra.mxu0 %v1762_v34  ;;  %1648 = vmatpush3.bf16.msra.mxu1 %v1763_v35 }
  0x27   : > { %1629 = vmatprep.subr.bf16.mxu0 %v1764_v36  ;;  %1649 = vmatprep.subr.bf16.mxu1 %v1765_v37 }
  0x2a   : > { %1630 = vmatpush3.bf16.msra.mxu0 %v1764_v36  ;;  %1650 = vmatpush3.bf16.msra.mxu1 %v1765_v37 }
  0x2b   : > { %1655 = vmatprep.subr.bf16.mxu0 %v1766_v38 }
  0x9a   : > { %v440_v6 = vpop.xlane.xlu0 %439  ;;  %v444_v7 = vpop.xlane.xlu1 %443 }
  0x9b   : > { %v448_v8 = vmul.f32 0.0078125, %v440_v6  ;;  %v450_v9 = vmul.f32 0.0078125, %v444_v7 }
  0x9d   : > { %v1925_v10 = vsub.f32 %v1912_v2, %v448_v8  ;;  %v1928_v11 = vsub.f32 %v1914_v3, %v450_v9 }
  0x9e   : > { %v442_v12 = vpop.xlane.xlu0 %441  ;;  %v446_v13 = vpop.xlane.xlu1 %445 }
  0x9f   : > { %v449_v14 = vmul.f32 0.0078125, %v442_v12  ;;  %v456_v15 = vmul.f32 %v1925_v10, %v1925_v10  ;;  %v451_v16 = vmul.f32 0.0078125, %v446_v13  ;;  %v458_v19 = vmul.f32 %v1928_v11, %v1928_v11  ;;  %v1767_v12 = vld [vmem:[%s2180_s8 + $0x30] sm:$0xff]   ;;  %v1769_v13 = vld [vmem:[%s2180_s8 + $0x20] sm:$0xff]  }
  0xa1   : > { %v1933_v17 = vsub.f32 %v1918_v4, %v449_v14  ;;  %460 = vadd.xlane.f32.xlu0 %v456_v15  ;;  %v1936_v18 = vsub.f32 %v1920_v5, %v451_v16  ;;  %v1770_v14 = vld [vmem:[%s2180_s8 + $0x18] sm:$0xff]   ;;  %v1771_v15 = vld [vmem:[%s2180_s8 + $0x10] sm:$0xff]   ;;  %v1772_v16 = vld [vmem:[%s2180_s8 + $0x8] sm:$0xff]  }
  0xa3   : > { %v457_v20 = vmul.f32 %v1933_v17, %v1933_v17  ;;  %v459_v21 = vmul.f32 %v1936_v18, %v1936_v18 }
  0xa5   : > { %464 = vadd.xlane.f32.xlu0 %v458_v19  ;;  %462 = vadd.xlane.f32.xlu1 %v457_v20  ;;  %v1491_v20 = vld [vmem:[%s2179_s7] ss:$0 sm:$0xff] }
  0xa9   : > { %466 = vadd.xlane.f32.xlu1 %v459_v21 }
 0x12a   : > { %v461_v39 = vpop.xlane.xlu0 %460 }
 0x12b   : > { %v468_v40 = vmul.f32 0.0078125, %v461_v39 }
 0x12d   : > { %v472_v41 = vadd.f32 1e-05, %v468_v40 }
 0x12e   : > { %v463_v42 = vpop.xlane.xlu1 %462  ;;  %v465_v43 = vpop.xlane.xlu0 %464 }
 0x12f   : > { %1782 = vrsqrt.f32 %v472_v41  ;;  %v469_v44 = vmul.f32 0.0078125, %v463_v42  ;;  %v470_v45 = vmul.f32 0.0078125, %v465_v43  ;;  %v1500_v43 = vld [vmem:[%s2181_s9] ss:$0 sm:$0xff] }
 0x131   : > { %v473_v46 = vadd.f32 1e-05, %v469_v44  ;;  %v474_v47 = vadd.f32 1e-05, %v470_v45 }
 0x132   : > { %v467_v48 = vpop.xlane.xlu1 %466 }
 0x133   : > { %1784 = vrsqrt.f32 %v473_v46  ;;  %v471_v49 = vmul.f32 0.0078125, %v467_v48 }
 0x134   : > { %1786 = vrsqrt.f32 %v474_v47 }
 0x135   : > { %v475_v50 = vadd.f32 1e-05, %v471_v49 }
 0x137   : > { %1788 = vrsqrt.f32 %v475_v50 }
 0x13c   : > { %v1783_v51 = vpop.eup %1782 }
 0x13d   : > { %v480_v52 = vmul.f32 %v1783_v51, %v1925_v10 }
 0x13f   : > { %v490_v57 = vmul.f32 %v1480_v53, %v480_v52 }
 0x140   : > { %v1785_v54 = vpop.eup %1784 }
 0x141   : > { %v1787_v55 = vpop.eup %1786  ;;  %v481_v56 = vmul.f32 %v1785_v54, %v1933_v17  ;;  %v500_v62 = vadd.f32 %v1481_v58, %v490_v57  ;;  %v1773_v17 = vld [vmem:[%s2180_s8] sm:$0xff]  }
 0x142   : > { %v482_v59 = vmul.f32 %v1787_v55, %v1928_v11  ;;  %v1768_v11 = vld [vmem:[%s2180_s8 + $0x28] sm:$0xff]   ;;  %v2067_v57 = vld [vmem:[%s422_s27] ss:$0 sm:$0xff] }
 0x143   : > { %v491_v60 = vmul.f32 %v1480_v53, %v481_v56 }
 0x144   : > { %v1789_v61 = vpop.eup %1788  ;;  %v492_v1 = vmul.f32 %v1480_v53, %v482_v59 }
 0x145   : > { %v501_v63 = vadd.f32 %v1481_v58, %v491_v60  ;;  %v483_v0 = vmul.f32 %v1789_v61, %v1936_v18 }
 0x146   : > { %v502_v8 = vadd.f32 %v1481_v58, %v492_v1 }
 0x147   : > { %v504_v6 = vpack.c.bf16 %v501_v63, %v500_v62  ;;  %v493_v7 = vmul.f32 %v1480_v53, %v483_v0 }
 0x149   : > { %1631 = vmatprep.mubr.bf16.mxu0 %v504_v6  ;;  %1651 = vmatprep.mubr.bf16.mxu1 %v504_v6  ;;  %v503_v9 = vadd.f32 %v1481_v58, %v493_v7 }
 0x14b   : > { %v505_v10 = vpack.c.bf16 %v503_v9, %v502_v8 }
 0x14d   : > { %1632 = vmatmul.mubr.bf16.vlgmr.msra.gmra.mxu0 %v505_v10  ;;  %1652 = vmatmul.mubr.bf16.vlgmr.msra.gmra.mxu1 %v505_v10 }
 0x14e   : > { %1656 = vmatpush3.bf16.msra.mxu0 %v1766_v38  ;;  %1671 = vmatprep.mubr.bf16.mxu0 %v504_v6 }
 0x14f   : > { %1657 = vmatprep.subr.bf16.mxu0 %v1767_v12 }
 0x152   : > { %1658 = vmatpush3.bf16.msra.mxu0 %v1767_v12 }
 0x153   : > { %1659 = vmatprep.subr.bf16.mxu0 %v1768_v11 }
 0x156   : > { %1660 = vmatpush3.bf16.msra.mxu0 %v1768_v11 }
 0x157   : > { %1661 = vmatprep.subr.bf16.mxu0 %v1769_v13 }
 0x15a   : > { %1662 = vmatpush3.bf16.msra.mxu0 %v1769_v13 }
 0x15b   : > { %1663 = vmatprep.subr.bf16.mxu0 %v1770_v14 }
 0x15e   : > { %1664 = vmatpush3.bf16.msra.mxu0 %v1770_v14 }
 0x15f   : > { %1665 = vmatprep.subr.bf16.mxu0 %v1771_v15 }
 0x162   : > { %1666 = vmatpush3.bf16.msra.mxu0 %v1771_v15 }
 0x163   : > { %1667 = vmatprep.subr.bf16.mxu0 %v1772_v16 }
 0x166   : > { %1668 = vmatpush3.bf16.msra.mxu0 %v1772_v16 }
 0x167   : > { %1669 = vmatprep.subr.bf16.mxu0 %v1773_v17 }
 0x16a   : > { %1670 = vmatpush3.bf16.msra.mxu0 %v1773_v17 }
 0x16d   : > { %1672 = vmatmul.mubr.bf16.vlgmr.msra.gmra.mxu0 %v505_v10 }
 0x20d   : > { %v1633_v18 = vpop.f32.mrf.mxu0  ;;  %v1653_v19 = vpop.f32.mrf.mxu1 }
 0x20e   : > { %v741_v26 = vadd.f32 %v1653_v19, %v1491_v20  ;;  %v621_v40 = vadd.f32 %v1633_v18, %v1482_v25 }
 0x20f   : > { %v612_v21 = vpop.f32.mrf.mxu0  ;;  %v732_v22 = vpop.f32.mrf.mxu1 }
 0x210   : > { %v613_v28 = vadd.f32 %v1482_v25, %v612_v21  ;;  %v733_v31 = vadd.f32 %v1491_v20, %v732_v22 }
 0x211   : > { %v1634_v23 = vpop.f32.mrf.mxu0  ;;  %v1654_v24 = vpop.f32.mrf.mxu1 }
 0x212   : > { %v744_v27 = vadd.f32 %v1654_v24, %v1491_v20  ;;  %v624_v39 = vadd.f32 %v1634_v23, %v1482_v25 }
 0x213   : > { %v615_v29 = vpop.f32.mrf.mxu0  ;;  %v735_v30 = vpop.f32.mrf.mxu1 }
 0x214   : > { %v2032_v32 = vpack.c.bf16 %v744_v27, %v741_v26  ;;  %v616_v33 = vadd.f32 %v1482_v25, %v615_v29  ;;  %v736_v34 = vadd.f32 %v1491_v20, %v735_v30  ;;  %v2048_v41 = vpack.c.bf16 %v624_v39, %v621_v40 }
 0x216   : > { %v2034_v35 = vpack.c.bf16 %v616_v33, %v613_v28  ;;  %v2036_v36 = vpack.c.bf16 %v736_v34, %v733_v31  ;;  %1727 = vmatprep.subr.msk.bf16.mxu1 %vm873_vm0, %v2032_v32  ;;  %v884_v37 = vsel %vm873_vm0, %v2032_v32, 0 }
 0x217   : > { %1676 = vmatpush3.bf16.xpose.msra.mxu1 %v884_v37 }
 0x218   : > { %1728 = vmatprep.subr.msk.bf16.mxu1 %vm873_vm0, %v2036_v36  ;;  %1679 = vmatprep.mubr.msk.bf16.mxu1 %vm873_vm0, %v2034_v35  ;;  %v881_v38 = vsel %vm873_vm0, %v2036_v36, 0 }
 0x21f   : > { %1678 = vmatpush3.bf16.xpose.msra.mxu1 %v881_v38 }
 0x226   : > { %1680 = vmatmul.mubr.msk.bf16.vlgmr.msra.gmra.mxu1 %vm873_vm0, %v2048_v41 }
 0x22d   : > { %v1673_v42 = vpop.f32.mrf.mxu0 }
 0x22e   : > { %v861_v46 = vadd.f32 %v1673_v42, %v1500_v43 }
 0x22f   : > { %v852_v44 = vpop.f32.mrf.mxu0 }
 0x230   : > { %v853_v49 = vadd.f32 %v1500_v43, %v852_v44 }
 0x231   : > { %v1674_v45 = vpop.f32.mrf.mxu0 }
 0x232   : > { %v864_v47 = vadd.f32 %v1674_v45, %v1500_v43 }
 0x233   : > { %v855_v48 = vpop.f32.mrf.mxu0 }
 0x234   : > { %v2055_v50 = vpack.c.bf16 %v864_v47, %v861_v46  ;;  %v856_v51 = vadd.f32 %v1500_v43, %v855_v48 }
 0x236   : > { %v2057_v52 = vpack.c.bf16 %v856_v51, %v853_v49  ;;  %1683 = vmatprep.subr.bf16.mxu1 %v2055_v50 }
 0x237   : > { %1684 = vmatpush3.bf16.msra.mxu1 %v2055_v50 }
 0x238   : > { %1685 = vmatprep.subr.bf16.mxu1 %v2057_v52 }
 0x23b   : > { %1686 = vmatpush3.bf16.msra.mxu1 %v2057_v52 }
 0x2e6   : > { %v1681_v53 = vpop.f32.mrf.mxu1 }
 0x2e7   : > { %v937_v55 = vmul.f32 0.125, %v1681_v53 }
 0x2e8   : > { %v920_v54 = vpop.f32.mrf.mxu1 }
 0x2e9   : > { %v935_v56 = vmul.f32 0.125, %v920_v54  ;;  %v947_v0 = vadd.f32 %v2067_v57, %v937_v55 }
 0x2ea   : > { %v1682_v58 = vpop.f32.mrf.mxu1 }
 0x2eb   : > { %v945_v59 = vadd.f32 %v2067_v57, %v935_v56  ;;  %v938_v61 = vmul.f32 0.125, %v1682_v58  ;;  %v956_v6 = vsel %vm949_vm1, %v947_v0, -inf }
 0x2ec   : > { %v923_v60 = vpop.f32.mrf.mxu1 }
 0x2ed   : > { %v936_v62 = vmul.f32 0.125, %v923_v60  ;;  %v950_v63 = vsel %vm949_vm1, %v945_v59, -inf  ;;  %v948_v8 = vadd.f32 %v2067_v57, %v938_v61 }
 0x2ee   : > { %951 = vmax.xlane.f32.xlu0 %v950_v63 }
 0x2ef   : > { %v946_v1 = vadd.f32 %v2067_v57, %v936_v62  ;;  %v959_v9 = vsel %vm949_vm1, %v948_v8, -inf }
 0x2f1   : > { %v953_v7 = vsel %vm949_vm1, %v946_v1, -inf }
 0x2f2   : > { %957 = vmax.xlane.f32.xlu0 %v956_v6  ;;  %954 = vmax.xlane.f32.xlu1 %v953_v7 }
 0x2f6   : > { %960 = vmax.xlane.f32.xlu1 %v959_v9 }
 0x377   : > { %v952_v10 = vpop.xlane.xlu0 %951 }
 0x378   : > { %v962_v12 = vsub.f32 %v945_v59, %v952_v10 }
 0x37a   : > { %v966_v16 = vmul.f32 1.442695, %v962_v12 }
 0x37b   : > { %v958_v11 = vpop.xlane.xlu0 %957  ;;  %v955_v13 = vpop.xlane.xlu1 %954 }
 0x37c   : > { %v964_v14 = vsub.f32 %v947_v0, %v958_v11  ;;  %v963_v15 = vsub.f32 %v946_v1, %v955_v13 }
 0x37e   : > { %v970_v17 = vmul.f32 1.442695, %v964_v14  ;;  %v968_v18 = vmul.f32 1.442695, %v963_v15 }
 0x37f   : > { %v961_v19 = vpop.xlane.xlu1 %960 }
 0x380   : > { %1790 = vpow2.f32 %v970_v17  ;;  %v965_v20 = vsub.f32 %v948_v8, %v961_v19 }
 0x381   : > { %1792 = vpow2.f32 %v968_v18 }
 0x382   : > { %1794 = vpow2.f32 %v966_v16  ;;  %v972_v21 = vmul.f32 1.442695, %v965_v20 }
 0x384   : > { %1796 = vpow2.f32 %v972_v21 }
 0x38d   : > { %v1791_v22 = vpop.eup %1790 }
 0x38e   : > { %v1793_v23 = vpop.eup %1792  ;;  %v980_v24 = vsel %vm949_vm1, %v1791_v22, 0.0 }
 0x38f   : > { %v1795_v25 = vpop.eup %1794  ;;  %981 = vadd.xlane.f32.xlu0 %v980_v24  ;;  %v977_v26 = vsel %vm949_vm1, %v1793_v23, 0.0 }
 0x390   : > { %978 = vadd.xlane.f32.xlu1 %v977_v26  ;;  %v974_v28 = vsel %vm949_vm1, %v1795_v25, 0.0 }
 0x391   : > { %v1797_v27 = vpop.eup %1796 }
 0x392   : > { %v983_v29 = vsel %vm949_vm1, %v1797_v27, 0.0 }
 0x393   : > { %975 = vadd.xlane.f32.xlu0 %v974_v28 }
 0x394   : > { %984 = vadd.xlane.f32.xlu1 %v983_v29 }
 0x3a5   : > { %1059 = vrot.lane.b32.xlu1 %v2036_v36, %s1830_s28 }
 0x3a9   : > { %1053 = vrot.lane.b32.xlu1 %v2034_v35, %s1830_s28  ;;  %1061 = vrot.lane.b32.xlu0 %v2032_v32, %s1830_s28 }
 0x3ad   : > { %1055 = vrot.lane.b32.xlu1 %v2048_v41, %s1830_s28 }
 0x418   : > { %v982_v30 = vpop.xlane.xlu0 %981 }
 0x419   : > { %v979_v31 = vpop.xlane.xlu1 %978 }
 0x41a   : > { %1798 = vrcp.f32 %v979_v31 }
 0x41b   : > { %1800 = vrcp.f32 %v982_v30 }
 0x41c   : > { %v976_v33 = vpop.xlane.xlu0 %975 }
 0x41d   : > { %1802 = vrcp.f32 %v976_v33  ;;  %v985_v34 = vpop.xlane.xlu1 %984 }
 0x41e   : > { %1804 = vrcp.f32 %v985_v34 }
 0x420   : > { %v1062_v37 = vpop.permute.xlu0 %1061 }
 0x421   : > { %1729 = vmatprep.subr.msk.bf16.mxu1 %vm873_vm0, %v1062_v37  ;;  %v1060_v39 = vpop.permute.xlu1 %1059  ;;  %v1073_v46 = vsel %vm873_vm0, %v1062_v37, 0 }
 0x422   : > { %v1070_v48 = vsel %vm873_vm0, %v1060_v39, 0 }
 0x425   : > { %v1054_v47 = vpop.permute.xlu1 %1053 }
 0x427   : > { %v1799_v36 = vpop.eup %1798 }
 0x428   : > { %v1801_v38 = vpop.eup %1800  ;;  %v991_v42 = vmul.f32 %v1799_v36, %v1793_v23 }
 0x429   : > { %v992_v43 = vmul.f32 %v1801_v38, %v1791_v22  ;;  %v1056_v49 = vpop.permute.xlu1 %1055 }
 0x42a   : > { %v1803_v35 = vpop.eup %1802 }
 0x42b   : > { %v1805_v40 = vpop.eup %1804  ;;  %v990_v32 = vmul.f32 %v1803_v35, %v1795_v25 }
 0x42c   : > { %v993_v41 = vmul.f32 %v1805_v40, %v1797_v27 }
 0x42d   : > { %v994_v44 = vpack.c.bf16 %v991_v42, %v990_v32 }
 0x42e   : > { %v995_v45 = vpack.c.bf16 %v993_v41, %v992_v43 }
 0x42f   : > { %1687 = vmatprep.mubr.msk.bf16.mxu1 %vm949_vm1, %v994_v44 }
 0x430   : > { %1688 = vmatmul.mubr.msk.bf16.vlgmr.msra.gmra.mxu1 %vm949_vm1, %v995_v45 }
 0x431   : > { %1692 = vmatpush3.bf16.xpose.msra.mxu1 %v1073_v46  ;;  %1695 = vmatprep.mubr.msk.bf16.mxu1 %vm873_vm0, %v1054_v47  ;;  %v1774_v46 = vld [vmem:[%s2182_s10 + $0x38] sm:$0xff]   ;;  %v1775_v47 = vld [vmem:[%s2182_s10 + $0x30] sm:$0xff]  }
 0x432   : > { %1730 = vmatprep.subr.msk.bf16.mxu1 %vm873_vm0, %v1060_v39  ;;  %1707 = vmatprep.subr.bf16.mxu0 %v1774_v46 }
 0x433   : > { %1708 = vmatpush3.bf16.msra.mxu0 %v1774_v46 }
 0x434   : > { %1709 = vmatprep.subr.bf16.mxu0 %v1775_v47 }
 0x437   : > { %1710 = vmatpush3.bf16.msra.mxu0 %v1775_v47 }
 0x439   : > { %1694 = vmatpush3.bf16.xpose.msra.mxu1 %v1070_v48  ;;  %v1776_v48 = vld [vmem:[%s2182_s10 + $0x28] sm:$0xff]  }
 0x43a   : > { %1711 = vmatprep.subr.bf16.mxu0 %v1776_v48 }
 0x43b   : > { %1712 = vmatpush3.bf16.msra.mxu0 %v1776_v48 }
 0x440   : > { %1696 = vmatmul.mubr.msk.bf16.vlgmr.msra.gmra.mxu1 %vm873_vm0, %v1056_v49  ;;  %v1777_v49 = vld [vmem:[%s2182_s10 + $0x20] sm:$0xff]  }
 0x441   : > { %1713 = vmatprep.subr.bf16.mxu0 %v1777_v49 }
 0x442   : > { %1714 = vmatpush3.bf16.msra.mxu0 %v1777_v49 }
 0x4f0   : > { %v2097_v51 = vpop.f32.mrf.mxu1 }
 0x4f2   : > { %v2099_v53 = vpop.f32.mrf.mxu1 }
 0x4f4   : > { %v2101_v54 = vpop.f32.mrf.mxu1 }
 0x4f6   : > { %v2103_v55 = vpop.f32.mrf.mxu1 }
 0x500   : > { %v1697_v56 = vpop.f32.mrf.mxu1 }
 0x501   : > { %v1126_v59 = vmul.f32 0.125, %v1697_v56  ;;  %v1778_v56 = vld [vmem:[%s2182_s10 + $0x18] sm:$0xff]  }
 0x502   : > { %v1109_v58 = vpop.f32.mrf.mxu1  ;;  %1715 = vmatprep.subr.bf16.mxu0 %v1778_v56 }
 0x503   : > { %v1124_v60 = vmul.f32 0.125, %v1109_v58  ;;  %v1130_v7 = vadd.f32 %v2067_v57, %v1126_v59  ;;  %v1779_v58 = vld [vmem:[%s2182_s10 + $0x10] sm:$0xff]   ;;  %1716 = vmatpush3.bf16.msra.mxu0 %v1778_v56  ;;  %v1780_v59 = vld [vmem:[%s2182_s10 + $0x8] sm:$0xff]  }
 0x504   : > { %v1698_v61 = vpop.f32.mrf.mxu1  ;;  %1717 = vmatprep.subr.bf16.mxu0 %v1779_v58 }
 0x505   : > { %v1128_v62 = vadd.f32 %v2067_v57, %v1124_v60  ;;  %v1127_v0 = vmul.f32 0.125, %v1698_v61  ;;  %v1138_v9 = vsel %vm949_vm1, %v1130_v7, -inf  ;;  %v1781_v61 = vld [vmem:[%s2182_s10] sm:$0xff]  }
 0x506   : > { %v1112_v63 = vpop.f32.mrf.mxu1 }
 0x507   : > { %v1125_v1 = vmul.f32 0.125, %v1112_v63  ;;  %v1132_v6 = vsel %vm949_vm1, %v1128_v62, -inf  ;;  %v1131_v12 = vadd.f32 %v2067_v57, %v1127_v0  ;;  %1718 = vmatpush3.bf16.msra.mxu0 %v1779_v58 }
 0x508   : > { %1133 = vmax.xlane.f32.xlu0 %v1132_v6  ;;  %1719 = vmatprep.subr.bf16.mxu0 %v1780_v59 }
 0x509   : > { %v1129_v8 = vadd.f32 %v2067_v57, %v1125_v1  ;;  %v1141_v11 = vsel %vm949_vm1, %v1131_v12, -inf }
 0x50b   : > { %v1135_v10 = vsel %vm949_vm1, %v1129_v8, -inf  ;;  %1720 = vmatpush3.bf16.msra.mxu0 %v1780_v59 }
 0x50c   : > { %1139 = vmax.xlane.f32.xlu0 %v1138_v9  ;;  %1136 = vmax.xlane.f32.xlu1 %v1135_v10 }
 0x50d   : > { %1721 = vmatprep.subr.bf16.mxu0 %v1781_v61 }
 0x50f   : > { %1722 = vmatpush3.bf16.msra.mxu0 %v1781_v61 }
 0x510   : > { %1142 = vmax.xlane.f32.xlu0 %v1141_v11 }
 0x591   : > { %v1134_v13 = vpop.xlane.xlu0 %1133 }
 0x592   : > { %v1144_v14 = vsub.f32 %v1128_v62, %v1134_v13 }
 0x594   : > { %v1148_v18 = vmul.f32 1.442695, %v1144_v14 }
 0x595   : > { %v1140_v15 = vpop.xlane.xlu0 %1139  ;;  %v1137_v16 = vpop.xlane.xlu1 %1136 }
 0x596   : > { %v1146_v17 = vsub.f32 %v1130_v7, %v1140_v15  ;;  %v1145_v20 = vsub.f32 %v1129_v8, %v1137_v16 }
 0x598   : > { %v1152_v19 = vmul.f32 1.442695, %v1146_v17  ;;  %v1150_v23 = vmul.f32 1.442695, %v1145_v20 }
 0x599   : > { %v1143_v21 = vpop.xlane.xlu0 %1142 }
 0x59a   : > { %1806 = vpow2.f32 %v1152_v19  ;;  %v1147_v22 = vsub.f32 %v1131_v12, %v1143_v21 }
 0x59b   : > { %1808 = vpow2.f32 %v1148_v18 }
 0x59c   : > { %v1154_v24 = vmul.f32 1.442695, %v1147_v22 }
 0x59e   : > { %1810 = vpow2.f32 %v1154_v24 }
 0x59f   : > { %1812 = vpow2.f32 %v1150_v23 }
 0x5a7   : > { %v1807_v57 = vpop.eup %1806 }
 0x5a8   : > { %v1162_v25 = vsel %vm949_vm1, %v1807_v57, 0.0  ;;  %v1809_v26 = vpop.eup %1808 }
 0x5a9   : > { %1163 = vadd.xlane.f32.xlu0 %v1162_v25  ;;  %v1156_v28 = vsel %vm949_vm1, %v1809_v26, 0.0 }
 0x5ab   : > { %v1811_v27 = vpop.eup %1810 }
 0x5ac   : > { %v1165_v29 = vsel %vm949_vm1, %v1811_v27, 0.0  ;;  %v1813_v30 = vpop.eup %1812 }
 0x5ad   : > { %1157 = vadd.xlane.f32.xlu0 %v1156_v28  ;;  %1166 = vadd.xlane.f32.xlu1 %v1165_v29  ;;  %v1159_v31 = vsel %vm949_vm1, %v1813_v30, 0.0 }
 0x5b1   : > { %1160 = vadd.xlane.f32.xlu1 %v1159_v31 }
 0x5c2   : > { %1180 = vrot.lane.b32.xlu1 %v2057_v52, %s1830_s28 }
 0x5c3   : > { %1182 = vrot.lane.b32.xlu0 %v2055_v50, %s1830_s28 }
 0x632   : > { %v1164_v33 = vpop.xlane.xlu0 %1163 }
 0x636   : > { %v1158_v34 = vpop.xlane.xlu0 %1157  ;;  %v1167_v37 = vpop.xlane.xlu1 %1166 }
 0x637   : > { %1814 = vrcp.f32 %v1167_v37 }
 0x638   : > { %1816 = vrcp.f32 %v1158_v34 }
 0x639   : > { %1818 = vrcp.f32 %v1164_v33 }
 0x63a   : > { %v1183_v36 = vpop.permute.xlu0 %1182  ;;  %v1161_v38 = vpop.xlane.xlu1 %1160 }
 0x63b   : > { %1820 = vrcp.f32 %v1161_v38  ;;  %1699 = vmatprep.subr.bf16.mxu1 %v1183_v36 }
 0x63c   : > { %1700 = vmatpush3.bf16.msra.mxu1 %v1183_v36 }
 0x63e   : > { %v1181_v35 = vpop.permute.xlu1 %1180 }
 0x63f   : > { %1701 = vmatprep.subr.bf16.mxu1 %v1181_v35 }
 0x640   : > { %1702 = vmatpush3.bf16.msra.mxu1 %v1181_v35 }
 0x644   : > { %v1815_v39 = vpop.eup %1814 }
 0x645   : > { %v1817_v40 = vpop.eup %1816  ;;  %v1175_v42 = vmul.f32 %v1815_v39, %v1811_v27 }
 0x646   : > { %v1819_v52 = vpop.eup %1818  ;;  %v1172_v50 = vmul.f32 %v1817_v40, %v1809_v26 }
 0x647   : > { %v1174_v41 = vmul.f32 %v1819_v52, %v1807_v57 }
 0x648   : > { %v1821_v32 = vpop.eup %1820 }
 0x649   : > { %v1173_v43 = vmul.f32 %v1821_v32, %v1813_v30  ;;  %v1177_v45 = vpack.c.bf16 %v1175_v42, %v1174_v41 }
 0x64b   : > { %v1176_v44 = vpack.c.bf16 %v1173_v43, %v1172_v50 }
 0x64d   : > { %1703 = vmatprep.mubr.msk.bf16.mxu1 %vm949_vm1, %v1176_v44 }
 0x64e   : > { %1704 = vmatmul.mubr.msk.bf16.vlgmr.msra.gmra.mxu1 %vm949_vm1, %v1177_v45 }
 0x70e   : > { %v1705_v60 = vpop.f32.mrf.mxu1 }
 0x710   : > { %v1226_v62 = vpop.f32.mrf.mxu1 }
 0x712   : > { %v1706_v63 = vpop.f32.mrf.mxu1 }
 0x713   : > { %v1745_v6 = vpack.i.bf16 %v1706_v63, %v1705_v60 }
 0x714   : > { %v1229_v0 = vpop.f32.mrf.mxu1 }
 0x715   : > { %v1740_v1 = vpack.i.bf16 %v1229_v0, %v1226_v62 }
 0x717   : > { %1741 = vrot.lane.b32.xlu1 %v1740_v1, %s1830_s28 }
 0x71b   : > { %1746 = vrot.lane.b32.xlu1 %v1745_v6, %s1830_s28 }
 0x789   : > { %v1742_v7 = vpop.permute.xlu1 %1741 }
 0x78a   : > { %v1744_v8 = vunpack.i.h.bf16 %v1742_v7  ;;  %v1743_v9 = vunpack.i.l.bf16 %v1742_v7 }
 0x78c   : > { %v1257_v10 = vsel %vm873_vm0, %v2099_v53, %v1743_v9  ;;  %v1258_v12 = vsel %vm873_vm0, %v2103_v55, %v1744_v8  ;;  %v1518_v53 = vld [vmem:[%s2183_s11] ss:$0 sm:$0xff] }
 0x78d   : > { %v1747_v11 = vpop.permute.xlu1 %1746  ;;  %v1261_v13 = vpack.c.bf16 %v1258_v12, %v1257_v10 }
 0x78e   : > { %v1749_v14 = vunpack.i.h.bf16 %v1747_v11  ;;  %v1748_v15 = vunpack.i.l.bf16 %v1747_v11 }
 0x78f   : > { %1723 = vmatprep.mubr.bf16.mxu0 %v1261_v13 }
 0x790   : > { %v1260_v16 = vsel %vm873_vm0, %v2101_v54, %v1749_v14  ;;  %v1259_v17 = vsel %vm873_vm0, %v2097_v51, %v1748_v15 }
 0x791   : > { %v1262_v18 = vpack.c.bf16 %v1260_v16, %v1259_v17 }
 0x793   : > { %1724 = vmatmul.mubr.bf16.vlgmr.msra.gmra.mxu0 %v1262_v18 }
 0x853   : > { %v1725_v19 = vpop.f32.mrf.mxu0 }
 0x854   : > { %v1377_v20 = vadd.f32 %v1725_v19, %v1518_v53 }
 0x855   : > { %v1368_v55 = vpop.f32.mrf.mxu0 }
 0x856   : > { %v1369_v22 = vadd.f32 %v1518_v53, %v1368_v55  ;;  %v1385_v57 = vadd.f32 %v1914_v3, %v1377_v20 }
 0x857   : > { %v1726_v21 = vpop.f32.mrf.mxu0 }
 0x858   : > { %v1380_v23 = vadd.f32 %v1726_v21, %v1518_v53  ;;  %v1383_v51 = vadd.f32 %v1912_v2, %v1369_v22 }
 0x859   : > { %v1371_v24 = vpop.f32.mrf.mxu0 }
 0x85a   : > { %v1386_v54 = vadd.f32 %v1920_v5, %v1380_v23  ;;  %v1372_v25 = vadd.f32 %v1518_v53, %v1371_v24 }
 0x85c   : > { %v1555_v26 = vpack.c.bf16 %v1386_v54, %v1385_v57  ;;  %v1384_v27 = vadd.f32 %v1918_v4, %v1372_v25 }
 0x85e   : > { %1558 = vst [vmem:[%s427_s16 + $0x8] sm:$0xff] %v1555_v26   ;;  %v1550_v28 = vpack.c.bf16 %v1384_v27, %v1383_v51 }
 0x860   : > { %1551 = vst [vmem:[%s427_s16] sm:$0xff] %v1550_v28  }
 0x861 PF: > { %s22_s21 = sadd.s32 1, %s1828_s21  }
 0x862   : > { %p19_p4 = scmp.ge.s32.totalorder %s22_s21, 4  }
 0x864   :  { %21 = sbr.rel (!%p19_p4) target bundleno = 1 (0x1), region = 101 }

// kernel: conformer_encoder_forward.11
= control target key start
LH: loop header
LB: loop body
LE: loop exit
PB: predicated region body
PF: predicated region fallthrough
CT: control target
= control target key end

     0   :  { %s2398_s0 = inlined_call_operand.vmem [shape: bf16[64,128], index: 0, kind: input, shape index: {}]   ;;  %s2399_s3 = inlined_call_operand.vmem [shape: bf16[128,512], index: 3, kind: input, shape index: {}]   ;;  %s2400_s1 = inlined_call_operand.vmem [shape: f32[1,128], index: 1, kind: input, shape index: {}]   ;;  %s2401_s2 = inlined_call_operand.vmem [shape: f32[1,128], index: 2, kind: input, shape index: {}]   ;;  %s2402_s5 = inlined_call_operand.vmem [shape: bf16[512,128], index: 5, kind: input, shape index: {}]   ;;  %s2403_s4 = inlined_call_operand.vmem [shape: f32[1,512], index: 4, kind: input, shape index: {}]   ;;  %s2404_s6 = inlined_call_operand.vmem [shape: f32[1,128], index: 6, kind: input, shape index: {}]   ;;  %s2405_s7 = inlined_call_operand.vmem [shape: f32[1,128], index: 7, kind: input, shape index: {}]   ;;  %s2406_s8 = inlined_call_operand.vmem [shape: f32[1,128], index: 8, kind: input, shape index: {}]   ;;  %s2407_s9 = inlined_call_operand.vmem [shape: bf16[64,128], index: 9, kind: output, shape index: {}]  }
   0x1   :  { %v1461_v0 = vld [vmem:[%s2398_s0] sm:$0xff]   ;;  %v1496_v1 = vld [vmem:[%s2398_s0 + $0x8] sm:$0xff]   ;;  %v1497_v6 = vld [vmem:[%s2398_s0 + $0x10] sm:$0xff]  }
   0x2   :  { %v1880_v2 = vunpack.c.l.bf16 %v1461_v0  ;;  %v1882_v3 = vunpack.c.l.bf16 %v1496_v1  ;;  %v1886_v4 = vunpack.c.h.bf16 %v1461_v0  ;;  %v1888_v5 = vunpack.c.h.bf16 %v1496_v1  ;;  %v1498_v9 = vld [vmem:[%s2398_s0 + $0x18] sm:$0xff]   ;;  %v1583_v12 = vld [vmem:[%s2399_s3 + $0xe4] ss:$16 sps:$4 sm:$0xff]   ;;  %v1587_v14 = vld [vmem:[%s2399_s3 + $0xe0] ss:$16 sps:$4 sm:$0xff]  }
   0x3   :  { %v1895_v7 = vunpack.c.l.bf16 %v1497_v6  ;;  %v1897_v8 = vunpack.c.h.bf16 %v1497_v6  ;;  %v1904_v10 = vunpack.c.l.bf16 %v1498_v9  ;;  %v1906_v11 = vunpack.c.h.bf16 %v1498_v9  ;;  %v1585_v13 = vld [vmem:[%s2399_s3 + $0xec] ss:$16 sps:$4 sm:$0xff]   ;;  %386 = vmatprep.subr.bf16.mxu0 %v1583_v12  ;;  %v1588_v15 = vld [vmem:[%s2399_s3 + $0xe8] ss:$16 sps:$4 sm:$0xff]   ;;  %v1589_v47 = vld [vmem:[%s2399_s3 + $0xc4] ss:$16 sps:$4 sm:$0xff]  }
   0x4   :  { %51 = vadd.xlane.f32.xlu0 %v1880_v2  ;;  %55 = vadd.xlane.f32.xlu1 %v1882_v3  ;;  %v1591_v48 = vld [vmem:[%s2399_s3 + $0xcc] ss:$16 sps:$4 sm:$0xff]   ;;  %v1593_v49 = vld [vmem:[%s2399_s3 + $0xc0] ss:$16 sps:$4 sm:$0xff]   ;;  %v1594_v50 = vld [vmem:[%s2399_s3 + $0xc8] ss:$16 sps:$4 sm:$0xff]  }
   0x5   :  { %2411 = vst [vmem:[#allocation2_spill] sm:$0xff] %v1897_v8  ;;  %2412 = vst [vmem:[#allocation3_spill] sm:$0xff] %v1904_v10  ;;  %459 = vmatprep.subr.bf16.mxu1 %v1585_v13  ;;  %387 = vmatpush1.bf16.msra.mxu0 %v1587_v14  ;;  %v1595_v52 = vld [vmem:[%s2399_s3 + $0xa4] ss:$16 sps:$4 sm:$0xff]   ;;  %v1597_v53 = vld [vmem:[%s2399_s3 + $0xac] ss:$16 sps:$4 sm:$0xff]  }
   0x6   :  { %2413 = vst [vmem:[#allocation4_spill] sm:$0xff] %v1906_v11  ;;  %460 = vmatpush1.bf16.msra.mxu1 %v1588_v15  ;;  %388 = vmatprep.subr.bf16.mxu0 %v1589_v47  ;;  %v1599_v54 = vld [vmem:[%s2399_s3 + $0xa0] ss:$16 sps:$4 sm:$0xff]   ;;  %v1600_v55 = vld [vmem:[%s2399_s3 + $0xa8] ss:$16 sps:$4 sm:$0xff]  }
   0x7   :  { %461 = vmatprep.subr.bf16.mxu1 %v1591_v48  ;;  %v1601_v56 = vld [vmem:[%s2399_s3 + $0x84] ss:$16 sps:$4 sm:$0xff]   ;;  %v1603_v57 = vld [vmem:[%s2399_s3 + $0x8c] ss:$16 sps:$4 sm:$0xff]   ;;  %v1605_v58 = vld [vmem:[%s2399_s3 + $0x80] ss:$16 sps:$4 sm:$0xff]  }
   0x8   :  { %53 = vadd.xlane.f32.xlu0 %v1886_v4  ;;  %57 = vadd.xlane.f32.xlu1 %v1888_v5  ;;  %v1606_v59 = vld [vmem:[%s2399_s3 + $0x88] ss:$16 sps:$4 sm:$0xff]   ;;  %v1607_v60 = vld [vmem:[%s2399_s3 + $0x64] ss:$16 sps:$4 sm:$0xff]   ;;  %v1609_v61 = vld [vmem:[%s2399_s3 + $0x6c] ss:$16 sps:$4 sm:$0xff]  }
   0x9   :  { %389 = vmatpush1.bf16.msra.mxu0 %v1593_v49  ;;  %v1611_v62 = vld [vmem:[%s2399_s3 + $0x60] ss:$16 sps:$4 sm:$0xff]   ;;  %v1612_v63 = vld [vmem:[%s2399_s3 + $0x68] ss:$16 sps:$4 sm:$0xff]   ;;  %v1613_v0 = vld [vmem:[%s2399_s3 + $0x44] ss:$16 sps:$4 sm:$0xff]  }
   0xa   :  { %462 = vmatpush1.bf16.msra.mxu1 %v1594_v50  ;;  %390 = vmatprep.subr.bf16.mxu0 %v1595_v52  ;;  %v1615_v1 = vld [vmem:[%s2399_s3 + $0x4c] ss:$16 sps:$4 sm:$0xff]   ;;  %v1617_v6 = vld [vmem:[%s2399_s3 + $0x40] ss:$16 sps:$4 sm:$0xff]   ;;  %v1618_v9 = vld [vmem:[%s2399_s3 + $0x48] ss:$16 sps:$4 sm:$0xff]  }
   0xb   :  { %463 = vmatprep.subr.bf16.mxu1 %v1597_v53  ;;  %v1619_v12 = vld [vmem:[%s2399_s3 + $0x24] ss:$16 sps:$4 sm:$0xff]   ;;  %v1621_v13 = vld [vmem:[%s2399_s3 + $0x2c] ss:$16 sps:$4 sm:$0xff]   ;;  %v1623_v14 = vld [vmem:[%s2399_s3 + $0x20] ss:$16 sps:$4 sm:$0xff]  }
   0xc   :  { %59 = vadd.xlane.f32.xlu0 %v1895_v7  ;;  %61 = vadd.xlane.f32.xlu1 %v1897_v8  ;;  %v1624_v15 = vld [vmem:[%s2399_s3 + $0x28] ss:$16 sps:$4 sm:$0xff]   ;;  %v1343_v53 = vld [vmem:[%s2400_s1] ss:$0 sm:$0xff] }
   0xd   :  { %391 = vmatpush1.bf16.msra.mxu0 %v1599_v54 }
   0xe   :  { %464 = vmatpush1.bf16.msra.mxu1 %v1600_v55  ;;  %392 = vmatprep.subr.bf16.mxu0 %v1601_v56 }
   0xf   :  { %465 = vmatprep.subr.bf16.mxu1 %v1603_v57 }
  0x10   :  { %63 = vadd.xlane.f32.xlu0 %v1904_v10  ;;  %65 = vadd.xlane.f32.xlu1 %v1906_v11 }
  0x11   :  { %393 = vmatpush1.bf16.msra.mxu0 %v1605_v58 }
  0x12   :  { %466 = vmatpush1.bf16.msra.mxu1 %v1606_v59  ;;  %394 = vmatprep.subr.bf16.mxu0 %v1607_v60  ;;  %v1344_v60 = vld [vmem:[%s2401_s2] ss:$0 sm:$0xff] }
  0x13   :  { %467 = vmatprep.subr.bf16.mxu1 %v1609_v61 }
  0x15   :  { %395 = vmatpush1.bf16.msra.mxu0 %v1611_v62 }
  0x16   :  { %468 = vmatpush1.bf16.msra.mxu1 %v1612_v63  ;;  %396 = vmatprep.subr.bf16.mxu0 %v1613_v0 }
  0x17   :  { %469 = vmatprep.subr.bf16.mxu1 %v1615_v1 }
  0x19   :  { %397 = vmatpush1.bf16.msra.mxu0 %v1617_v6 }
  0x1a   :  { %470 = vmatpush1.bf16.msra.mxu1 %v1618_v9  ;;  %398 = vmatprep.subr.bf16.mxu0 %v1619_v12 }
  0x1b   :  { %471 = vmatprep.subr.bf16.mxu1 %v1621_v13 }
  0x1d   :  { %399 = vmatpush1.bf16.msra.mxu0 %v1623_v14 }
  0x1e   :  { %472 = vmatpush1.bf16.msra.mxu1 %v1624_v15 }
  0x8d   :  { %v52_v16 = vpop.xlane.xlu0 %51  ;;  %v56_v17 = vpop.xlane.xlu1 %55 }
  0x8e   :  { %v68_v18 = vmul.f32 0.0078125, %v52_v16  ;;  %v70_v19 = vmul.f32 0.0078125, %v56_v17  ;;  %v1625_v16 = vld [vmem:[%s2399_s3 + $0x4] ss:$16 sps:$4 sm:$0xff]   ;;  %v1627_v17 = vld [vmem:[%s2399_s3 + $0xc] ss:$16 sps:$4 sm:$0xff]  }
  0x8f   :  { %400 = vmatprep.subr.bf16.mxu0 %v1625_v16  ;;  %473 = vmatprep.subr.bf16.mxu1 %v1627_v17 }
  0x90   :  { %v1923_v20 = vsub.f32 %v1880_v2, %v68_v18  ;;  %v1926_v21 = vsub.f32 %v1882_v3, %v70_v19  ;;  %v1823_v18 = vmov 0   ;;  %v1629_v19 = vld [vmem:[%s2399_s3] ss:$16 sps:$4 sm:$0xff]  }
  0x91   :  { %v54_v22 = vpop.xlane.xlu0 %53  ;;  %v58_v23 = vpop.xlane.xlu1 %57  ;;  %418 = vmatprep.mubr.bf16.mxu0 %v1823_v18  ;;  %491 = vmatprep.mubr.bf16.mxu1 %v1823_v18 }
  0x92   :  { %v69_v24 = vmul.f32 0.0078125, %v54_v22  ;;  %v84_v25 = vmul.f32 %v1923_v20, %v1923_v20  ;;  %v71_v26 = vmul.f32 0.0078125, %v58_v23  ;;  %v86_v29 = vmul.f32 %v1926_v21, %v1926_v21  ;;  %v1630_v22 = vld [vmem:[%s2399_s3 + $0x8] ss:$16 sps:$4 sm:$0xff]   ;;  %401 = vmatpush1.bf16.msra.mxu0 %v1629_v19 }
  0x93   :  { %474 = vmatpush1.bf16.msra.mxu1 %v1630_v22 }
  0x94   :  { %v1931_v27 = vsub.f32 %v1886_v4, %v69_v24  ;;  %92 = vadd.xlane.f32.xlu0 %v84_v25  ;;  %v1934_v28 = vsub.f32 %v1888_v5, %v71_v26 }
  0x95   :  { %v60_v30 = vpop.xlane.xlu0 %59  ;;  %v62_v31 = vpop.xlane.xlu1 %61 }
  0x96   :  { %v72_v32 = vmul.f32 0.0078125, %v60_v30  ;;  %v85_v33 = vmul.f32 %v1931_v27, %v1931_v27  ;;  %v73_v34 = vmul.f32 0.0078125, %v62_v31  ;;  %v87_v37 = vmul.f32 %v1934_v28, %v1934_v28 }
  0x98   :  { %v1941_v35 = vsub.f32 %v1895_v7, %v72_v32  ;;  %96 = vadd.xlane.f32.xlu0 %v86_v29  ;;  %94 = vadd.xlane.f32.xlu1 %v85_v33  ;;  %v1944_v36 = vsub.f32 %v1897_v8, %v73_v34 }
  0x99   :  { %v64_v38 = vpop.xlane.xlu0 %63  ;;  %v66_v39 = vpop.xlane.xlu1 %65 }
  0x9a   :  { %v74_v40 = vmul.f32 0.0078125, %v64_v38  ;;  %v88_v41 = vmul.f32 %v1941_v35, %v1941_v35  ;;  %v75_v42 = vmul.f32 0.0078125, %v66_v39  ;;  %v89_v45 = vmul.f32 %v1944_v36, %v1944_v36 }
  0x9c   :  { %v1951_v43 = vsub.f32 %v1904_v10, %v74_v40  ;;  %98 = vadd.xlane.f32.xlu1 %v87_v37  ;;  %100 = vadd.xlane.f32.xlu0 %v88_v41  ;;  %v1954_v44 = vsub.f32 %v1906_v11, %v75_v42 }
  0x9e   :  { %v90_v46 = vmul.f32 %v1951_v43, %v1951_v43  ;;  %v91_v51 = vmul.f32 %v1954_v44, %v1954_v44 }
  0xa0   :  { %102 = vadd.xlane.f32.xlu1 %v89_v45  ;;  %104 = vadd.xlane.f32.xlu0 %v90_v46 }
  0xa4   :  { %106 = vadd.xlane.f32.xlu1 %v91_v51 }
 0x11d   :  { %v93_v23 = vpop.xlane.xlu0 %92 }
 0x11e   :  { %v108_v24 = vmul.f32 0.0078125, %v93_v23 }
 0x120   :  { %v116_v25 = vadd.f32 1e-05, %v108_v24 }
 0x121   :  { %v95_v26 = vpop.xlane.xlu1 %94  ;;  %v97_v29 = vpop.xlane.xlu0 %96 }
 0x122   :  { %1663 = vrsqrt.f32 %v116_v25  ;;  %v109_v30 = vmul.f32 0.0078125, %v95_v26  ;;  %v110_v31 = vmul.f32 0.0078125, %v97_v29 }
 0x124   :  { %v117_v32 = vadd.f32 1e-05, %v109_v30  ;;  %v118_v33 = vadd.f32 1e-05, %v110_v31 }
 0x125   :  { %v99_v34 = vpop.xlane.xlu1 %98  ;;  %v101_v37 = vpop.xlane.xlu0 %100 }
 0x126   :  { %1665 = vrsqrt.f32 %v117_v32  ;;  %v111_v38 = vmul.f32 0.0078125, %v99_v34  ;;  %v112_v40 = vmul.f32 0.0078125, %v101_v37  ;;  %v1633_v34 = vld [vmem:[%s2402_s5 + $0xf8] sm:$0xff]   ;;  %v1635_v37 = vld [vmem:[%s2402_s5 + $0x70] sm:$0xff]  }
 0x127   :  { %1667 = vrsqrt.f32 %v118_v33  ;;  %1542 = vmatprep.subr.bf16.mxu1 %v1633_v34 }
 0x128   :  { %v119_v39 = vadd.f32 1e-05, %v111_v38  ;;  %v120_v45 = vadd.f32 1e-05, %v112_v40  ;;  %v1637_v38 = vld [vmem:[%s2402_s5 + $0xf0] sm:$0xff]  }
 0x129   :  { %v103_v41 = vpop.xlane.xlu1 %102  ;;  %v105_v47 = vpop.xlane.xlu0 %104  ;;  %v1638_v40 = vld [vmem:[%s2402_s5 + $0xb0] sm:$0xff]  }
 0x12a   :  { %1669 = vrsqrt.f32 %v119_v39  ;;  %v113_v42 = vmul.f32 0.0078125, %v103_v41  ;;  %v114_v51 = vmul.f32 0.0078125, %v105_v47  ;;  %v1636_v39 = vld [vmem:[%s2402_s5 + $0x30] sm:$0xff]   ;;  %v1639_v41 = vld [vmem:[%s2402_s5 + $0x68] sm:$0xff]   ;;  %v1643_v47 = vld [vmem:[%s2402_s5 + $0x60] sm:$0xff]  }
 0x12c   :  { %v121_v46 = vadd.f32 1e-05, %v113_v42  ;;  %v122_v56 = vadd.f32 1e-05, %v114_v51  ;;  %v1641_v42 = vld [vmem:[%s2402_s5 + $0xe8] sm:$0xff]   ;;  %v1647_v51 = vld [vmem:[%s2402_s5 + $0x58] sm:$0xff]  }
 0x12d   :  { %v107_v48 = vpop.xlane.xlu1 %106 }
 0x12e   :  { %1671 = vrsqrt.f32 %v121_v46  ;;  %v115_v49 = vmul.f32 0.0078125, %v107_v48  ;;  %v1642_v46 = vld [vmem:[%s2402_s5 + $0xa8] sm:$0xff]   ;;  %v1645_v48 = vld [vmem:[%s2402_s5 + $0xe0] sm:$0xff]  }
 0x12f   :  { %v1664_v50 = vpop.eup %1663  ;;  %1673 = vrsqrt.f32 %v120_v45  ;;  %v1640_v45 = vld [vmem:[%s2402_s5 + $0x28] sm:$0xff]  }
 0x130   :  { %v132_v52 = vmul.f32 %v1664_v50, %v1923_v20  ;;  %v123_v54 = vadd.f32 1e-05, %v115_v49  ;;  %v1644_v49 = vld [vmem:[%s2402_s5 + $0x20] sm:$0xff]  }
 0x131   :  { %v1646_v50 = vld [vmem:[%s2402_s5 + $0xa0] sm:$0xff]  }
 0x132   :  { %v146_v58 = vmul.f32 %v1343_v53, %v132_v52  ;;  %1675 = vrsqrt.f32 %v123_v54  ;;  %v1649_v52 = vld [vmem:[%s2402_s5 + $0xd8] sm:$0xff]  }
 0x133   :  { %v1666_v55 = vpop.eup %1665  ;;  %1677 = vrsqrt.f32 %v122_v56  ;;  %v1650_v54 = vld [vmem:[%s2402_s5 + $0x98] sm:$0xff]   ;;  %v1653_v56 = vld [vmem:[%s2402_s5 + $0xd0] sm:$0xff]  }
 0x134   :  { %v133_v57 = vmul.f32 %v1666_v55, %v1931_v27  ;;  %v1668_v59 = vpop.eup %1667  ;;  %v160_v20 = vadd.f32 %v1344_v60, %v146_v58  ;;  %v1651_v55 = vld [vmem:[%s2402_s5 + $0x50] sm:$0xff]  }
 0x135   :  { %v134_v0 = vmul.f32 %v1668_v59, %v1926_v21  ;;  %v1654_v58 = vld [vmem:[%s2402_s5 + $0x90] sm:$0xff]   ;;  %v1655_v59 = vld [vmem:[%s2402_s5 + $0x48] sm:$0xff]  }
 0x136   :  { %v147_v61 = vmul.f32 %v1343_v53, %v133_v57  ;;  %v1652_v57 = vld [vmem:[%s2402_s5 + $0x10] sm:$0xff]  }
 0x137   :  { %v1670_v62 = vpop.eup %1669  ;;  %v148_v27 = vmul.f32 %v1343_v53, %v134_v0  ;;  %v1660_v0 = vld [vmem:[%s2402_s5] sm:$0xff]  }
 0x138   :  { %v161_v63 = vadd.f32 %v1344_v60, %v147_v61  ;;  %v135_v1 = vmul.f32 %v1670_v62, %v1934_v28  ;;  %v1656_v61 = vld [vmem:[%s2402_s5 + $0x8] sm:$0xff]  }
 0x139   :  { %v162_v16 = vadd.f32 %v1344_v60, %v148_v27  ;;  %v1658_v62 = vld [vmem:[%s2402_s5 + $0x88] sm:$0xff]  }
 0x13a   :  { %v168_v6 = vpack.c.bf16 %v161_v63, %v160_v20  ;;  %v149_v9 = vmul.f32 %v1343_v53, %v135_v1  ;;  %v1659_v20 = vld [vmem:[%s2402_s5 + $0x40] sm:$0xff]  }
 0x13b   :  { %v1672_v12 = vpop.eup %1671  ;;  %v1661_v63 = vld [vmem:[%s2402_s5 + $0xc0] sm:$0xff]  }
 0x13c   :  { %419 = vmatmul.mubr.bf16.vlgmr.msra.gmra.mxu0 %v168_v6  ;;  %492 = vmatmul.mubr.bf16.vlgmr.msra.gmra.mxu1 %v168_v6  ;;  %v1674_v13 = vpop.eup %1673  ;;  %v163_v14 = vadd.f32 %v1344_v60, %v149_v9  ;;  %v137_v15 = vmul.f32 %v1672_v12, %v1944_v36  ;;  %v1662_v1 = vld [vmem:[%s2402_s5 + $0x80] sm:$0xff]   ;;  %v206_v6 = vlaneseq }
 0x13d   :  { %428 = vmatprep.mubr.bf16.mxu0 %v1823_v18  ;;  %501 = vmatprep.mubr.bf16.mxu1 %v1823_v18  ;;  %v136_v17 = vmul.f32 %v1674_v13, %v1941_v35  ;;  %v204_v13 = vld [vmem:[%s2403_s4] sm:$0xf] }
 0x13e   :  { %v169_v21 = vpack.c.bf16 %v163_v14, %v162_v16  ;;  %v151_v19 = vmul.f32 %v1343_v53, %v137_v15  ;;  %v207_v9 = vshrl.u32 %v206_v6, 7 }
 0x13f   :  { %v1676_v28 = vpop.eup %1675  ;;  %v150_v23 = vmul.f32 %v1343_v53, %v136_v17 }
 0x140   :  { %v1678_v22 = vpop.eup %1677  ;;  %v165_v24 = vadd.f32 %v1344_v60, %v151_v19  ;;  %v139_v25 = vmul.f32 %v1676_v28, %v1954_v44  ;;  %v1631_v44 = vld [vmem:[%s2402_s5 + $0x78] sm:$0xff]   ;;  %v208_v12 = vsub.s32 0, %v207_v9  ;;  %v216_v27 = vsub.s32 2, %v207_v9 }
 0x141   :  { %v164_v26 = vadd.f32 %v1344_v60, %v150_v23  ;;  %v138_v36 = vmul.f32 %v1678_v22, %v1951_v43  ;;  %v1632_v43 = vld [vmem:[%s2402_s5 + $0x38] sm:$0xff]   ;;  %1502 = vmatprep.subr.bf16.mxu0 %v1631_v44  ;;  %v212_v14 = vsub.s32 1, %v207_v9  ;;  %v220_v15 = vsub.s32 3, %v207_v9 }
 0x142   :  { %v153_v30 = vmul.f32 %v1343_v53, %v139_v25  ;;  %1503 = vmatpush3.bf16.msra.mxu0 %v1632_v43  ;;  %v2167_v16 = vrot.slane %v204_v13, %v208_v12  ;;  %v2169_v17 = vrot.slane %v204_v13, %v216_v27 }
 0x143   :  { %v170_v29 = vpack.c.bf16 %v165_v24, %v164_v26  ;;  %v152_v35 = vmul.f32 %v1343_v53, %v138_v36  ;;  %1504 = vmatprep.subr.bf16.mxu0 %v1635_v37  ;;  %v1648_v53 = vld [vmem:[%s2402_s5 + $0x18] sm:$0xff]   ;;  %v2173_v19 = vrot.slane %v204_v13, %v220_v15 }
 0x144   :  { %429 = vmatmul.mubr.bf16.gmra.mxu0 %v169_v21  ;;  %502 = vmatmul.mubr.bf16.gmra.mxu1 %v169_v21  ;;  %v167_v31 = vadd.f32 %v1344_v60, %v153_v30  ;;  %v2171_v21 = vrot.slane %v204_v13, %v212_v14 }
 0x145   :  { %438 = vmatprep.mubr.bf16.mxu0 %v1823_v18  ;;  %511 = vmatprep.mubr.bf16.mxu1 %v1823_v18  ;;  %v166_v32 = vadd.f32 %v1344_v60, %v152_v35  ;;  %v1657_v60 = vld [vmem:[%s2402_s5 + $0xc8] sm:$0xff]  }
 0x146   :  { %1505 = vmatpush3.bf16.msra.mxu0 %v1636_v39 }
 0x147   :  { %v171_v33 = vpack.c.bf16 %v167_v31, %v166_v32  ;;  %1506 = vmatprep.subr.bf16.mxu0 %v1639_v41 }
 0x14a   :  { %1507 = vmatpush3.bf16.msra.mxu0 %v1640_v45 }
 0x14b   :  { %1508 = vmatprep.subr.bf16.mxu0 %v1643_v47 }
 0x14c   :  { %439 = vmatmul.mubr.bf16.gmra.mxu0 %v170_v29  ;;  %512 = vmatmul.mubr.bf16.gmra.mxu1 %v170_v29 }
 0x14d   :  { %448 = vmatprep.mubr.bf16.mxu0 %v1823_v18  ;;  %521 = vmatprep.mubr.bf16.mxu1 %v1823_v18  ;;  %v1634_v18 = vld [vmem:[%s2402_s5 + $0xb8] sm:$0xff]  }
 0x14e   :  { %1543 = vmatpush3.bf16.msra.mxu1 %v1634_v18  ;;  %1509 = vmatpush3.bf16.msra.mxu0 %v1644_v49 }
 0x14f   :  { %1544 = vmatprep.subr.bf16.mxu1 %v1637_v38  ;;  %1510 = vmatprep.subr.bf16.mxu0 %v1647_v51 }
 0x152   :  { %1545 = vmatpush3.bf16.msra.mxu1 %v1638_v40  ;;  %1511 = vmatpush3.bf16.msra.mxu0 %v1648_v53 }
 0x153   :  { %1546 = vmatprep.subr.bf16.mxu1 %v1641_v42  ;;  %1512 = vmatprep.subr.bf16.mxu0 %v1651_v55 }
 0x154   :  { %449 = vmatmul.mubr.bf16.gmra.mxu0 %v171_v33  ;;  %522 = vmatmul.mubr.bf16.gmra.mxu1 %v171_v33 }
 0x156   :  { %1547 = vmatpush3.bf16.msra.mxu1 %v1642_v46  ;;  %1513 = vmatpush3.bf16.msra.mxu0 %v1652_v57 }
 0x157   :  { %1548 = vmatprep.subr.bf16.mxu1 %v1645_v48  ;;  %1514 = vmatprep.subr.bf16.mxu0 %v1655_v59 }
 0x15a   :  { %1549 = vmatpush3.bf16.msra.mxu1 %v1646_v50  ;;  %1515 = vmatpush3.bf16.msra.mxu0 %v1656_v61 }
 0x15b   :  { %1550 = vmatprep.subr.bf16.mxu1 %v1649_v52  ;;  %1516 = vmatprep.subr.bf16.mxu0 %v1659_v20 }
 0x15e   :  { %1551 = vmatpush3.bf16.msra.mxu1 %v1650_v54  ;;  %1517 = vmatpush3.bf16.msra.mxu0 %v1660_v0 }
 0x15f   :  { %1552 = vmatprep.subr.bf16.mxu1 %v1653_v56 }
 0x162   :  { %1553 = vmatpush3.bf16.msra.mxu1 %v1654_v58 }
 0x163   :  { %1554 = vmatprep.subr.bf16.mxu1 %v1657_v60 }
 0x166   :  { %1555 = vmatpush3.bf16.msra.mxu1 %v1658_v62 }
 0x167   :  { %1556 = vmatprep.subr.bf16.mxu1 %v1661_v63 }
 0x16a   :  { %1557 = vmatpush3.bf16.msra.mxu1 %v1662_v1 }
 0x1fc   :  { %v420_v28 = vpop.f32.mrf.mxu0  ;;  %v493_v22 = vpop.f32.mrf.mxu1 }
 0x1fd   :  { %v2176_v23 = vadd.f32 %v420_v28, %v2167_v16  ;;  %v2179_v24 = vadd.f32 %v493_v22, %v2169_v17 }
 0x1fe   :  { %v422_v25 = vpop.f32.mrf.mxu0  ;;  %v495_v26 = vpop.f32.mrf.mxu1 }
 0x1ff   :  { %v1377_v36 = vmul.f32 -1.442695, %v2176_v23  ;;  %v1379_v29 = vmul.f32 -1.442695, %v2179_v24  ;;  %v2184_v30 = vadd.f32 %v422_v25, %v2171_v21  ;;  %v2187_v35 = vadd.f32 %v495_v26, %v2173_v19 }
 0x200   :  { %v424_v31 = vpop.f32.mrf.mxu0  ;;  %v497_v32 = vpop.f32.mrf.mxu1 }
 0x201   :  { %1679 = vpow2.f32 %v1377_v36  ;;  %v1378_v33 = vmul.f32 -1.442695, %v2184_v30  ;;  %v1380_v44 = vmul.f32 -1.442695, %v2187_v35  ;;  %v2192_v43 = vadd.f32 %v424_v31, %v2167_v16 }
 0x202   :  { %1681 = vpow2.f32 %v1379_v29  ;;  %v2195_v34 = vadd.f32 %v497_v32, %v2169_v17  ;;  %v426_v18 = vpop.f32.mrf.mxu0  ;;  %v499_v37 = vpop.f32.mrf.mxu1 }
 0x203   :  { %1683 = vpow2.f32 %v1378_v33  ;;  %v1381_v38 = vmul.f32 -1.442695, %v2192_v43  ;;  %v2199_v39 = vadd.f32 %v426_v18, %v2171_v21  ;;  %v2202_v40 = vadd.f32 %v499_v37, %v2173_v19 }
 0x204   :  { %1685 = vpow2.f32 %v1380_v44  ;;  %v1383_v41 = vmul.f32 -1.442695, %v2195_v34  ;;  %v430_v42 = vpop.f32.mrf.mxu0  ;;  %v503_v45 = vpop.f32.mrf.mxu1 }
 0x205   :  { %1687 = vpow2.f32 %v1381_v38  ;;  %v1382_v46 = vmul.f32 -1.442695, %v2199_v39  ;;  %v1384_v47 = vmul.f32 -1.442695, %v2202_v40  ;;  %v2208_v48 = vadd.f32 %v430_v42, %v2167_v16 }
 0x206   :  { %1689 = vpow2.f32 %v1383_v41  ;;  %v2211_v49 = vadd.f32 %v503_v45, %v2169_v17  ;;  %v432_v50 = vpop.f32.mrf.mxu0  ;;  %v505_v51 = vpop.f32.mrf.mxu1 }
 0x207   :  { %1691 = vpow2.f32 %v1382_v46  ;;  %v1385_v52 = vmul.f32 -1.442695, %v2208_v48  ;;  %v2215_v53 = vadd.f32 %v432_v50, %v2171_v21  ;;  %v2218_v54 = vadd.f32 %v505_v51, %v2173_v19 }
 0x208   :  { %1693 = vpow2.f32 %v1384_v47  ;;  %v1387_v55 = vmul.f32 -1.442695, %v2211_v49  ;;  %v434_v56 = vpop.f32.mrf.mxu0  ;;  %v507_v57 = vpop.f32.mrf.mxu1 }
 0x209   :  { %1695 = vpow2.f32 %v1385_v52  ;;  %v1386_v58 = vmul.f32 -1.442695, %v2215_v53  ;;  %v1388_v59 = vmul.f32 -1.442695, %v2218_v54  ;;  %v2224_v60 = vadd.f32 %v434_v56, %v2167_v16 }
 0x20a   :  { %1697 = vpow2.f32 %v1387_v55  ;;  %v2227_v61 = vadd.f32 %v507_v57, %v2169_v17  ;;  %v436_v62 = vpop.f32.mrf.mxu0  ;;  %v509_v20 = vpop.f32.mrf.mxu1 }
 0x20b   :  { %1699 = vpow2.f32 %v1386_v58  ;;  %v1389_v63 = vmul.f32 -1.442695, %v2224_v60  ;;  %v2231_v0 = vadd.f32 %v436_v62, %v2171_v21  ;;  %v2234_v1 = vadd.f32 %v509_v20, %v2173_v19 }
 0x20c   :  { %1701 = vpow2.f32 %v1388_v59  ;;  %v1391_v6 = vmul.f32 -1.442695, %v2227_v61  ;;  %v440_v9 = vpop.f32.mrf.mxu0  ;;  %v513_v12 = vpop.f32.mrf.mxu1 }
 0x20d   :  { %1703 = vpow2.f32 %v1389_v63  ;;  %v1390_v27 = vmul.f32 -1.442695, %v2231_v0  ;;  %v1392_v13 = vmul.f32 -1.442695, %v2234_v1  ;;  %v2240_v55 = vadd.f32 %v440_v9, %v2167_v16 }
 0x20e   :  { %v1680_v14 = vpop.eup %1679  ;;  %1705 = vpow2.f32 %v1391_v6  ;;  %v442_v15 = vpop.f32.mrf.mxu0  ;;  %v2243_v58 = vadd.f32 %v513_v12, %v2169_v17 }
 0x20f   :  { %v515_v28 = vpop.f32.mrf.mxu1  ;;  %v1682_v22 = vpop.eup %1681  ;;  %v628_v25 = vadd.f32 1.0, %v1680_v14  ;;  %1707 = vpow2.f32 %v1390_v27  ;;  %v1393_v9 = vmul.f32 -1.442695, %v2240_v55  ;;  %v2248_v12 = vadd.f32 %v442_v15, %v2171_v21 }
 0x210   :  { %v1684_v26 = vpop.eup %1683  ;;  %v630_v36 = vadd.f32 1.0, %v1682_v22  ;;  %1709 = vpow2.f32 %v1392_v13  ;;  %v444_v29 = vpop.f32.mrf.mxu0 }
 0x211   :  { %v1686_v31 = vpop.eup %1685  ;;  %1711 = vrcp.f32 %v628_v25  ;;  %v629_v32 = vadd.f32 1.0, %v1684_v26  ;;  %v517_v33 = vpop.f32.mrf.mxu1  ;;  %v1395_v26 = vmul.f32 -1.442695, %v2243_v58 }
 0x212   :  { %v1688_v44 = vpop.eup %1687  ;;  %1713 = vrcp.f32 %v630_v36  ;;  %v631_v18 = vadd.f32 1.0, %v1686_v31  ;;  %v446_v45 = vpop.f32.mrf.mxu0 }
 0x213   :  { %v1690_v37 = vpop.eup %1689  ;;  %1715 = vrcp.f32 %v629_v32  ;;  %v632_v38 = vadd.f32 1.0, %v1688_v44  ;;  %v519_v50 = vpop.f32.mrf.mxu1  ;;  %v2251_v32 = vadd.f32 %v515_v28, %v2173_v19  ;;  %v2254_v44 = vadd.f32 %v444_v29, %v2167_v16 }
 0x214   :  { %v1692_v41 = vpop.eup %1691  ;;  %1717 = vrcp.f32 %v631_v18  ;;  %v634_v42 = vadd.f32 1.0, %v1690_v37  ;;  %v450_v20 = vpop.f32.mrf.mxu0  ;;  %v2263_v28 = vadd.f32 %v519_v50, %v2173_v19 }
 0x215   :  { %v1694_v46 = vpop.eup %1693  ;;  %1719 = vrcp.f32 %v632_v38  ;;  %v633_v47 = vadd.f32 1.0, %v1692_v41  ;;  %v523_v27 = vpop.f32.mrf.mxu1  ;;  %v2257_v41 = vadd.f32 %v517_v33, %v2169_v17  ;;  %v2266_v29 = vadd.f32 %v450_v20, %v2167_v16 }
 0x216   :  { %v1696_v51 = vpop.eup %1695  ;;  %1721 = vrcp.f32 %v634_v42  ;;  %v635_v52 = vadd.f32 1.0, %v1694_v46  ;;  %v452_v18 = vpop.f32.mrf.mxu0  ;;  %v2260_v42 = vadd.f32 %v446_v45, %v2171_v21  ;;  %v2270_v33 = vadd.f32 %v523_v27, %v2169_v17 }
 0x217   :  { %v1698_v56 = vpop.eup %1697  ;;  %1723 = vrcp.f32 %v633_v47  ;;  %v636_v57 = vadd.f32 1.0, %v1696_v51  ;;  %v525_v15 = vpop.f32.mrf.mxu1  ;;  %v2273_v45 = vadd.f32 %v452_v18, %v2171_v21  ;;  %v1397_v20 = vmul.f32 -1.442695, %v2254_v44 }
 0x218   :  { %v1700_v59 = vpop.eup %1699  ;;  %1725 = vrcp.f32 %v635_v52  ;;  %v638_v62 = vadd.f32 1.0, %v1698_v56  ;;  %v1394_v52 = vmul.f32 -1.442695, %v2248_v12  ;;  %v2277_v50 = vadd.f32 %v525_v15, %v2173_v19 }
 0x219   :  { %v1702_v63 = vpop.eup %1701  ;;  %1727 = vrcp.f32 %v636_v57  ;;  %v637_v6 = vadd.f32 1.0, %v1700_v59  ;;  %v1396_v57 = vmul.f32 -1.442695, %v2251_v32  ;;  %v454_v59 = vpop.f32.mrf.mxu0 }
 0x21a   :  { %v1704_v13 = vpop.eup %1703  ;;  %1729 = vrcp.f32 %v638_v62  ;;  %v639_v14 = vadd.f32 1.0, %v1702_v63  ;;  %v1399_v63 = vmul.f32 -1.442695, %v2257_v41 }
 0x21b   :  { %v1706_v22 = vpop.eup %1705  ;;  %1731 = vrcp.f32 %v637_v6  ;;  %v640_v25 = vadd.f32 1.0, %v1704_v13  ;;  %v527_v6 = vpop.f32.mrf.mxu1  ;;  %v1398_v13 = vmul.f32 -1.442695, %v2260_v42 }
 0x21c   :  { %v1708_v36 = vpop.eup %1707  ;;  %1733 = vrcp.f32 %v639_v14  ;;  %v642_v31 = vadd.f32 1.0, %v1706_v22  ;;  %v1400_v14 = vmul.f32 -1.442695, %v2263_v28  ;;  %v1401_v22 = vmul.f32 -1.442695, %v2266_v29  ;;  %v456_v15 = vpop.f32.mrf.mxu0 }
 0x21d   :  { %v1710_v37 = vpop.eup %1709  ;;  %1735 = vrcp.f32 %v640_v25  ;;  %v641_v38 = vadd.f32 1.0, %v1708_v36  ;;  %v1403_v36 = vmul.f32 -1.442695, %v2270_v33 }
 0x21e   :  { %v1712_v46 = vpop.eup %1711  ;;  %1737 = vrcp.f32 %v642_v31  ;;  %v643_v47 = vadd.f32 1.0, %v1710_v37  ;;  %v1402_v31 = vmul.f32 -1.442695, %v2273_v45 }
 0x21f   :  { %v1714_v51 = vpop.eup %1713  ;;  %1739 = vrcp.f32 %v641_v38  ;;  %v2292_v38 = vadd.f32 %v527_v6, %v2169_v17  ;;  %v724_v8 = vmul.f32 %v1712_v46, %v2176_v23 }
 0x220   :  { %v1716_v56 = vpop.eup %1715  ;;  %1741 = vrcp.f32 %v643_v47  ;;  %v726_v6 = vmul.f32 %v1714_v51, %v2179_v24 }
 0x221   :  { %v1718_v62 = vpop.eup %1717  ;;  %1743 = vpow2.f32 %v1393_v9  ;;  %v2287_v9 = vadd.f32 %v454_v59, %v2167_v16  ;;  %v529_v16 = vpop.f32.mrf.mxu1  ;;  %v1407_v24 = vmul.f32 -1.442695, %v2292_v38 }
 0x222   :  { %v1720_v27 = vpop.eup %1719  ;;  %1745 = vpow2.f32 %v1395_v26  ;;  %v1404_v26 = vmul.f32 -1.442695, %v2277_v50 }
 0x223   :  { %v1722_v25 = vpop.eup %1721  ;;  %1747 = vpow2.f32 %v1394_v52  ;;  %v728_v37 = vmul.f32 %v1720_v27, %v2192_v43  ;;  %v725_v52 = vmul.f32 %v1716_v56, %v2184_v30  ;;  %v727_v43 = vmul.f32 %v1718_v62, %v2187_v35 }
 0x224   :  { %v1724_v18 = vpop.eup %1723  ;;  %1749 = vpow2.f32 %v1396_v57  ;;  %v730_v11 = vmul.f32 %v1722_v25, %v2195_v34  ;;  %v2302_v30 = vadd.f32 %v456_v15, %v2171_v21 }
 0x225   :  { %v1726_v47 = vpop.eup %1725  ;;  %v729_v10 = vmul.f32 %v1724_v18, %v2199_v39  ;;  %1751 = vpow2.f32 %v1397_v20  ;;  %v756_v39 = vpack.c.bf16 %v728_v37, %v724_v8  ;;  %v2305_v20 = vadd.f32 %v529_v16, %v2173_v19 }
 0x226   :  { %v1728_v59 = vpop.eup %1727  ;;  %v731_v57 = vmul.f32 %v1726_v47, %v2202_v40  ;;  %1753 = vpow2.f32 %v1399_v63  ;;  %v758_v35 = vpack.c.bf16 %v730_v11, %v726_v6  ;;  %v1405_v40 = vmul.f32 -1.442695, %v2287_v9 }
 0x227   :  { %v1730_v17 = vpop.eup %1729  ;;  %1755 = vpow2.f32 %v1398_v13  ;;  %v757_v34 = vpack.c.bf16 %v729_v10, %v725_v52  ;;  %v1406_v8 = vmul.f32 -1.442695, %v2302_v30  ;;  %v1408_v11 = vmul.f32 -1.442695, %v2305_v20 }
 0x228   :  { %v1732_v56 = vpop.eup %1731  ;;  %1757 = vpow2.f32 %v1400_v14  ;;  %v759_v23 = vpack.c.bf16 %v731_v57, %v727_v43 }
 0x229   :  { %v1734_v46 = vpop.eup %1733  ;;  %1759 = vpow2.f32 %v1401_v22  ;;  %1067 = vmatprep.mubr.bf16.mxu0 %v757_v34  ;;  %v733_v63 = vmul.f32 %v1732_v56, %v2215_v53  ;;  %v732_v22 = vmul.f32 %v1728_v59, %v2208_v48 }
 0x22a   :  { %v1736_v62 = vpop.eup %1735  ;;  %1761 = vpow2.f32 %v1403_v36  ;;  %1132 = vmatprep.mubr.bf16.mxu1 %v759_v23  ;;  %1068 = vmatmul.mubr.bf16.vlgmr.msra.gmra.mxu0 %v756_v39  ;;  %v735_v25 = vmul.f32 %v1734_v46, %v2218_v54 }
 0x22b   :  { %v1738_v10 = vpop.eup %1737  ;;  %1763 = vpow2.f32 %v1402_v31  ;;  %1133 = vmatmul.mubr.bf16.vlgmr.msra.gmra.mxu1 %v758_v35  ;;  %v736_v19 = vmul.f32 %v1736_v62, %v2224_v60  ;;  %v734_v31 = vmul.f32 %v1730_v17, %v2211_v49 }
 0x22c   :  { %v1740_v21 = vpop.eup %1739  ;;  %1765 = vpow2.f32 %v1404_v26  ;;  %v738_v27 = vmul.f32 %v1738_v10, %v2227_v61 }
 0x22d   :  { %v1742_v51 = vpop.eup %1741  ;;  %v737_v13 = vmul.f32 %v1740_v21, %v2231_v0  ;;  %1767 = vpow2.f32 %v1405_v40  ;;  %v760_v0 = vpack.c.bf16 %v736_v19, %v732_v22 }
 0x22e   :  { %v1744_v14 = vpop.eup %1743  ;;  %v739_v36 = vmul.f32 %v1742_v51, %v2234_v1  ;;  %1769 = vpow2.f32 %v1407_v24  ;;  %v762_v48 = vpack.c.bf16 %v738_v27, %v734_v31 }
 0x22f   :  { %v1746_v60 = vpop.eup %1745  ;;  %v644_v18 = vadd.f32 1.0, %v1744_v14  ;;  %1771 = vpow2.f32 %v1406_v8  ;;  %v761_v37 = vpack.c.bf16 %v737_v13, %v733_v63 }
 0x230   :  { %v1748_v53 = vpop.eup %1747  ;;  %v646_v26 = vadd.f32 1.0, %v1746_v60  ;;  %1773 = vpow2.f32 %v1408_v11  ;;  %v763_v61 = vpack.c.bf16 %v739_v36, %v735_v25 }
 0x231   :  { %v1750_v15 = vpop.eup %1749  ;;  %1775 = vrcp.f32 %v644_v18  ;;  %v645_v47 = vadd.f32 1.0, %v1748_v53  ;;  %1075 = vmatprep.mubr.bf16.mxu0 %v761_v37 }
 0x232   :  { %v1752_v54 = vpop.eup %1751  ;;  %1777 = vrcp.f32 %v646_v26  ;;  %v647_v1 = vadd.f32 1.0, %v1750_v15  ;;  %1140 = vmatprep.mubr.bf16.mxu1 %v763_v61  ;;  %1076 = vmatmul.mubr.bf16.gmra.mxu0 %v760_v0 }
 0x233   :  { %v1754_v52 = vpop.eup %1753  ;;  %1779 = vrcp.f32 %v645_v47  ;;  %v648_v49 = vadd.f32 1.0, %v1752_v54  ;;  %1141 = vmatmul.mubr.bf16.gmra.mxu1 %v762_v48 }
 0x234   :  { %v1756_v16 = vpop.eup %1755  ;;  %1781 = vrcp.f32 %v647_v1  ;;  %v650_v59 = vadd.f32 1.0, %v1754_v52 }
 0x235   :  { %v1758_v43 = vpop.eup %1757  ;;  %1783 = vrcp.f32 %v648_v49  ;;  %v649_v57 = vadd.f32 1.0, %v1756_v16 }
 0x236   :  { %v1760_v17 = vpop.eup %1759  ;;  %1785 = vrcp.f32 %v650_v59  ;;  %v651_v6 = vadd.f32 1.0, %v1758_v43 }
 0x237   :  { %v1762_v34 = vpop.eup %1761  ;;  %1787 = vrcp.f32 %v649_v57  ;;  %v652_v56 = vadd.f32 1.0, %v1760_v17 }
 0x238   :  { %v1764_v39 = vpop.eup %1763  ;;  %1789 = vrcp.f32 %v651_v6  ;;  %v654_v23 = vadd.f32 1.0, %v1762_v34 }
 0x239   :  { %v1766_v46 = vpop.eup %1765  ;;  %1791 = vrcp.f32 %v652_v56  ;;  %v653_v35 = vadd.f32 1.0, %v1764_v39 }
 0x23a   :  { %v1768_v40 = vpop.eup %1767  ;;  %1793 = vrcp.f32 %v654_v23  ;;  %v655_v62 = vadd.f32 1.0, %v1766_v46 }
 0x23b   :  { %v1770_v24 = vpop.eup %1769  ;;  %1795 = vrcp.f32 %v653_v35  ;;  %v656_v10 = vadd.f32 1.0, %v1768_v40 }
 0x23c   :  { %v1772_v8 = vpop.eup %1771  ;;  %1797 = vrcp.f32 %v655_v62  ;;  %v658_v21 = vadd.f32 1.0, %v1770_v24 }
 0x23d   :  { %v1774_v19 = vpop.eup %1773  ;;  %1799 = vrcp.f32 %v656_v10  ;;  %v657_v11 = vadd.f32 1.0, %v1772_v8 }
 0x23e   :  { %v1776_v51 = vpop.eup %1775  ;;  %1801 = vrcp.f32 %v658_v21  ;;  %v659_v63 = vadd.f32 1.0, %v1774_v19 }
 0x23f   :  { %v1778_v27 = vpop.eup %1777  ;;  %1803 = vrcp.f32 %v657_v11  ;;  %v740_v61 = vmul.f32 %v1776_v51, %v2240_v55 }
 0x240   :  { %v1780_v13 = vpop.eup %1779  ;;  %1805 = vrcp.f32 %v659_v63  ;;  %v742_v48 = vmul.f32 %v1778_v27, %v2243_v58 }
 0x241   :  { %v1782_v14 = vpop.eup %1781  ;;  %v741_v18 = vmul.f32 %v1780_v13, %v2248_v12 }
 0x242   :  { %v1784_v22 = vpop.eup %1783  ;;  %v743_v0 = vmul.f32 %v1782_v14, %v2251_v32 }
 0x243   :  { %v1786_v25 = vpop.eup %1785  ;;  %v744_v60 = vmul.f32 %v1784_v22, %v2254_v44 }
 0x244   :  { %v1788_v36 = vpop.eup %1787  ;;  %v746_v37 = vmul.f32 %v1786_v25, %v2257_v41 }
 0x245   :  { %v1790_v31 = vpop.eup %1789  ;;  %v745_v53 = vmul.f32 %v1788_v36, %v2260_v42  ;;  %v764_v52 = vpack.c.bf16 %v744_v60, %v740_v61 }
 0x246   :  { %v1792_v26 = vpop.eup %1791  ;;  %v747_v15 = vmul.f32 %v1790_v31, %v2263_v28  ;;  %v766_v12 = vpack.c.bf16 %v746_v37, %v742_v48 }
 0x247   :  { %v1794_v47 = vpop.eup %1793  ;;  %v765_v54 = vpack.c.bf16 %v745_v53, %v741_v18  ;;  %v748_v43 = vmul.f32 %v1792_v26, %v2266_v29  ;;  %v2338_v29 = vld [vmem:[%s2404_s6] ss:$0 sm:$0xff] }
 0x248   :  { %v1796_v1 = vpop.eup %1795  ;;  %v767_v44 = vpack.c.bf16 %v747_v15, %v743_v0  ;;  %v750_v6 = vmul.f32 %v1794_v47, %v2270_v33 }
 0x249   :  { %v1798_v49 = vpop.eup %1797  ;;  %1083 = vmatprep.mubr.bf16.mxu0 %v765_v54  ;;  %v749_v28 = vmul.f32 %v1796_v1, %v2273_v45 }
 0x24a   :  { %v1800_v41 = vpop.eup %1799  ;;  %1148 = vmatprep.mubr.bf16.mxu1 %v767_v44  ;;  %1084 = vmatmul.mubr.bf16.gmra.mxu0 %v764_v52  ;;  %v751_v57 = vmul.f32 %v1798_v49, %v2277_v50 }
 0x24b   :  { %v1802_v42 = vpop.eup %1801  ;;  %1149 = vmatmul.mubr.bf16.gmra.mxu1 %v766_v12  ;;  %v752_v32 = vmul.f32 %v1800_v41, %v2287_v9 }
 0x24c   :  { %v1804_v55 = vpop.eup %1803  ;;  %v754_v58 = vmul.f32 %v1802_v42, %v2292_v38 }
 0x24d   :  { %v1806_v16 = vpop.eup %1805  ;;  %v753_v59 = vmul.f32 %v1804_v55, %v2302_v30  ;;  %v768_v39 = vpack.c.bf16 %v752_v32, %v748_v43 }
 0x24e   :  { %v755_v17 = vmul.f32 %v1806_v16, %v2305_v20  ;;  %v770_v9 = vpack.c.bf16 %v754_v58, %v750_v6 }
 0x24f   :  { %v769_v34 = vpack.c.bf16 %v753_v59, %v749_v28 }
 0x250   :  { %v771_v56 = vpack.c.bf16 %v755_v17, %v751_v57 }
 0x251   :  { %1091 = vmatprep.mubr.bf16.mxu0 %v769_v34 }
 0x252   :  { %1156 = vmatprep.mubr.bf16.mxu1 %v771_v56  ;;  %1092 = vmatmul.mubr.bf16.gmra.mxu0 %v768_v39 }
 0x253   :  { %1157 = vmatmul.mubr.bf16.gmra.mxu1 %v770_v9 }
 0x2ea   :  { %v1518_v45 = vpop.f32.mrf.mxu0 }
 0x2eb   :  { %v1558_v38 = vpop.f32.mrf.mxu1 }
 0x2ec   :  { %v1519_v50 = vpop.f32.mrf.mxu0 }
 0x2ed   :  { %v1520_v30 = vadd.f32 %v1519_v50, %v1518_v45  ;;  %v1559_v20 = vpop.f32.mrf.mxu1 }
 0x2ee   :  { %v1521_v23 = vpop.f32.mrf.mxu0  ;;  %v1560_v46 = vadd.f32 %v1559_v20, %v1558_v38 }
 0x2ef   :  { %v1070_v33 = vadd.f32 %v1520_v30, %v2338_v29  ;;  %v1561_v35 = vpop.f32.mrf.mxu1 }
 0x2f0   :  { %v1522_v40 = vpop.f32.mrf.mxu0 }
 0x2f1   :  { %v1135_v62 = vadd.f32 %v1560_v46, %v1070_v33  ;;  %v1523_v24 = vadd.f32 %v1522_v40, %v1521_v23  ;;  %v1562_v10 = vpop.f32.mrf.mxu1 }
 0x2f2   :  { %v1524_v8 = vpop.f32.mrf.mxu0  ;;  %v1563_v11 = vadd.f32 %v1562_v10, %v1561_v35 }
 0x2f3   :  { %v1165_v21 = vmul.f32 0.5, %v1135_v62  ;;  %v1073_v19 = vadd.f32 %v1523_v24, %v2338_v29  ;;  %v1564_v51 = vpop.f32.mrf.mxu1  ;;  %v2414_v62 = vld [vmem:[#allocation2_spill] sm:$0xff] }
 0x2f4   :  { %v1525_v63 = vpop.f32.mrf.mxu0 }
 0x2f5   :  { %v1138_v27 = vadd.f32 %v1563_v11, %v1073_v19  ;;  %v1526_v13 = vadd.f32 %v1525_v63, %v1524_v8  ;;  %v1565_v14 = vpop.f32.mrf.mxu1  ;;  %v2343_v22 = vadd.f32 %v1880_v2, %v1165_v21  ;;  %v2416_v63 = vld [vmem:[#allocation4_spill] sm:$0xff] }
 0x2f6   :  { %v1527_v25 = vpop.f32.mrf.mxu0  ;;  %v1566_v31 = vadd.f32 %v1565_v14, %v1564_v51 }
 0x2f7   :  { %v1166_v36 = vmul.f32 0.5, %v1138_v27  ;;  %v1078_v60 = vadd.f32 %v1526_v13, %v2338_v29  ;;  %v1567_v18 = vpop.f32.mrf.mxu1  ;;  %1183 = vadd.xlane.f32.xlu0 %v2343_v22 }
 0x2f8   :  { %v1528_v37 = vpop.f32.mrf.mxu0 }
 0x2f9   :  { %v1143_v53 = vadd.f32 %v1566_v31, %v1078_v60  ;;  %v1529_v26 = vadd.f32 %v1528_v37, %v1527_v25  ;;  %v1568_v61 = vpop.f32.mrf.mxu1  ;;  %v1174_v0 = vadd.f32 %v1886_v4, %v1166_v36 }
 0x2fa   :  { %v1569_v48 = vadd.f32 %v1568_v61, %v1567_v18 }
 0x2fb   :  { %v1167_v15 = vmul.f32 0.5, %v1143_v53  ;;  %v1081_v47 = vadd.f32 %v1529_v26, %v2338_v29  ;;  %1185 = vadd.xlane.f32.xlu1 %v1174_v0 }
 0x2fd   :  { %v1146_v2 = vadd.f32 %v1569_v48, %v1081_v47  ;;  %v1175_v54 = vadd.f32 %v1882_v3, %v1167_v15 }
 0x2ff   :  { %v1168_v1 = vmul.f32 0.5, %v1146_v2  ;;  %1187 = vadd.xlane.f32.xlu0 %v1175_v54 }
 0x301   :  { %v1176_v44 = vadd.f32 %v1888_v5, %v1168_v1 }
 0x303   :  { %1189 = vadd.xlane.f32.xlu1 %v1176_v44 }
 0x30a   :  { %v1530_v52 = vpop.f32.mrf.mxu0 }
 0x30b   :  { %v1570_v49 = vpop.f32.mrf.mxu1 }
 0x30c   :  { %v1531_v12 = vpop.f32.mrf.mxu0 }
 0x30d   :  { %v1532_v41 = vadd.f32 %v1531_v12, %v1530_v52  ;;  %v1571_v42 = vpop.f32.mrf.mxu1 }
 0x30e   :  { %v1533_v55 = vpop.f32.mrf.mxu0  ;;  %v1572_v32 = vadd.f32 %v1571_v42, %v1570_v49 }
 0x30f   :  { %v1086_v4 = vadd.f32 %v1532_v41, %v2338_v29  ;;  %v1573_v16 = vpop.f32.mrf.mxu1 }
 0x310   :  { %v1534_v28 = vpop.f32.mrf.mxu0 }
 0x311   :  { %v1151_v58 = vadd.f32 %v1572_v32, %v1086_v4  ;;  %v1535_v59 = vadd.f32 %v1534_v28, %v1533_v55  ;;  %v1574_v43 = vpop.f32.mrf.mxu1 }
 0x312   :  { %v1536_v3 = vpop.f32.mrf.mxu0  ;;  %v1575_v5 = vadd.f32 %v1574_v43, %v1573_v16 }
 0x313   :  { %v1169_v57 = vmul.f32 0.5, %v1151_v58  ;;  %v1089_v17 = vadd.f32 %v1535_v59, %v2338_v29  ;;  %v1576_v6 = vpop.f32.mrf.mxu1 }
 0x314   :  { %v1537_v34 = vpop.f32.mrf.mxu0 }
 0x315   :  { %v1154_v56 = vadd.f32 %v1575_v5, %v1089_v17  ;;  %v1538_v39 = vadd.f32 %v1537_v34, %v1536_v3  ;;  %v1577_v9 = vpop.f32.mrf.mxu1  ;;  %v1177_v45 = vadd.f32 %v1895_v7, %v1169_v57  ;;  %v2415_v7 = vld [vmem:[#allocation3_spill] sm:$0xff] }
 0x316   :  { %v1539_v38 = vpop.f32.mrf.mxu0  ;;  %v1578_v20 = vadd.f32 %v1577_v9, %v1576_v6 }
 0x317   :  { %v1170_v50 = vmul.f32 0.5, %v1154_v56  ;;  %v1094_v30 = vadd.f32 %v1538_v39, %v2338_v29  ;;  %v1579_v23 = vpop.f32.mrf.mxu1  ;;  %1191 = vadd.xlane.f32.xlu0 %v1177_v45 }
 0x318   :  { %v1540_v33 = vpop.f32.mrf.mxu0 }
 0x319   :  { %v1159_v46 = vadd.f32 %v1578_v20, %v1094_v30  ;;  %v1541_v35 = vadd.f32 %v1540_v33, %v1539_v38  ;;  %v1580_v40 = vpop.f32.mrf.mxu1  ;;  %v1178_v24 = vadd.f32 %v2414_v62, %v1170_v50  ;;  %v1442_v30 = vld [vmem:[%s2405_s7] ss:$0 sm:$0xff] }
 0x31a   :  { %v1581_v21 = vadd.f32 %v1580_v40, %v1579_v23 }
 0x31b   :  { %v1171_v10 = vmul.f32 0.5, %v1159_v46  ;;  %v1097_v8 = vadd.f32 %v1541_v35, %v2338_v29  ;;  %1193 = vadd.xlane.f32.xlu1 %v1178_v24  ;;  %v1443_v46 = vld [vmem:[%s2406_s8] ss:$0 sm:$0xff] }
 0x31d   :  { %v1162_v19 = vadd.f32 %v1581_v21, %v1097_v8  ;;  %v1179_v11 = vadd.f32 %v2415_v7, %v1171_v10 }
 0x31f   :  { %v1172_v51 = vmul.f32 0.5, %v1162_v19  ;;  %1195 = vadd.xlane.f32.xlu0 %v1179_v11 }
 0x321   :  { %v1180_v27 = vadd.f32 %v2416_v63, %v1172_v51 }
 0x323   :  { %1197 = vadd.xlane.f32.xlu1 %v1180_v27 }
 0x380   :  { %v1184_v13 = vpop.xlane.xlu0 %1183 }
 0x381   :  { %v1199_v14 = vmul.f32 0.0078125, %v1184_v13 }
 0x383   :  { %v1207_v25 = vsub.f32 %v2343_v22, %v1199_v14 }
 0x384   :  { %v1186_v36 = vpop.xlane.xlu1 %1185 }
 0x385   :  { %v1200_v60 = vmul.f32 0.0078125, %v1186_v36  ;;  %v1215_v31 = vmul.f32 %v1207_v25, %v1207_v25 }
 0x387   :  { %v1208_v18 = vsub.f32 %v1174_v0, %v1200_v60  ;;  %1223 = vadd.xlane.f32.xlu0 %v1215_v31 }
 0x388   :  { %v1188_v29 = vpop.xlane.xlu0 %1187 }
 0x389   :  { %v1201_v37 = vmul.f32 0.0078125, %v1188_v29  ;;  %v1216_v53 = vmul.f32 %v1208_v18, %v1208_v18 }
 0x38b   :  { %v1209_v26 = vsub.f32 %v1175_v54, %v1201_v37  ;;  %1225 = vadd.xlane.f32.xlu1 %v1216_v53 }
 0x38c   :  { %v1190_v61 = vpop.xlane.xlu1 %1189 }
 0x38d   :  { %v1202_v15 = vmul.f32 0.0078125, %v1190_v61  ;;  %v1217_v47 = vmul.f32 %v1209_v26, %v1209_v26 }
 0x38f   :  { %v1210_v48 = vsub.f32 %v1176_v44, %v1202_v15  ;;  %1227 = vadd.xlane.f32.xlu0 %v1217_v47 }
 0x391   :  { %v1218_v2 = vmul.f32 %v1210_v48, %v1210_v48 }
 0x393   :  { %1229 = vadd.xlane.f32.xlu1 %v1218_v2 }
 0x3a0   :  { %v1192_v1 = vpop.xlane.xlu0 %1191 }
 0x3a1   :  { %v1203_v52 = vmul.f32 0.0078125, %v1192_v1 }
 0x3a3   :  { %v2360_v22 = vsub.f32 %v1177_v45, %v1203_v52 }
 0x3a4   :  { %v1194_v49 = vpop.xlane.xlu1 %1193 }
 0x3a5   :  { %v1204_v12 = vmul.f32 0.0078125, %v1194_v49  ;;  %v1219_v0 = vmul.f32 %v2360_v22, %v2360_v22 }
 0x3a7   :  { %v2364_v41 = vsub.f32 %v1178_v24, %v1204_v12  ;;  %1231 = vadd.xlane.f32.xlu0 %v1219_v0 }
 0x3a8   :  { %v1196_v54 = vpop.xlane.xlu0 %1195 }
 0x3a9   :  { %v1205_v42 = vmul.f32 0.0078125, %v1196_v54  ;;  %v1220_v44 = vmul.f32 %v2364_v41, %v2364_v41 }
 0x3ab   :  { %v2368_v55 = vsub.f32 %v1179_v11, %v1205_v42  ;;  %1233 = vadd.xlane.f32.xlu1 %v1220_v44 }
 0x3ac   :  { %v1198_v4 = vpop.xlane.xlu1 %1197 }
 0x3ad   :  { %v1206_v32 = vmul.f32 0.0078125, %v1198_v4  ;;  %v1221_v16 = vmul.f32 %v2368_v55, %v2368_v55 }
 0x3af   :  { %v2372_v28 = vsub.f32 %v1180_v27, %v1206_v32  ;;  %1235 = vadd.xlane.f32.xlu0 %v1221_v16 }
 0x3b1   :  { %v1222_v58 = vmul.f32 %v2372_v28, %v2372_v28 }
 0x3b3   :  { %1237 = vadd.xlane.f32.xlu1 %v1222_v58 }
 0x410   :  { %v1224_v59 = vpop.xlane.xlu0 %1223 }
 0x411   :  { %v1239_v43 = vmul.f32 0.0078125, %v1224_v59 }
 0x413   :  { %v1247_v3 = vadd.f32 1e-05, %v1239_v43 }
 0x414   :  { %v1226_v57 = vpop.xlane.xlu1 %1225 }
 0x415   :  { %1807 = vrsqrt.f32 %v1247_v3  ;;  %v1240_v17 = vmul.f32 0.0078125, %v1226_v57 }
 0x417   :  { %v1248_v5 = vadd.f32 1e-05, %v1240_v17 }
 0x418   :  { %v1228_v6 = vpop.xlane.xlu0 %1227 }
 0x419   :  { %1809 = vrsqrt.f32 %v1248_v5  ;;  %v1241_v34 = vmul.f32 0.0078125, %v1228_v6 }
 0x41b   :  { %v1249_v56 = vadd.f32 1e-05, %v1241_v34 }
 0x41c   :  { %v1230_v39 = vpop.xlane.xlu1 %1229 }
 0x41d   :  { %1811 = vrsqrt.f32 %v1249_v56  ;;  %v1242_v9 = vmul.f32 0.0078125, %v1230_v39 }
 0x41f   :  { %v1250_v45 = vadd.f32 1e-05, %v1242_v9 }
 0x421   :  { %1813 = vrsqrt.f32 %v1250_v45 }
 0x422   :  { %v1808_v38 = vpop.eup %1807 }
 0x423   :  { %v1263_v50 = vmul.f32 %v1808_v38, %v1207_v25 }
 0x425   :  { %v1277_v23 = vmul.f32 %v1442_v30, %v1263_v50 }
 0x426   :  { %v1810_v20 = vpop.eup %1809 }
 0x427   :  { %v1264_v33 = vmul.f32 %v1810_v20, %v1208_v18  ;;  %v1291_v62 = vadd.f32 %v1443_v46, %v1277_v23 }
 0x429   :  { %v1278_v35 = vmul.f32 %v1442_v30, %v1264_v33 }
 0x42a   :  { %v1812_v40 = vpop.eup %1811 }
 0x42b   :  { %v1292_v24 = vadd.f32 %v1443_v46, %v1278_v35  ;;  %v1265_v10 = vmul.f32 %v1812_v40, %v1209_v26 }
 0x42d   :  { %v1479_v8 = vpack.c.bf16 %v1292_v24, %v1291_v62  ;;  %v1279_v19 = vmul.f32 %v1442_v30, %v1265_v10 }
 0x42e   :  { %v1814_v21 = vpop.eup %1813 }
 0x42f   :  { %1480 = vst [vmem:[%s2407_s9] sm:$0xff] %v1479_v8   ;;  %v1266_v7 = vmul.f32 %v1814_v21, %v1210_v48  ;;  %v1293_v27 = vadd.f32 %v1443_v46, %v1279_v19 }
 0x430   :  { %v1232_v11 = vpop.xlane.xlu0 %1231 }
 0x431   :  { %v1280_v51 = vmul.f32 %v1442_v30, %v1266_v7  ;;  %v1243_v63 = vmul.f32 0.0078125, %v1232_v11 }
 0x433   :  { %v1294_v13 = vadd.f32 %v1443_v46, %v1280_v51  ;;  %v1251_v14 = vadd.f32 1e-05, %v1243_v63 }
 0x434   :  { %v1234_v25 = vpop.xlane.xlu1 %1233 }
 0x435   :  { %v1484_v36 = vpack.c.bf16 %v1294_v13, %v1293_v27  ;;  %1815 = vrsqrt.f32 %v1251_v14  ;;  %v1244_v60 = vmul.f32 0.0078125, %v1234_v25 }
 0x437   :  { %1499 = vst [vmem:[%s2407_s9 + $0x8] sm:$0xff] %v1484_v36   ;;  %v1252_v31 = vadd.f32 1e-05, %v1244_v60 }
 0x438   :  { %v1236_v18 = vpop.xlane.xlu0 %1235 }
 0x439   :  { %1817 = vrsqrt.f32 %v1252_v31  ;;  %v1245_v29 = vmul.f32 0.0078125, %v1236_v18 }
 0x43b   :  { %v1253_v37 = vadd.f32 1e-05, %v1245_v29 }
 0x43c   :  { %v1238_v53 = vpop.xlane.xlu1 %1237 }
 0x43d   :  { %1819 = vrsqrt.f32 %v1253_v37  ;;  %v1246_v26 = vmul.f32 0.0078125, %v1238_v53 }
 0x43f   :  { %v1254_v61 = vadd.f32 1e-05, %v1246_v26 }
 0x441   :  { %1821 = vrsqrt.f32 %v1254_v61 }
 0x442   :  { %v1816_v15 = vpop.eup %1815 }
 0x443   :  { %v1267_v47 = vmul.f32 %v1816_v15, %v2360_v22 }
 0x445   :  { %v1281_v2 = vmul.f32 %v1442_v30, %v1267_v47 }
 0x446   :  { %v1818_v48 = vpop.eup %1817 }
 0x447   :  { %v1268_v1 = vmul.f32 %v1818_v48, %v2364_v41  ;;  %v1295_v12 = vadd.f32 %v1443_v46, %v1281_v2 }
 0x449   :  { %v1282_v52 = vmul.f32 %v1442_v30, %v1268_v1 }
 0x44a   :  { %v1820_v49 = vpop.eup %1819 }
 0x44b   :  { %v1296_v0 = vadd.f32 %v1443_v46, %v1282_v52  ;;  %v1269_v54 = vmul.f32 %v1820_v49, %v2368_v55 }
 0x44d   :  { %v1489_v42 = vpack.c.bf16 %v1296_v0, %v1295_v12  ;;  %v1283_v4 = vmul.f32 %v1442_v30, %v1269_v54 }
 0x44e   :  { %v1822_v44 = vpop.eup %1821 }
 0x44f   :  { %1500 = vst [vmem:[%s2407_s9 + $0x10] sm:$0xff] %v1489_v42   ;;  %v1270_v32 = vmul.f32 %v1822_v44, %v2372_v28  ;;  %v1297_v16 = vadd.f32 %v1443_v46, %v1283_v4 }
 0x451   :  { %v1284_v22 = vmul.f32 %v1442_v30, %v1270_v32 }
 0x453   :  { %v1298_v58 = vadd.f32 %v1443_v46, %v1284_v22 }
 0x455   :  { %v1494_v59 = vpack.c.bf16 %v1298_v58, %v1297_v16 }
 0x457   :  { %1501 = vst [vmem:[%s2407_s9 + $0x18] sm:$0xff] %v1494_v59  }

// kernel: conformer_encoder_forward.12
= control target key start
LH: loop header
LB: loop body
LE: loop exit
PB: predicated region body
PF: predicated region fallthrough
CT: control target
= control target key end

     0   :  { %s2216_s0 = inlined_call_operand.vmem [shape: bf16[64,128], index: 0, kind: input, shape index: {}]   ;;  %s2217_s3 = inlined_call_operand.vmem [shape: bf16[128,512], index: 3, kind: input, shape index: {}]   ;;  %s2218_s1 = inlined_call_operand.vmem [shape: f32[1,128], index: 1, kind: input, shape index: {}]   ;;  %s2219_s2 = inlined_call_operand.vmem [shape: f32[1,128], index: 2, kind: input, shape index: {}]   ;;  %s2220_s5 = inlined_call_operand.vmem [shape: bf16[512,128], index: 5, kind: input, shape index: {}]   ;;  %s2221_s4 = inlined_call_operand.vmem [shape: f32[1,512], index: 4, kind: input, shape index: {}]   ;;  %s2222_s6 = inlined_call_operand.vmem [shape: f32[1,128], index: 6, kind: input, shape index: {}]   ;;  %s2223_s7 = inlined_call_operand.vmem [shape: bf16[64,128], index: 7, kind: output, shape index: {}]  }
   0x1   :  { %v1335_v0 = vld [vmem:[%s2216_s0] sm:$0xff]   ;;  %v1370_v1 = vld [vmem:[%s2216_s0 + $0x8] sm:$0xff]   ;;  %v1371_v6 = vld [vmem:[%s2216_s0 + $0x10] sm:$0xff]  }
   0x2   :  { %v1728_v2 = vunpack.c.l.bf16 %v1335_v0  ;;  %v1730_v3 = vunpack.c.l.bf16 %v1370_v1  ;;  %v1734_v4 = vunpack.c.h.bf16 %v1335_v0  ;;  %v1736_v5 = vunpack.c.h.bf16 %v1370_v1  ;;  %v1372_v9 = vld [vmem:[%s2216_s0 + $0x18] sm:$0xff]   ;;  %v1457_v12 = vld [vmem:[%s2217_s3 + $0xe4] ss:$16 sps:$4 sm:$0xff]   ;;  %v1461_v14 = vld [vmem:[%s2217_s3 + $0xe0] ss:$16 sps:$4 sm:$0xff]  }
   0x3   :  { %v1743_v7 = vunpack.c.l.bf16 %v1371_v6  ;;  %v1745_v8 = vunpack.c.h.bf16 %v1371_v6  ;;  %v1752_v10 = vunpack.c.l.bf16 %v1372_v9  ;;  %v1754_v11 = vunpack.c.h.bf16 %v1372_v9  ;;  %v1459_v13 = vld [vmem:[%s2217_s3 + $0xec] ss:$16 sps:$4 sm:$0xff]   ;;  %380 = vmatprep.subr.bf16.mxu0 %v1457_v12  ;;  %v1462_v15 = vld [vmem:[%s2217_s3 + $0xe8] ss:$16 sps:$4 sm:$0xff]   ;;  %v1463_v47 = vld [vmem:[%s2217_s3 + $0xc4] ss:$16 sps:$4 sm:$0xff]  }
   0x4   :  { %45 = vadd.xlane.f32.xlu0 %v1728_v2  ;;  %49 = vadd.xlane.f32.xlu1 %v1730_v3  ;;  %v1465_v48 = vld [vmem:[%s2217_s3 + $0xcc] ss:$16 sps:$4 sm:$0xff]   ;;  %v1467_v49 = vld [vmem:[%s2217_s3 + $0xc0] ss:$16 sps:$4 sm:$0xff]   ;;  %v1468_v50 = vld [vmem:[%s2217_s3 + $0xc8] ss:$16 sps:$4 sm:$0xff]  }
   0x5   :  { %2227 = vst [vmem:[#allocation2_spill] sm:$0xff] %v1745_v8  ;;  %2228 = vst [vmem:[#allocation3_spill] sm:$0xff] %v1752_v10  ;;  %453 = vmatprep.subr.bf16.mxu1 %v1459_v13  ;;  %381 = vmatpush1.bf16.msra.mxu0 %v1461_v14  ;;  %v1469_v52 = vld [vmem:[%s2217_s3 + $0xa4] ss:$16 sps:$4 sm:$0xff]   ;;  %v1471_v53 = vld [vmem:[%s2217_s3 + $0xac] ss:$16 sps:$4 sm:$0xff]  }
   0x6   :  { %2229 = vst [vmem:[#allocation4_spill] sm:$0xff] %v1754_v11  ;;  %454 = vmatpush1.bf16.msra.mxu1 %v1462_v15  ;;  %382 = vmatprep.subr.bf16.mxu0 %v1463_v47  ;;  %v1473_v54 = vld [vmem:[%s2217_s3 + $0xa0] ss:$16 sps:$4 sm:$0xff]   ;;  %v1474_v55 = vld [vmem:[%s2217_s3 + $0xa8] ss:$16 sps:$4 sm:$0xff]  }
   0x7   :  { %455 = vmatprep.subr.bf16.mxu1 %v1465_v48  ;;  %v1475_v56 = vld [vmem:[%s2217_s3 + $0x84] ss:$16 sps:$4 sm:$0xff]   ;;  %v1477_v57 = vld [vmem:[%s2217_s3 + $0x8c] ss:$16 sps:$4 sm:$0xff]   ;;  %v1479_v58 = vld [vmem:[%s2217_s3 + $0x80] ss:$16 sps:$4 sm:$0xff]  }
   0x8   :  { %47 = vadd.xlane.f32.xlu0 %v1734_v4  ;;  %51 = vadd.xlane.f32.xlu1 %v1736_v5  ;;  %v1480_v59 = vld [vmem:[%s2217_s3 + $0x88] ss:$16 sps:$4 sm:$0xff]   ;;  %v1481_v60 = vld [vmem:[%s2217_s3 + $0x64] ss:$16 sps:$4 sm:$0xff]   ;;  %v1483_v61 = vld [vmem:[%s2217_s3 + $0x6c] ss:$16 sps:$4 sm:$0xff]  }
   0x9   :  { %383 = vmatpush1.bf16.msra.mxu0 %v1467_v49  ;;  %v1485_v62 = vld [vmem:[%s2217_s3 + $0x60] ss:$16 sps:$4 sm:$0xff]   ;;  %v1486_v63 = vld [vmem:[%s2217_s3 + $0x68] ss:$16 sps:$4 sm:$0xff]   ;;  %v1487_v0 = vld [vmem:[%s2217_s3 + $0x44] ss:$16 sps:$4 sm:$0xff]  }
   0xa   :  { %456 = vmatpush1.bf16.msra.mxu1 %v1468_v50  ;;  %384 = vmatprep.subr.bf16.mxu0 %v1469_v52  ;;  %v1489_v1 = vld [vmem:[%s2217_s3 + $0x4c] ss:$16 sps:$4 sm:$0xff]   ;;  %v1491_v6 = vld [vmem:[%s2217_s3 + $0x40] ss:$16 sps:$4 sm:$0xff]   ;;  %v1492_v9 = vld [vmem:[%s2217_s3 + $0x48] ss:$16 sps:$4 sm:$0xff]  }
   0xb   :  { %457 = vmatprep.subr.bf16.mxu1 %v1471_v53  ;;  %v1493_v12 = vld [vmem:[%s2217_s3 + $0x24] ss:$16 sps:$4 sm:$0xff]   ;;  %v1495_v13 = vld [vmem:[%s2217_s3 + $0x2c] ss:$16 sps:$4 sm:$0xff]   ;;  %v1497_v14 = vld [vmem:[%s2217_s3 + $0x20] ss:$16 sps:$4 sm:$0xff]  }
   0xc   :  { %53 = vadd.xlane.f32.xlu0 %v1743_v7  ;;  %55 = vadd.xlane.f32.xlu1 %v1745_v8  ;;  %v1498_v15 = vld [vmem:[%s2217_s3 + $0x28] ss:$16 sps:$4 sm:$0xff]   ;;  %v1219_v53 = vld [vmem:[%s2218_s1] ss:$0 sm:$0xff] }
   0xd   :  { %385 = vmatpush1.bf16.msra.mxu0 %v1473_v54 }
   0xe   :  { %458 = vmatpush1.bf16.msra.mxu1 %v1474_v55  ;;  %386 = vmatprep.subr.bf16.mxu0 %v1475_v56 }
   0xf   :  { %459 = vmatprep.subr.bf16.mxu1 %v1477_v57 }
  0x10   :  { %57 = vadd.xlane.f32.xlu0 %v1752_v10  ;;  %59 = vadd.xlane.f32.xlu1 %v1754_v11 }
  0x11   :  { %387 = vmatpush1.bf16.msra.mxu0 %v1479_v58 }
  0x12   :  { %460 = vmatpush1.bf16.msra.mxu1 %v1480_v59  ;;  %388 = vmatprep.subr.bf16.mxu0 %v1481_v60  ;;  %v1220_v60 = vld [vmem:[%s2219_s2] ss:$0 sm:$0xff] }
  0x13   :  { %461 = vmatprep.subr.bf16.mxu1 %v1483_v61 }
  0x15   :  { %389 = vmatpush1.bf16.msra.mxu0 %v1485_v62 }
  0x16   :  { %462 = vmatpush1.bf16.msra.mxu1 %v1486_v63  ;;  %390 = vmatprep.subr.bf16.mxu0 %v1487_v0 }
  0x17   :  { %463 = vmatprep.subr.bf16.mxu1 %v1489_v1 }
  0x19   :  { %391 = vmatpush1.bf16.msra.mxu0 %v1491_v6 }
  0x1a   :  { %464 = vmatpush1.bf16.msra.mxu1 %v1492_v9  ;;  %392 = vmatprep.subr.bf16.mxu0 %v1493_v12 }
  0x1b   :  { %465 = vmatprep.subr.bf16.mxu1 %v1495_v13 }
  0x1d   :  { %393 = vmatpush1.bf16.msra.mxu0 %v1497_v14 }
  0x1e   :  { %466 = vmatpush1.bf16.msra.mxu1 %v1498_v15 }
  0x8d   :  { %v46_v16 = vpop.xlane.xlu0 %45  ;;  %v50_v17 = vpop.xlane.xlu1 %49 }
  0x8e   :  { %v62_v18 = vmul.f32 0.0078125, %v46_v16  ;;  %v64_v19 = vmul.f32 0.0078125, %v50_v17  ;;  %v1499_v16 = vld [vmem:[%s2217_s3 + $0x4] ss:$16 sps:$4 sm:$0xff]   ;;  %v1501_v17 = vld [vmem:[%s2217_s3 + $0xc] ss:$16 sps:$4 sm:$0xff]  }
  0x8f   :  { %394 = vmatprep.subr.bf16.mxu0 %v1499_v16  ;;  %467 = vmatprep.subr.bf16.mxu1 %v1501_v17 }
  0x90   :  { %v1771_v20 = vsub.f32 %v1728_v2, %v62_v18  ;;  %v1774_v21 = vsub.f32 %v1730_v3, %v64_v19  ;;  %v1681_v18 = vmov 0   ;;  %v1503_v19 = vld [vmem:[%s2217_s3] ss:$16 sps:$4 sm:$0xff]  }
  0x91   :  { %v48_v22 = vpop.xlane.xlu0 %47  ;;  %v52_v23 = vpop.xlane.xlu1 %51  ;;  %412 = vmatprep.mubr.bf16.mxu0 %v1681_v18  ;;  %485 = vmatprep.mubr.bf16.mxu1 %v1681_v18 }
  0x92   :  { %v63_v24 = vmul.f32 0.0078125, %v48_v22  ;;  %v78_v25 = vmul.f32 %v1771_v20, %v1771_v20  ;;  %v65_v26 = vmul.f32 0.0078125, %v52_v23  ;;  %v80_v29 = vmul.f32 %v1774_v21, %v1774_v21  ;;  %v1504_v22 = vld [vmem:[%s2217_s3 + $0x8] ss:$16 sps:$4 sm:$0xff]   ;;  %395 = vmatpush1.bf16.msra.mxu0 %v1503_v19 }
  0x93   :  { %468 = vmatpush1.bf16.msra.mxu1 %v1504_v22 }
  0x94   :  { %v1779_v27 = vsub.f32 %v1734_v4, %v63_v24  ;;  %86 = vadd.xlane.f32.xlu0 %v78_v25  ;;  %v1782_v28 = vsub.f32 %v1736_v5, %v65_v26 }
  0x95   :  { %v54_v30 = vpop.xlane.xlu0 %53  ;;  %v56_v31 = vpop.xlane.xlu1 %55 }
  0x96   :  { %v66_v32 = vmul.f32 0.0078125, %v54_v30  ;;  %v79_v33 = vmul.f32 %v1779_v27, %v1779_v27  ;;  %v67_v34 = vmul.f32 0.0078125, %v56_v31  ;;  %v81_v37 = vmul.f32 %v1782_v28, %v1782_v28 }
  0x98   :  { %v1789_v35 = vsub.f32 %v1743_v7, %v66_v32  ;;  %90 = vadd.xlane.f32.xlu0 %v80_v29  ;;  %88 = vadd.xlane.f32.xlu1 %v79_v33  ;;  %v1792_v36 = vsub.f32 %v1745_v8, %v67_v34 }
  0x99   :  { %v58_v38 = vpop.xlane.xlu0 %57  ;;  %v60_v39 = vpop.xlane.xlu1 %59 }
  0x9a   :  { %v68_v40 = vmul.f32 0.0078125, %v58_v38  ;;  %v82_v41 = vmul.f32 %v1789_v35, %v1789_v35  ;;  %v69_v42 = vmul.f32 0.0078125, %v60_v39  ;;  %v83_v45 = vmul.f32 %v1792_v36, %v1792_v36 }
  0x9c   :  { %v1799_v43 = vsub.f32 %v1752_v10, %v68_v40  ;;  %92 = vadd.xlane.f32.xlu1 %v81_v37  ;;  %94 = vadd.xlane.f32.xlu0 %v82_v41  ;;  %v1802_v44 = vsub.f32 %v1754_v11, %v69_v42 }
  0x9e   :  { %v84_v46 = vmul.f32 %v1799_v43, %v1799_v43  ;;  %v85_v51 = vmul.f32 %v1802_v44, %v1802_v44 }
  0xa0   :  { %96 = vadd.xlane.f32.xlu1 %v83_v45  ;;  %98 = vadd.xlane.f32.xlu0 %v84_v46 }
  0xa4   :  { %100 = vadd.xlane.f32.xlu1 %v85_v51 }
 0x11d   :  { %v87_v23 = vpop.xlane.xlu0 %86 }
 0x11e   :  { %v102_v24 = vmul.f32 0.0078125, %v87_v23 }
 0x120   :  { %v110_v25 = vadd.f32 1e-05, %v102_v24 }
 0x121   :  { %v89_v26 = vpop.xlane.xlu1 %88  ;;  %v91_v29 = vpop.xlane.xlu0 %90 }
 0x122   :  { %1537 = vrsqrt.f32 %v110_v25  ;;  %v103_v30 = vmul.f32 0.0078125, %v89_v26  ;;  %v104_v31 = vmul.f32 0.0078125, %v91_v29 }
 0x124   :  { %v111_v32 = vadd.f32 1e-05, %v103_v30  ;;  %v112_v33 = vadd.f32 1e-05, %v104_v31 }
 0x125   :  { %v93_v34 = vpop.xlane.xlu1 %92  ;;  %v95_v37 = vpop.xlane.xlu0 %94 }
 0x126   :  { %1539 = vrsqrt.f32 %v111_v32  ;;  %v105_v38 = vmul.f32 0.0078125, %v93_v34  ;;  %v106_v40 = vmul.f32 0.0078125, %v95_v37  ;;  %v1507_v34 = vld [vmem:[%s2220_s5 + $0xf8] sm:$0xff]   ;;  %v1509_v37 = vld [vmem:[%s2220_s5 + $0x70] sm:$0xff]  }
 0x127   :  { %1541 = vrsqrt.f32 %v112_v33  ;;  %1416 = vmatprep.subr.bf16.mxu1 %v1507_v34 }
 0x128   :  { %v113_v39 = vadd.f32 1e-05, %v105_v38  ;;  %v114_v45 = vadd.f32 1e-05, %v106_v40  ;;  %v1511_v38 = vld [vmem:[%s2220_s5 + $0xf0] sm:$0xff]  }
 0x129   :  { %v97_v41 = vpop.xlane.xlu1 %96  ;;  %v99_v47 = vpop.xlane.xlu0 %98  ;;  %v1512_v40 = vld [vmem:[%s2220_s5 + $0xb0] sm:$0xff]  }
 0x12a   :  { %1543 = vrsqrt.f32 %v113_v39  ;;  %v107_v42 = vmul.f32 0.0078125, %v97_v41  ;;  %v108_v51 = vmul.f32 0.0078125, %v99_v47  ;;  %v1510_v39 = vld [vmem:[%s2220_s5 + $0x30] sm:$0xff]   ;;  %v1513_v41 = vld [vmem:[%s2220_s5 + $0x68] sm:$0xff]   ;;  %v1517_v47 = vld [vmem:[%s2220_s5 + $0x60] sm:$0xff]  }
 0x12c   :  { %v115_v46 = vadd.f32 1e-05, %v107_v42  ;;  %v116_v56 = vadd.f32 1e-05, %v108_v51  ;;  %v1515_v42 = vld [vmem:[%s2220_s5 + $0xe8] sm:$0xff]   ;;  %v1521_v51 = vld [vmem:[%s2220_s5 + $0x58] sm:$0xff]  }
 0x12d   :  { %v101_v48 = vpop.xlane.xlu1 %100 }
 0x12e   :  { %1545 = vrsqrt.f32 %v115_v46  ;;  %v109_v49 = vmul.f32 0.0078125, %v101_v48  ;;  %v1516_v46 = vld [vmem:[%s2220_s5 + $0xa8] sm:$0xff]   ;;  %v1519_v48 = vld [vmem:[%s2220_s5 + $0xe0] sm:$0xff]  }
 0x12f   :  { %v1538_v50 = vpop.eup %1537  ;;  %1547 = vrsqrt.f32 %v114_v45  ;;  %v1514_v45 = vld [vmem:[%s2220_s5 + $0x28] sm:$0xff]  }
 0x130   :  { %v126_v52 = vmul.f32 %v1538_v50, %v1771_v20  ;;  %v117_v54 = vadd.f32 1e-05, %v109_v49  ;;  %v1518_v49 = vld [vmem:[%s2220_s5 + $0x20] sm:$0xff]  }
 0x131   :  { %v1520_v50 = vld [vmem:[%s2220_s5 + $0xa0] sm:$0xff]  }
 0x132   :  { %v140_v58 = vmul.f32 %v1219_v53, %v126_v52  ;;  %1549 = vrsqrt.f32 %v117_v54  ;;  %v1523_v52 = vld [vmem:[%s2220_s5 + $0xd8] sm:$0xff]  }
 0x133   :  { %v1540_v55 = vpop.eup %1539  ;;  %1551 = vrsqrt.f32 %v116_v56  ;;  %v1524_v54 = vld [vmem:[%s2220_s5 + $0x98] sm:$0xff]   ;;  %v1527_v56 = vld [vmem:[%s2220_s5 + $0xd0] sm:$0xff]  }
 0x134   :  { %v127_v57 = vmul.f32 %v1540_v55, %v1779_v27  ;;  %v1542_v59 = vpop.eup %1541  ;;  %v154_v20 = vadd.f32 %v1220_v60, %v140_v58  ;;  %v1525_v55 = vld [vmem:[%s2220_s5 + $0x50] sm:$0xff]  }
 0x135   :  { %v128_v0 = vmul.f32 %v1542_v59, %v1774_v21  ;;  %v1528_v58 = vld [vmem:[%s2220_s5 + $0x90] sm:$0xff]   ;;  %v1529_v59 = vld [vmem:[%s2220_s5 + $0x48] sm:$0xff]  }
 0x136   :  { %v141_v61 = vmul.f32 %v1219_v53, %v127_v57  ;;  %v1526_v57 = vld [vmem:[%s2220_s5 + $0x10] sm:$0xff]  }
 0x137   :  { %v1544_v62 = vpop.eup %1543  ;;  %v142_v27 = vmul.f32 %v1219_v53, %v128_v0  ;;  %v1534_v0 = vld [vmem:[%s2220_s5] sm:$0xff]  }
 0x138   :  { %v155_v63 = vadd.f32 %v1220_v60, %v141_v61  ;;  %v129_v1 = vmul.f32 %v1544_v62, %v1782_v28  ;;  %v1530_v61 = vld [vmem:[%s2220_s5 + $0x8] sm:$0xff]  }
 0x139   :  { %v156_v16 = vadd.f32 %v1220_v60, %v142_v27  ;;  %v1532_v62 = vld [vmem:[%s2220_s5 + $0x88] sm:$0xff]  }
 0x13a   :  { %v162_v6 = vpack.c.bf16 %v155_v63, %v154_v20  ;;  %v143_v9 = vmul.f32 %v1219_v53, %v129_v1  ;;  %v1533_v20 = vld [vmem:[%s2220_s5 + $0x40] sm:$0xff]  }
 0x13b   :  { %v1546_v12 = vpop.eup %1545  ;;  %v1535_v63 = vld [vmem:[%s2220_s5 + $0xc0] sm:$0xff]  }
 0x13c   :  { %413 = vmatmul.mubr.bf16.vlgmr.msra.gmra.mxu0 %v162_v6  ;;  %486 = vmatmul.mubr.bf16.vlgmr.msra.gmra.mxu1 %v162_v6  ;;  %v1548_v13 = vpop.eup %1547  ;;  %v157_v14 = vadd.f32 %v1220_v60, %v143_v9  ;;  %v131_v15 = vmul.f32 %v1546_v12, %v1792_v36  ;;  %v1536_v1 = vld [vmem:[%s2220_s5 + $0x80] sm:$0xff]   ;;  %v200_v6 = vlaneseq }
 0x13d   :  { %422 = vmatprep.mubr.bf16.mxu0 %v1681_v18  ;;  %495 = vmatprep.mubr.bf16.mxu1 %v1681_v18  ;;  %v130_v17 = vmul.f32 %v1548_v13, %v1789_v35  ;;  %v198_v13 = vld [vmem:[%s2221_s4] sm:$0xf] }
 0x13e   :  { %v163_v21 = vpack.c.bf16 %v157_v14, %v156_v16  ;;  %v145_v19 = vmul.f32 %v1219_v53, %v131_v15  ;;  %v201_v9 = vshrl.u32 %v200_v6, 7 }
 0x13f   :  { %v1550_v28 = vpop.eup %1549  ;;  %v144_v23 = vmul.f32 %v1219_v53, %v130_v17 }
 0x140   :  { %v1552_v22 = vpop.eup %1551  ;;  %v159_v24 = vadd.f32 %v1220_v60, %v145_v19  ;;  %v133_v25 = vmul.f32 %v1550_v28, %v1802_v44  ;;  %v1505_v44 = vld [vmem:[%s2220_s5 + $0x78] sm:$0xff]   ;;  %v202_v12 = vsub.s32 0, %v201_v9  ;;  %v210_v27 = vsub.s32 2, %v201_v9 }
 0x141   :  { %v158_v26 = vadd.f32 %v1220_v60, %v144_v23  ;;  %v132_v36 = vmul.f32 %v1552_v22, %v1799_v43  ;;  %v1506_v43 = vld [vmem:[%s2220_s5 + $0x38] sm:$0xff]   ;;  %1376 = vmatprep.subr.bf16.mxu0 %v1505_v44  ;;  %v206_v14 = vsub.s32 1, %v201_v9  ;;  %v214_v15 = vsub.s32 3, %v201_v9 }
 0x142   :  { %v147_v30 = vmul.f32 %v1219_v53, %v133_v25  ;;  %1377 = vmatpush3.bf16.msra.mxu0 %v1506_v43  ;;  %v2015_v16 = vrot.slane %v198_v13, %v202_v12  ;;  %v2017_v17 = vrot.slane %v198_v13, %v210_v27 }
 0x143   :  { %v164_v29 = vpack.c.bf16 %v159_v24, %v158_v26  ;;  %v146_v35 = vmul.f32 %v1219_v53, %v132_v36  ;;  %1378 = vmatprep.subr.bf16.mxu0 %v1509_v37  ;;  %v1522_v53 = vld [vmem:[%s2220_s5 + $0x18] sm:$0xff]   ;;  %v2021_v19 = vrot.slane %v198_v13, %v214_v15 }
 0x144   :  { %423 = vmatmul.mubr.bf16.gmra.mxu0 %v163_v21  ;;  %496 = vmatmul.mubr.bf16.gmra.mxu1 %v163_v21  ;;  %v161_v31 = vadd.f32 %v1220_v60, %v147_v30  ;;  %v2019_v21 = vrot.slane %v198_v13, %v206_v14 }
 0x145   :  { %432 = vmatprep.mubr.bf16.mxu0 %v1681_v18  ;;  %505 = vmatprep.mubr.bf16.mxu1 %v1681_v18  ;;  %v160_v32 = vadd.f32 %v1220_v60, %v146_v35  ;;  %v1531_v60 = vld [vmem:[%s2220_s5 + $0xc8] sm:$0xff]  }
 0x146   :  { %1379 = vmatpush3.bf16.msra.mxu0 %v1510_v39 }
 0x147   :  { %v165_v33 = vpack.c.bf16 %v161_v31, %v160_v32  ;;  %1380 = vmatprep.subr.bf16.mxu0 %v1513_v41 }
 0x14a   :  { %1381 = vmatpush3.bf16.msra.mxu0 %v1514_v45 }
 0x14b   :  { %1382 = vmatprep.subr.bf16.mxu0 %v1517_v47 }
 0x14c   :  { %433 = vmatmul.mubr.bf16.gmra.mxu0 %v164_v29  ;;  %506 = vmatmul.mubr.bf16.gmra.mxu1 %v164_v29 }
 0x14d   :  { %442 = vmatprep.mubr.bf16.mxu0 %v1681_v18  ;;  %515 = vmatprep.mubr.bf16.mxu1 %v1681_v18  ;;  %v1508_v18 = vld [vmem:[%s2220_s5 + $0xb8] sm:$0xff]  }
 0x14e   :  { %1417 = vmatpush3.bf16.msra.mxu1 %v1508_v18  ;;  %1383 = vmatpush3.bf16.msra.mxu0 %v1518_v49 }
 0x14f   :  { %1418 = vmatprep.subr.bf16.mxu1 %v1511_v38  ;;  %1384 = vmatprep.subr.bf16.mxu0 %v1521_v51 }
 0x152   :  { %1419 = vmatpush3.bf16.msra.mxu1 %v1512_v40  ;;  %1385 = vmatpush3.bf16.msra.mxu0 %v1522_v53 }
 0x153   :  { %1420 = vmatprep.subr.bf16.mxu1 %v1515_v42  ;;  %1386 = vmatprep.subr.bf16.mxu0 %v1525_v55 }
 0x154   :  { %443 = vmatmul.mubr.bf16.gmra.mxu0 %v165_v33  ;;  %516 = vmatmul.mubr.bf16.gmra.mxu1 %v165_v33 }
 0x156   :  { %1421 = vmatpush3.bf16.msra.mxu1 %v1516_v46  ;;  %1387 = vmatpush3.bf16.msra.mxu0 %v1526_v57 }
 0x157   :  { %1422 = vmatprep.subr.bf16.mxu1 %v1519_v48  ;;  %1388 = vmatprep.subr.bf16.mxu0 %v1529_v59 }
 0x15a   :  { %1423 = vmatpush3.bf16.msra.mxu1 %v1520_v50  ;;  %1389 = vmatpush3.bf16.msra.mxu0 %v1530_v61 }
 0x15b   :  { %1424 = vmatprep.subr.bf16.mxu1 %v1523_v52  ;;  %1390 = vmatprep.subr.bf16.mxu0 %v1533_v20 }
 0x15e   :  { %1425 = vmatpush3.bf16.msra.mxu1 %v1524_v54  ;;  %1391 = vmatpush3.bf16.msra.mxu0 %v1534_v0 }
 0x15f   :  { %1426 = vmatprep.subr.bf16.mxu1 %v1527_v56 }
 0x162   :  { %1427 = vmatpush3.bf16.msra.mxu1 %v1528_v58 }
 0x163   :  { %1428 = vmatprep.subr.bf16.mxu1 %v1531_v60 }
 0x166   :  { %1429 = vmatpush3.bf16.msra.mxu1 %v1532_v62 }
 0x167   :  { %1430 = vmatprep.subr.bf16.mxu1 %v1535_v63 }
 0x16a   :  { %1431 = vmatpush3.bf16.msra.mxu1 %v1536_v1 }
 0x1fc   :  { %v414_v28 = vpop.f32.mrf.mxu0  ;;  %v487_v22 = vpop.f32.mrf.mxu1 }
 0x1fd   :  { %v2024_v23 = vadd.f32 %v414_v28, %v2015_v16  ;;  %v2027_v24 = vadd.f32 %v487_v22, %v2017_v17 }
 0x1fe   :  { %v416_v25 = vpop.f32.mrf.mxu0  ;;  %v489_v26 = vpop.f32.mrf.mxu1 }
 0x1ff   :  { %v1253_v36 = vmul.f32 -1.442695, %v2024_v23  ;;  %v1255_v29 = vmul.f32 -1.442695, %v2027_v24  ;;  %v2032_v30 = vadd.f32 %v416_v25, %v2019_v21  ;;  %v2035_v35 = vadd.f32 %v489_v26, %v2021_v19 }
 0x200   :  { %v418_v31 = vpop.f32.mrf.mxu0  ;;  %v491_v32 = vpop.f32.mrf.mxu1 }
 0x201   :  { %1553 = vpow2.f32 %v1253_v36  ;;  %v1254_v33 = vmul.f32 -1.442695, %v2032_v30  ;;  %v1256_v44 = vmul.f32 -1.442695, %v2035_v35  ;;  %v2040_v43 = vadd.f32 %v418_v31, %v2015_v16 }
 0x202   :  { %1555 = vpow2.f32 %v1255_v29  ;;  %v2043_v34 = vadd.f32 %v491_v32, %v2017_v17  ;;  %v420_v18 = vpop.f32.mrf.mxu0  ;;  %v493_v37 = vpop.f32.mrf.mxu1 }
 0x203   :  { %1557 = vpow2.f32 %v1254_v33  ;;  %v1257_v38 = vmul.f32 -1.442695, %v2040_v43  ;;  %v2047_v39 = vadd.f32 %v420_v18, %v2019_v21  ;;  %v2050_v40 = vadd.f32 %v493_v37, %v2021_v19 }
 0x204   :  { %1559 = vpow2.f32 %v1256_v44  ;;  %v1259_v41 = vmul.f32 -1.442695, %v2043_v34  ;;  %v424_v42 = vpop.f32.mrf.mxu0  ;;  %v497_v45 = vpop.f32.mrf.mxu1 }
 0x205   :  { %1561 = vpow2.f32 %v1257_v38  ;;  %v1258_v46 = vmul.f32 -1.442695, %v2047_v39  ;;  %v1260_v47 = vmul.f32 -1.442695, %v2050_v40  ;;  %v2056_v48 = vadd.f32 %v424_v42, %v2015_v16 }
 0x206   :  { %1563 = vpow2.f32 %v1259_v41  ;;  %v2059_v49 = vadd.f32 %v497_v45, %v2017_v17  ;;  %v426_v50 = vpop.f32.mrf.mxu0  ;;  %v499_v51 = vpop.f32.mrf.mxu1 }
 0x207   :  { %1565 = vpow2.f32 %v1258_v46  ;;  %v1261_v52 = vmul.f32 -1.442695, %v2056_v48  ;;  %v2063_v53 = vadd.f32 %v426_v50, %v2019_v21  ;;  %v2066_v54 = vadd.f32 %v499_v51, %v2021_v19 }
 0x208   :  { %1567 = vpow2.f32 %v1260_v47  ;;  %v1263_v55 = vmul.f32 -1.442695, %v2059_v49  ;;  %v428_v56 = vpop.f32.mrf.mxu0  ;;  %v501_v57 = vpop.f32.mrf.mxu1 }
 0x209   :  { %1569 = vpow2.f32 %v1261_v52  ;;  %v1262_v58 = vmul.f32 -1.442695, %v2063_v53  ;;  %v1264_v59 = vmul.f32 -1.442695, %v2066_v54  ;;  %v2072_v60 = vadd.f32 %v428_v56, %v2015_v16 }
 0x20a   :  { %1571 = vpow2.f32 %v1263_v55  ;;  %v2075_v61 = vadd.f32 %v501_v57, %v2017_v17  ;;  %v430_v62 = vpop.f32.mrf.mxu0  ;;  %v503_v20 = vpop.f32.mrf.mxu1 }
 0x20b   :  { %1573 = vpow2.f32 %v1262_v58  ;;  %v1265_v63 = vmul.f32 -1.442695, %v2072_v60  ;;  %v2079_v0 = vadd.f32 %v430_v62, %v2019_v21  ;;  %v2082_v1 = vadd.f32 %v503_v20, %v2021_v19 }
 0x20c   :  { %1575 = vpow2.f32 %v1264_v59  ;;  %v1267_v6 = vmul.f32 -1.442695, %v2075_v61  ;;  %v434_v9 = vpop.f32.mrf.mxu0  ;;  %v507_v12 = vpop.f32.mrf.mxu1 }
 0x20d   :  { %1577 = vpow2.f32 %v1265_v63  ;;  %v1266_v27 = vmul.f32 -1.442695, %v2079_v0  ;;  %v1268_v13 = vmul.f32 -1.442695, %v2082_v1  ;;  %v2088_v55 = vadd.f32 %v434_v9, %v2015_v16 }
 0x20e   :  { %v1554_v14 = vpop.eup %1553  ;;  %1579 = vpow2.f32 %v1267_v6  ;;  %v436_v15 = vpop.f32.mrf.mxu0  ;;  %v2091_v58 = vadd.f32 %v507_v12, %v2017_v17 }
 0x20f   :  { %v509_v28 = vpop.f32.mrf.mxu1  ;;  %v1556_v22 = vpop.eup %1555  ;;  %v622_v25 = vadd.f32 1.0, %v1554_v14  ;;  %1581 = vpow2.f32 %v1266_v27  ;;  %v1269_v9 = vmul.f32 -1.442695, %v2088_v55  ;;  %v2096_v12 = vadd.f32 %v436_v15, %v2019_v21 }
 0x210   :  { %v1558_v26 = vpop.eup %1557  ;;  %v624_v36 = vadd.f32 1.0, %v1556_v22  ;;  %1583 = vpow2.f32 %v1268_v13  ;;  %v438_v29 = vpop.f32.mrf.mxu0 }
 0x211   :  { %v1560_v31 = vpop.eup %1559  ;;  %1585 = vrcp.f32 %v622_v25  ;;  %v623_v32 = vadd.f32 1.0, %v1558_v26  ;;  %v511_v33 = vpop.f32.mrf.mxu1  ;;  %v1271_v26 = vmul.f32 -1.442695, %v2091_v58 }
 0x212   :  { %v1562_v44 = vpop.eup %1561  ;;  %1587 = vrcp.f32 %v624_v36  ;;  %v625_v18 = vadd.f32 1.0, %v1560_v31  ;;  %v440_v45 = vpop.f32.mrf.mxu0 }
 0x213   :  { %v1564_v37 = vpop.eup %1563  ;;  %1589 = vrcp.f32 %v623_v32  ;;  %v626_v38 = vadd.f32 1.0, %v1562_v44  ;;  %v513_v50 = vpop.f32.mrf.mxu1  ;;  %v2099_v32 = vadd.f32 %v509_v28, %v2021_v19  ;;  %v2102_v44 = vadd.f32 %v438_v29, %v2015_v16 }
 0x214   :  { %v1566_v41 = vpop.eup %1565  ;;  %1591 = vrcp.f32 %v625_v18  ;;  %v628_v42 = vadd.f32 1.0, %v1564_v37  ;;  %v444_v20 = vpop.f32.mrf.mxu0  ;;  %v2111_v28 = vadd.f32 %v513_v50, %v2021_v19 }
 0x215   :  { %v1568_v46 = vpop.eup %1567  ;;  %1593 = vrcp.f32 %v626_v38  ;;  %v627_v47 = vadd.f32 1.0, %v1566_v41  ;;  %v517_v27 = vpop.f32.mrf.mxu1  ;;  %v2105_v41 = vadd.f32 %v511_v33, %v2017_v17  ;;  %v2114_v29 = vadd.f32 %v444_v20, %v2015_v16 }
 0x216   :  { %v1570_v51 = vpop.eup %1569  ;;  %1595 = vrcp.f32 %v628_v42  ;;  %v629_v52 = vadd.f32 1.0, %v1568_v46  ;;  %v446_v18 = vpop.f32.mrf.mxu0  ;;  %v2108_v42 = vadd.f32 %v440_v45, %v2019_v21  ;;  %v2118_v33 = vadd.f32 %v517_v27, %v2017_v17 }
 0x217   :  { %v1572_v56 = vpop.eup %1571  ;;  %1597 = vrcp.f32 %v627_v47  ;;  %v630_v57 = vadd.f32 1.0, %v1570_v51  ;;  %v519_v15 = vpop.f32.mrf.mxu1  ;;  %v2121_v45 = vadd.f32 %v446_v18, %v2019_v21  ;;  %v1273_v20 = vmul.f32 -1.442695, %v2102_v44 }
 0x218   :  { %v1574_v59 = vpop.eup %1573  ;;  %1599 = vrcp.f32 %v629_v52  ;;  %v632_v62 = vadd.f32 1.0, %v1572_v56  ;;  %v1270_v52 = vmul.f32 -1.442695, %v2096_v12  ;;  %v2125_v50 = vadd.f32 %v519_v15, %v2021_v19 }
 0x219   :  { %v1576_v63 = vpop.eup %1575  ;;  %1601 = vrcp.f32 %v630_v57  ;;  %v631_v6 = vadd.f32 1.0, %v1574_v59  ;;  %v1272_v57 = vmul.f32 -1.442695, %v2099_v32  ;;  %v448_v59 = vpop.f32.mrf.mxu0 }
 0x21a   :  { %v1578_v13 = vpop.eup %1577  ;;  %1603 = vrcp.f32 %v632_v62  ;;  %v633_v14 = vadd.f32 1.0, %v1576_v63  ;;  %v1275_v63 = vmul.f32 -1.442695, %v2105_v41 }
 0x21b   :  { %v1580_v22 = vpop.eup %1579  ;;  %1605 = vrcp.f32 %v631_v6  ;;  %v634_v25 = vadd.f32 1.0, %v1578_v13  ;;  %v521_v6 = vpop.f32.mrf.mxu1  ;;  %v1274_v13 = vmul.f32 -1.442695, %v2108_v42 }
 0x21c   :  { %v1582_v36 = vpop.eup %1581  ;;  %1607 = vrcp.f32 %v633_v14  ;;  %v636_v31 = vadd.f32 1.0, %v1580_v22  ;;  %v1276_v14 = vmul.f32 -1.442695, %v2111_v28  ;;  %v1277_v22 = vmul.f32 -1.442695, %v2114_v29  ;;  %v450_v15 = vpop.f32.mrf.mxu0 }
 0x21d   :  { %v1584_v37 = vpop.eup %1583  ;;  %1609 = vrcp.f32 %v634_v25  ;;  %v635_v38 = vadd.f32 1.0, %v1582_v36  ;;  %v1279_v36 = vmul.f32 -1.442695, %v2118_v33 }
 0x21e   :  { %v1586_v46 = vpop.eup %1585  ;;  %1611 = vrcp.f32 %v636_v31  ;;  %v637_v47 = vadd.f32 1.0, %v1584_v37  ;;  %v1278_v31 = vmul.f32 -1.442695, %v2121_v45 }
 0x21f   :  { %v1588_v51 = vpop.eup %1587  ;;  %1613 = vrcp.f32 %v635_v38  ;;  %v2140_v38 = vadd.f32 %v521_v6, %v2017_v17  ;;  %v718_v8 = vmul.f32 %v1586_v46, %v2024_v23 }
 0x220   :  { %v1590_v56 = vpop.eup %1589  ;;  %1615 = vrcp.f32 %v637_v47  ;;  %v720_v6 = vmul.f32 %v1588_v51, %v2027_v24 }
 0x221   :  { %v1592_v62 = vpop.eup %1591  ;;  %1617 = vpow2.f32 %v1269_v9  ;;  %v2135_v9 = vadd.f32 %v448_v59, %v2015_v16  ;;  %v523_v16 = vpop.f32.mrf.mxu1  ;;  %v1283_v24 = vmul.f32 -1.442695, %v2140_v38 }
 0x222   :  { %v1594_v27 = vpop.eup %1593  ;;  %1619 = vpow2.f32 %v1271_v26  ;;  %v1280_v26 = vmul.f32 -1.442695, %v2125_v50 }
 0x223   :  { %v1596_v25 = vpop.eup %1595  ;;  %1621 = vpow2.f32 %v1270_v52  ;;  %v722_v37 = vmul.f32 %v1594_v27, %v2040_v43  ;;  %v719_v52 = vmul.f32 %v1590_v56, %v2032_v30  ;;  %v721_v43 = vmul.f32 %v1592_v62, %v2035_v35 }
 0x224   :  { %v1598_v18 = vpop.eup %1597  ;;  %1623 = vpow2.f32 %v1272_v57  ;;  %v724_v11 = vmul.f32 %v1596_v25, %v2043_v34  ;;  %v2150_v30 = vadd.f32 %v450_v15, %v2019_v21 }
 0x225   :  { %v1600_v47 = vpop.eup %1599  ;;  %v723_v10 = vmul.f32 %v1598_v18, %v2047_v39  ;;  %1625 = vpow2.f32 %v1273_v20  ;;  %v750_v39 = vpack.c.bf16 %v722_v37, %v718_v8  ;;  %v2153_v20 = vadd.f32 %v523_v16, %v2021_v19 }
 0x226   :  { %v1602_v59 = vpop.eup %1601  ;;  %v725_v57 = vmul.f32 %v1600_v47, %v2050_v40  ;;  %1627 = vpow2.f32 %v1275_v63  ;;  %v752_v35 = vpack.c.bf16 %v724_v11, %v720_v6  ;;  %v1281_v40 = vmul.f32 -1.442695, %v2135_v9 }
 0x227   :  { %v1604_v17 = vpop.eup %1603  ;;  %1629 = vpow2.f32 %v1274_v13  ;;  %v751_v34 = vpack.c.bf16 %v723_v10, %v719_v52  ;;  %v1282_v8 = vmul.f32 -1.442695, %v2150_v30  ;;  %v1284_v11 = vmul.f32 -1.442695, %v2153_v20 }
 0x228   :  { %v1606_v56 = vpop.eup %1605  ;;  %1631 = vpow2.f32 %v1276_v14  ;;  %v753_v23 = vpack.c.bf16 %v725_v57, %v721_v43 }
 0x229   :  { %v1608_v46 = vpop.eup %1607  ;;  %1633 = vpow2.f32 %v1277_v22  ;;  %1061 = vmatprep.mubr.bf16.mxu0 %v751_v34  ;;  %v727_v63 = vmul.f32 %v1606_v56, %v2063_v53  ;;  %v726_v22 = vmul.f32 %v1602_v59, %v2056_v48 }
 0x22a   :  { %v1610_v62 = vpop.eup %1609  ;;  %1635 = vpow2.f32 %v1279_v36  ;;  %1126 = vmatprep.mubr.bf16.mxu1 %v753_v23  ;;  %1062 = vmatmul.mubr.bf16.vlgmr.msra.gmra.mxu0 %v750_v39  ;;  %v729_v25 = vmul.f32 %v1608_v46, %v2066_v54 }
 0x22b   :  { %v1612_v10 = vpop.eup %1611  ;;  %1637 = vpow2.f32 %v1278_v31  ;;  %1127 = vmatmul.mubr.bf16.vlgmr.msra.gmra.mxu1 %v752_v35  ;;  %v730_v19 = vmul.f32 %v1610_v62, %v2072_v60  ;;  %v728_v31 = vmul.f32 %v1604_v17, %v2059_v49 }
 0x22c   :  { %v1614_v21 = vpop.eup %1613  ;;  %1639 = vpow2.f32 %v1280_v26  ;;  %v732_v27 = vmul.f32 %v1612_v10, %v2075_v61 }
 0x22d   :  { %v1616_v51 = vpop.eup %1615  ;;  %v731_v13 = vmul.f32 %v1614_v21, %v2079_v0  ;;  %1641 = vpow2.f32 %v1281_v40  ;;  %v754_v0 = vpack.c.bf16 %v730_v19, %v726_v22 }
 0x22e   :  { %v1618_v14 = vpop.eup %1617  ;;  %v733_v36 = vmul.f32 %v1616_v51, %v2082_v1  ;;  %1643 = vpow2.f32 %v1283_v24  ;;  %v756_v48 = vpack.c.bf16 %v732_v27, %v728_v31 }
 0x22f   :  { %v1620_v60 = vpop.eup %1619  ;;  %v638_v18 = vadd.f32 1.0, %v1618_v14  ;;  %1645 = vpow2.f32 %v1282_v8  ;;  %v755_v37 = vpack.c.bf16 %v731_v13, %v727_v63 }
 0x230   :  { %v1622_v53 = vpop.eup %1621  ;;  %v640_v26 = vadd.f32 1.0, %v1620_v60  ;;  %1647 = vpow2.f32 %v1284_v11  ;;  %v757_v61 = vpack.c.bf16 %v733_v36, %v729_v25 }
 0x231   :  { %v1624_v15 = vpop.eup %1623  ;;  %1649 = vrcp.f32 %v638_v18  ;;  %v639_v47 = vadd.f32 1.0, %v1622_v53  ;;  %1069 = vmatprep.mubr.bf16.mxu0 %v755_v37 }
 0x232   :  { %v1626_v54 = vpop.eup %1625  ;;  %1651 = vrcp.f32 %v640_v26  ;;  %v641_v1 = vadd.f32 1.0, %v1624_v15  ;;  %1134 = vmatprep.mubr.bf16.mxu1 %v757_v61  ;;  %1070 = vmatmul.mubr.bf16.gmra.mxu0 %v754_v0 }
 0x233   :  { %v1628_v52 = vpop.eup %1627  ;;  %1653 = vrcp.f32 %v639_v47  ;;  %v642_v49 = vadd.f32 1.0, %v1626_v54  ;;  %1135 = vmatmul.mubr.bf16.gmra.mxu1 %v756_v48 }
 0x234   :  { %v1630_v16 = vpop.eup %1629  ;;  %1655 = vrcp.f32 %v641_v1  ;;  %v644_v59 = vadd.f32 1.0, %v1628_v52 }
 0x235   :  { %v1632_v43 = vpop.eup %1631  ;;  %1657 = vrcp.f32 %v642_v49  ;;  %v643_v57 = vadd.f32 1.0, %v1630_v16 }
 0x236   :  { %v1634_v17 = vpop.eup %1633  ;;  %1659 = vrcp.f32 %v644_v59  ;;  %v645_v6 = vadd.f32 1.0, %v1632_v43 }
 0x237   :  { %v1636_v34 = vpop.eup %1635  ;;  %1661 = vrcp.f32 %v643_v57  ;;  %v646_v56 = vadd.f32 1.0, %v1634_v17 }
 0x238   :  { %v1638_v39 = vpop.eup %1637  ;;  %1663 = vrcp.f32 %v645_v6  ;;  %v648_v23 = vadd.f32 1.0, %v1636_v34 }
 0x239   :  { %v1640_v46 = vpop.eup %1639  ;;  %1665 = vrcp.f32 %v646_v56  ;;  %v647_v35 = vadd.f32 1.0, %v1638_v39 }
 0x23a   :  { %v1642_v40 = vpop.eup %1641  ;;  %1667 = vrcp.f32 %v648_v23  ;;  %v649_v62 = vadd.f32 1.0, %v1640_v46 }
 0x23b   :  { %v1644_v24 = vpop.eup %1643  ;;  %1669 = vrcp.f32 %v647_v35  ;;  %v650_v10 = vadd.f32 1.0, %v1642_v40 }
 0x23c   :  { %v1646_v8 = vpop.eup %1645  ;;  %1671 = vrcp.f32 %v649_v62  ;;  %v652_v21 = vadd.f32 1.0, %v1644_v24 }
 0x23d   :  { %v1648_v19 = vpop.eup %1647  ;;  %1673 = vrcp.f32 %v650_v10  ;;  %v651_v11 = vadd.f32 1.0, %v1646_v8 }
 0x23e   :  { %v1650_v51 = vpop.eup %1649  ;;  %1675 = vrcp.f32 %v652_v21  ;;  %v653_v63 = vadd.f32 1.0, %v1648_v19 }
 0x23f   :  { %v1652_v27 = vpop.eup %1651  ;;  %1677 = vrcp.f32 %v651_v11  ;;  %v734_v61 = vmul.f32 %v1650_v51, %v2088_v55 }
 0x240   :  { %v1654_v13 = vpop.eup %1653  ;;  %1679 = vrcp.f32 %v653_v63  ;;  %v736_v48 = vmul.f32 %v1652_v27, %v2091_v58 }
 0x241   :  { %v1656_v14 = vpop.eup %1655  ;;  %v735_v18 = vmul.f32 %v1654_v13, %v2096_v12 }
 0x242   :  { %v1658_v22 = vpop.eup %1657  ;;  %v737_v0 = vmul.f32 %v1656_v14, %v2099_v32 }
 0x243   :  { %v1660_v25 = vpop.eup %1659  ;;  %v738_v60 = vmul.f32 %v1658_v22, %v2102_v44 }
 0x244   :  { %v1662_v36 = vpop.eup %1661  ;;  %v740_v37 = vmul.f32 %v1660_v25, %v2105_v41 }
 0x245   :  { %v1664_v31 = vpop.eup %1663  ;;  %v739_v53 = vmul.f32 %v1662_v36, %v2108_v42  ;;  %v758_v52 = vpack.c.bf16 %v738_v60, %v734_v61 }
 0x246   :  { %v1666_v26 = vpop.eup %1665  ;;  %v741_v15 = vmul.f32 %v1664_v31, %v2111_v28  ;;  %v760_v12 = vpack.c.bf16 %v740_v37, %v736_v48 }
 0x247   :  { %v1668_v47 = vpop.eup %1667  ;;  %v759_v54 = vpack.c.bf16 %v739_v53, %v735_v18  ;;  %v742_v43 = vmul.f32 %v1666_v26, %v2114_v29  ;;  %v2186_v29 = vld [vmem:[%s2222_s6] ss:$0 sm:$0xff] }
 0x248   :  { %v1670_v1 = vpop.eup %1669  ;;  %v761_v44 = vpack.c.bf16 %v741_v15, %v737_v0  ;;  %v744_v6 = vmul.f32 %v1668_v47, %v2118_v33 }
 0x249   :  { %v1672_v49 = vpop.eup %1671  ;;  %1077 = vmatprep.mubr.bf16.mxu0 %v759_v54  ;;  %v743_v28 = vmul.f32 %v1670_v1, %v2121_v45 }
 0x24a   :  { %v1674_v41 = vpop.eup %1673  ;;  %1142 = vmatprep.mubr.bf16.mxu1 %v761_v44  ;;  %1078 = vmatmul.mubr.bf16.gmra.mxu0 %v758_v52  ;;  %v745_v57 = vmul.f32 %v1672_v49, %v2125_v50 }
 0x24b   :  { %v1676_v42 = vpop.eup %1675  ;;  %1143 = vmatmul.mubr.bf16.gmra.mxu1 %v760_v12  ;;  %v746_v32 = vmul.f32 %v1674_v41, %v2135_v9 }
 0x24c   :  { %v1678_v55 = vpop.eup %1677  ;;  %v748_v58 = vmul.f32 %v1676_v42, %v2140_v38 }
 0x24d   :  { %v1680_v16 = vpop.eup %1679  ;;  %v747_v59 = vmul.f32 %v1678_v55, %v2150_v30  ;;  %v762_v39 = vpack.c.bf16 %v746_v32, %v742_v43 }
 0x24e   :  { %v749_v17 = vmul.f32 %v1680_v16, %v2153_v20  ;;  %v764_v9 = vpack.c.bf16 %v748_v58, %v744_v6 }
 0x24f   :  { %v763_v34 = vpack.c.bf16 %v747_v59, %v743_v28 }
 0x250   :  { %v765_v56 = vpack.c.bf16 %v749_v17, %v745_v57 }
 0x251   :  { %1085 = vmatprep.mubr.bf16.mxu0 %v763_v34 }
 0x252   :  { %1150 = vmatprep.mubr.bf16.mxu1 %v765_v56  ;;  %1086 = vmatmul.mubr.bf16.gmra.mxu0 %v762_v39 }
 0x253   :  { %1151 = vmatmul.mubr.bf16.gmra.mxu1 %v764_v9 }
 0x2ea   :  { %v1392_v45 = vpop.f32.mrf.mxu0 }
 0x2eb   :  { %v1432_v38 = vpop.f32.mrf.mxu1 }
 0x2ec   :  { %v1393_v50 = vpop.f32.mrf.mxu0 }
 0x2ed   :  { %v1394_v30 = vadd.f32 %v1393_v50, %v1392_v45  ;;  %v1433_v20 = vpop.f32.mrf.mxu1 }
 0x2ee   :  { %v1395_v23 = vpop.f32.mrf.mxu0  ;;  %v1434_v46 = vadd.f32 %v1433_v20, %v1432_v38 }
 0x2ef   :  { %v1064_v33 = vadd.f32 %v1394_v30, %v2186_v29  ;;  %v1435_v35 = vpop.f32.mrf.mxu1 }
 0x2f0   :  { %v1396_v40 = vpop.f32.mrf.mxu0 }
 0x2f1   :  { %v1129_v62 = vadd.f32 %v1434_v46, %v1064_v33  ;;  %v1397_v24 = vadd.f32 %v1396_v40, %v1395_v23  ;;  %v1436_v10 = vpop.f32.mrf.mxu1  ;;  %v2230_v40 = vld [vmem:[#allocation2_spill] sm:$0xff] }
 0x2f2   :  { %v1398_v8 = vpop.f32.mrf.mxu0  ;;  %v1437_v19 = vadd.f32 %v1436_v10, %v1435_v35 }
 0x2f3   :  { %v1067_v21 = vadd.f32 %v1397_v24, %v2186_v29  ;;  %v1438_v11 = vpop.f32.mrf.mxu1  ;;  %v1159_v63 = vmul.f32 0.5, %v1129_v62 }
 0x2f4   :  { %v1399_v51 = vpop.f32.mrf.mxu0 }
 0x2f5   :  { %v1132_v27 = vadd.f32 %v1437_v19, %v1067_v21  ;;  %v1400_v13 = vadd.f32 %v1399_v51, %v1398_v8  ;;  %v1439_v14 = vpop.f32.mrf.mxu1  ;;  %v1167_v37 = vadd.f32 %v1728_v2, %v1159_v63 }
 0x2f6   :  { %v1401_v22 = vpop.f32.mrf.mxu0  ;;  %v1440_v60 = vadd.f32 %v1439_v14, %v1438_v11 }
 0x2f7   :  { %v1160_v25 = vmul.f32 0.5, %v1132_v27  ;;  %v1072_v36 = vadd.f32 %v1400_v13, %v2186_v29  ;;  %v1441_v31 = vpop.f32.mrf.mxu1  ;;  %v2231_v13 = vld [vmem:[#allocation3_spill] sm:$0xff] }
 0x2f8   :  { %v1402_v18 = vpop.f32.mrf.mxu0 }
 0x2f9   :  { %v1168_v53 = vadd.f32 %v1734_v4, %v1160_v25  ;;  %v1137_v26 = vadd.f32 %v1440_v60, %v1072_v36  ;;  %v1403_v61 = vadd.f32 %v1402_v18, %v1401_v22  ;;  %v1442_v0 = vpop.f32.mrf.mxu1  ;;  %v2232_v22 = vld [vmem:[#allocation4_spill] sm:$0xff] }
 0x2fa   :  { %v1443_v48 = vadd.f32 %v1442_v0, %v1441_v31 }
 0x2fb   :  { %v1353_v15 = vpack.c.bf16 %v1168_v53, %v1167_v37  ;;  %v1075_v47 = vadd.f32 %v1403_v61, %v2186_v29  ;;  %v1161_v54 = vmul.f32 0.5, %v1137_v26 }
 0x2fd   :  { %1354 = vst [vmem:[%s2223_s7] sm:$0xff] %v1353_v15   ;;  %v1140_v1 = vadd.f32 %v1443_v48, %v1075_v47  ;;  %v1169_v52 = vadd.f32 %v1730_v3, %v1161_v54 }
 0x2ff   :  { %v1162_v44 = vmul.f32 0.5, %v1140_v1 }
 0x301   :  { %v1170_v2 = vadd.f32 %v1736_v5, %v1162_v44 }
 0x303   :  { %v1358_v49 = vpack.c.bf16 %v1170_v2, %v1169_v52 }
 0x305   :  { %1373 = vst [vmem:[%s2223_s7 + $0x8] sm:$0xff] %v1358_v49  }
 0x30a   :  { %v1404_v4 = vpop.f32.mrf.mxu0 }
 0x30b   :  { %v1444_v12 = vpop.f32.mrf.mxu1 }
 0x30c   :  { %v1405_v41 = vpop.f32.mrf.mxu0 }
 0x30d   :  { %v1406_v42 = vadd.f32 %v1405_v41, %v1404_v4  ;;  %v1445_v55 = vpop.f32.mrf.mxu1 }
 0x30e   :  { %v1407_v32 = vpop.f32.mrf.mxu0  ;;  %v1446_v28 = vadd.f32 %v1445_v55, %v1444_v12 }
 0x30f   :  { %v1080_v16 = vadd.f32 %v1406_v42, %v2186_v29  ;;  %v1447_v58 = vpop.f32.mrf.mxu1 }
 0x310   :  { %v1408_v59 = vpop.f32.mrf.mxu0 }
 0x311   :  { %v1145_v43 = vadd.f32 %v1446_v28, %v1080_v16  ;;  %v1409_v3 = vadd.f32 %v1408_v59, %v1407_v32  ;;  %v1448_v57 = vpop.f32.mrf.mxu1 }
 0x312   :  { %v1410_v5 = vpop.f32.mrf.mxu0  ;;  %v1449_v6 = vadd.f32 %v1448_v57, %v1447_v58 }
 0x313   :  { %v1083_v17 = vadd.f32 %v1409_v3, %v2186_v29  ;;  %v1450_v34 = vpop.f32.mrf.mxu1  ;;  %v1163_v39 = vmul.f32 0.5, %v1145_v43 }
 0x314   :  { %v1411_v56 = vpop.f32.mrf.mxu0 }
 0x315   :  { %v1148_v9 = vadd.f32 %v1449_v6, %v1083_v17  ;;  %v1412_v45 = vadd.f32 %v1411_v56, %v1410_v5  ;;  %v1451_v38 = vpop.f32.mrf.mxu1  ;;  %v1171_v35 = vadd.f32 %v1743_v7, %v1163_v39 }
 0x316   :  { %v1413_v50 = vpop.f32.mrf.mxu0  ;;  %v1452_v23 = vadd.f32 %v1451_v38, %v1450_v34 }
 0x317   :  { %v1164_v30 = vmul.f32 0.5, %v1148_v9  ;;  %v1088_v20 = vadd.f32 %v1412_v45, %v2186_v29  ;;  %v1453_v33 = vpop.f32.mrf.mxu1 }
 0x318   :  { %v1414_v46 = vpop.f32.mrf.mxu0 }
 0x319   :  { %v1172_v62 = vadd.f32 %v2230_v40, %v1164_v30  ;;  %v1153_v24 = vadd.f32 %v1452_v23, %v1088_v20  ;;  %v1415_v10 = vadd.f32 %v1414_v46, %v1413_v50  ;;  %v1454_v8 = vpop.f32.mrf.mxu1 }
 0x31a   :  { %v1455_v11 = vadd.f32 %v1454_v8, %v1453_v33 }
 0x31b   :  { %v1363_v21 = vpack.c.bf16 %v1172_v62, %v1171_v35  ;;  %v1091_v19 = vadd.f32 %v1415_v10, %v2186_v29  ;;  %v1165_v51 = vmul.f32 0.5, %v1153_v24 }
 0x31d   :  { %1374 = vst [vmem:[%s2223_s7 + $0x10] sm:$0xff] %v1363_v21   ;;  %v1156_v63 = vadd.f32 %v1455_v11, %v1091_v19  ;;  %v1173_v14 = vadd.f32 %v2231_v13, %v1165_v51 }
 0x31f   :  { %v1166_v27 = vmul.f32 0.5, %v1156_v63 }
 0x321   :  { %v1174_v7 = vadd.f32 %v2232_v22, %v1166_v27 }
 0x323   :  { %v1368_v25 = vpack.c.bf16 %v1174_v7, %v1173_v14 }
 0x325   :  { %1375 = vst [vmem:[%s2223_s7 + $0x18] sm:$0xff] %v1368_v25  }

</bundles_post_ra>
